<compile_context>
chip_gen: v7x
topology: tpu7x:2x2x1
jax: 0.10.0
libtpu: 0.0.40
codegen_flags: <defaults>
</compile_context>

<pallas_src>
import functools

import jax
import jax.numpy as jnp
from jax.experimental import pallas as pl
from jax.experimental.pallas import tpu as pltpu

DIMENSION = 4          # in_channels of the discriminator's first conv
LEAKY_SLOPE = 0.2
BN_EPS = 1e-5
VMEM_LIMIT = 32 * 1024 * 1024   # safe on v5e/v6e/v7x; tiles below stay far under this


# ----------------------------------------------------------------------------
# Small helpers (static / trace-time)
# ----------------------------------------------------------------------------
def _round_up(x, m):
    return (x + m - 1) // m * m


def _pad_rows(m, max_tile=256):
    """Return (padded_rows, row_tile): rows padded to a multiple of the tile."""
    if m >= max_tile:
        m_pad = _round_up(m, max_tile)
        return m_pad, max_tile
    m_pad = _round_up(m, 8)
    return m_pad, m_pad


def _pick_tile(dim, max_t, unit):
    """Largest multiple of `unit` that divides `dim` and is <= max_t (dim % unit == 0)."""
    best = unit
    t = unit
    while t <= min(max_t, dim):
        if dim % t == 0:
            best = t
        t += unit
    return best


def _bce_with_ones_from_logits(z):
    """-log(sigmoid(z)) = softplus(-z), computed stably; clamped at 100 like torch BCE."""
    sp = jnp.maximum(-z, 0.0) + jnp.log(1.0 + jnp.exp(-jnp.abs(z)))
    return jnp.minimum(sp, 100.0)


def _flatten_rows128(x):
    """Flatten to a lane-dense (rows, 128) f32 array (rows padded to a multiple of 8)."""
    lane = 128
    f = x.astype(jnp.float32).reshape(-1)
    total = f.shape[0]
    rows = pl.cdiv(total, lane)
    rows_pad = _round_up(rows, 8)
    f = jnp.pad(f, (0, rows_pad * lane - total))
    return f.reshape(rows_pad, lane), total


# ----------------------------------------------------------------------------
# Pallas kernels
# ----------------------------------------------------------------------------
def _conv_mm_kernel(p_ref, w_ref, scale_ref, shift_ref, o_ref, *, apply_act):
    """(im2col-patches @ weight) over the full K in one block; BN(eval) affine +
    LeakyReLU fused; bf16 store."""
    y = jnp.dot(p_ref[...], w_ref[...], preferred_element_type=jnp.float32)
    y = y * scale_ref[...] + shift_ref[...]                     # (1, tn) broadcast, f32
    if apply_act:
        y = jnp.where(y >= 0.0, y, LEAKY_SLOPE * y)
    o_ref[...] = y.astype(o_ref.dtype)


def _tail_loss_kernel(p_ref, w4_ref, scale_ref, shift_ref, wc_ref, a_ref, d_ref, o_ref,
                      *, apply_act, m_valid, inv_mse_count):
    """Fused tail (single grid step):
       layer-4 matmul + BN + LeakyReLU
       -> final 3x3/Cout=1 conv on a 1x1 map == center-tap dot (VPU mul + lane reduce)
       -> adversarial term mean(BCE(sigmoid, 1)) - mean(sigmoid)
       -> + 100 * MSE content term."""
    h = jnp.dot(p_ref[...], w4_ref[...], preferred_element_type=jnp.float32)  # (M_pad, 512)
    h = h * scale_ref[...] + shift_ref[...]
    if apply_act:
        h = jnp.where(h >= 0.0, h, LEAKY_SLOPE * h)

    # Only the center tap of the final conv sees data (all other taps hit zero padding).
    logit = jnp.sum(h * wc_ref[...], axis=-1, keepdims=True)                  # (M_pad, 1)
    row = jax.lax.broadcasted_iota(jnp.int32, logit.shape, 0)
    valid = (row < m_valid).astype(jnp.float32)                               # mask pad rows
    prob = jax.nn.sigmoid(logit)
    bce = _bce_with_ones_from_logits(logit)
    adv = jnp.sum((bce - prob) * valid, keepdims=True) * (1.0 / m_valid)      # (1, 1)

    diff = a_ref[...] - d_ref[...]
    content = jnp.sum(diff * diff, keepdims=True) * inv_mse_count             # (1, 1)

    o_ref[...] = 100.0 * content + adv


def _logit_loss_kernel(p_ref, w_ref, a_ref, d_ref, o_ref, sum_ref,
                       *, tm, m_valid, inv_mse_count):
    """General-path final layer + loss: logit = patches . w_row (VPU mul + lane reduce),
    adversarial reduction accumulated over M tiles, MSE added once at step 0."""
    i = pl.program_id(0)

    @pl.when(i == 0)
    def _():
        diff = a_ref[...] - d_ref[...]
        sum_ref[...] = 100.0 * inv_mse_count * jnp.sum(diff * diff, keepdims=True)

    logit = jnp.sum(p_ref[...].astype(jnp.float32) * w_ref[...],
                    axis=-1, keepdims=True)                                   # (tm, 1)
    row = i * tm + jax.lax.broadcasted_iota(jnp.int32, (tm, 1), 0)
    valid = (row < m_valid).astype(jnp.float32)
    prob = jax.nn.sigmoid(logit)
    bce = _bce_with_ones_from_logits(logit)
    sum_ref[...] += jnp.sum((bce - prob) * valid, keepdims=True) * (1.0 / m_valid)

    @pl.when(i == pl.num_programs(0) - 1)
    def _():
        o_ref[...] = sum_ref[...]


# ----------------------------------------------------------------------------
# Wrappers
# ----------------------------------------------------------------------------
def _conv_layer_pallas(patches, w2d_pad_bf16, scale_pad, shift_pad, apply_act):
    """patches: bf16 (M, K); weight already padded/bf16 (K_pad, Cout_pad). K collapsed
    into a single block (no K grid axis); bf16 output."""
    M, K = patches.shape
    K_pad, Cout_pad = w2d_pad_bf16.shape

    M_pad, tm = _pad_rows(M, 256)
    p = jnp.pad(patches, ((0, M_pad - M), (0, K_pad - K)))      # stays bf16

    tn = _pick_tile(Cout_pad, 512, 128)
    grid = (M_pad // tm, Cout_pad // tn)

    kernel = functools.partial(_conv_mm_kernel, apply_act=apply_act)
    out = pl.pallas_call(
        kernel,
        out_shape=jax.ShapeDtypeStruct((M_pad, Cout_pad), jnp.bfloat16),
        grid=grid,
        in_specs=[
            pl.BlockSpec((tm, K_pad), lambda i, j: (i, 0)),
            pl.BlockSpec((K_pad, tn), lambda i, j: (0, j)),
            pl.BlockSpec((1, tn), lambda i, j: (0, j)),
            pl.BlockSpec((1, tn), lambda i, j: (0, j)),
        ],
        out_specs=pl.BlockSpec((tm, tn), lambda i, j: (i, j)),
        compiler_params=pltpu.CompilerParams(
            dimension_semantics=("parallel", "parallel"),
            vmem_limit_bytes=VMEM_LIMIT),
    )(p, w2d_pad_bf16, scale_pad, shift_pad)
    return out


def _fused_tail_loss(patches, w4, scale4, shift4, w_center, a2, d2,
                     m_valid, inv_mse_count, apply_act):
    """Fast path: layer-4 conv + final 1x1-map conv + adversarial + content, one call."""
    M, K = patches.shape
    K_pad, Cout = w4.shape
    M_pad = _round_up(max(M, 8), 8)
    p = jnp.pad(patches, ((0, M_pad - M), (0, K_pad - K)))      # bf16

    kernel = functools.partial(_tail_loss_kernel, apply_act=apply_act,
                               m_valid=m_valid, inv_mse_count=inv_mse_count)
    out = pl.pallas_call(
        kernel,
        out_shape=jax.ShapeDtypeStruct((1, 1), jnp.float32),
        grid=(1,),
        in_specs=[
            pl.BlockSpec((M_pad, K_pad), lambda i: (0, 0)),
            pl.BlockSpec((K_pad, Cout), lambda i: (0, 0)),
            pl.BlockSpec((1, Cout), lambda i: (0, 0)),
            pl.BlockSpec((1, Cout), lambda i: (0, 0)),
            pl.BlockSpec((1, Cout), lambda i: (0, 0)),
            pl.BlockSpec(a2.shape, lambda i: (0, 0)),
            pl.BlockSpec(d2.shape, lambda i: (0, 0)),
        ],
        out_specs=pl.BlockSpec((1, 1), lambda i: (0, 0)),
        compiler_params=pltpu.CompilerParams(
            dimension_semantics=("arbitrary",),
            vmem_limit_bytes=VMEM_LIMIT),
    )(p, w4, scale4, shift4, w_center, a2, d2)
    return out[0, 0]


def _logit_loss_pallas(patches, w_row, a2, d2, m_valid, inv_mse_count):
    """General path: logits from layer-5 im2col patches against a (1,K) weight row,
    plus the adversarial + content reductions; tiled over M."""
    M, K = patches.shape
    K_pad = w_row.shape[1]
    M_pad, tm = _pad_rows(M, 256)
    p = jnp.pad(patches, ((0, M_pad - M), (0, K_pad - K)))

    kernel = functools.partial(_logit_loss_kernel, tm=tm, m_valid=m_valid,
                               inv_mse_count=inv_mse_count)
    out = pl.pallas_call(
        kernel,
        out_shape=jax.ShapeDtypeStruct((1, 1), jnp.float32),
        grid=(M_pad // tm,),
        in_specs=[
            pl.BlockSpec((tm, K_pad), lambda i: (i, 0)),
            pl.BlockSpec((1, K_pad), lambda i: (0, 0)),
            pl.BlockSpec(a2.shape, lambda i: (0, 0)),
            pl.BlockSpec(d2.shape, lambda i: (0, 0)),
        ],
        out_specs=pl.BlockSpec((1, 1), lambda i: (0, 0)),
        scratch_shapes=[pltpu.VMEM((1, 1), jnp.float32)],
        compiler_params=pltpu.CompilerParams(
            dimension_semantics=("arbitrary",),
            vmem_limit_bytes=VMEM_LIMIT),
    )(p, w_row, a2, d2)
    return out[0, 0]


def _im2col_nhwc(x, stride):
    """x: (N, H, W, C) -> patches (N*Ho*Wo, 9*C) for a 3x3 conv, padding=1.

    Column order is (kh, kw, c) to match the (KH, KW, Cin, Cout) weight flattening.
    """
    N, H, W, C = x.shape
    xp = jnp.pad(x, ((0, 0), (1, 1), (1, 1), (0, 0)))
    Ho = (H + 2 - 3) // stride + 1
    Wo = (W + 2 - 3) // stride + 1
    cols = []
    for kh in range(3):
        for kw in range(3):
            sl = xp[:, kh:kh + stride * (Ho - 1) + 1:stride,
                       kw:kw + stride * (Wo - 1) + 1:stride, :]       # (N, Ho, Wo, C)
            cols.append(sl)
    patches = jnp.concatenate(cols, axis=-1)                          # (N, Ho, Wo, 9*C)
    return patches.reshape(N * Ho * Wo, 9 * C), Ho, Wo


# ----------------------------------------------------------------------------
# Parameter handling
# ----------------------------------------------------------------------------
def init_params(key):
    """Raw params mirroring the nn.Sequential discriminator (BN in eval mode folded
    into a per-channel affine)."""
    # (Cout, Cin, stride, has_bn, apply_leaky_relu)
    cfg = [
        (64, DIMENSION, 2, False, True),
        (128, 64, 2, True, True),
        (256, 128, 2, True, True),
        (512, 256, 2, True, True),
        (1, 512, 1, False, False),     # final conv -> sigmoid (done in fused loss kernel)
    ]
    params = []
    for (cout, cin, stride, has_bn, act) in cfg:
        key, sub = jax.random.split(key)
        fan_in = cin * 9
        w = jax.random.normal(sub, (cout, cin, 3, 3), jnp.float32) * (2.0 / fan_in) ** 0.5
        if has_bn:
            gamma = jnp.ones((cout,), jnp.float32)
            beta = jnp.zeros((cout,), jnp.float32)
            running_mean = jnp.zeros((cout,), jnp.float32)
            running_var = jnp.ones((cout,), jnp.float32)
            scale = gamma / jnp.sqrt(running_var + BN_EPS)
            shift = beta - running_mean * scale
        else:
            scale = jnp.ones((cout,), jnp.float32)
            shift = jnp.zeros((cout,), jnp.float32)
        params.append((w, scale, shift, stride, act))
    return params


def prepare_params(raw_params):
    """Pad/reshape weights once.

    Conv layers 1-4: (Cout,Cin,3,3) -> bf16 (K_pad, Cout_pad), K/Cout padded to 128
    multiples; BN scale/shift as zero-padded (1, Cout_pad) f32 rows.
    Final Cout=1 layer: center-tap row (1, Cin) f32 for the 1x1 fast path and a full
    flattened (1, K5_pad) f32 row for the general path (no 127 zero weight columns)."""
    *conv_raw, last_raw = raw_params
    conv = []
    for (w, scale, shift, stride, act) in conv_raw:
        cout, cin, kh, kw = w.shape
        K = cin * kh * kw
        K_pad = _round_up(K, 128)
        Cout_pad = _round_up(cout, 128)
        w2d = jnp.transpose(w, (2, 3, 1, 0)).reshape(K, cout)          # rows = (kh, kw, cin)
        w2d = jnp.pad(w2d, ((0, K_pad - K), (0, Cout_pad - cout))).astype(jnp.bfloat16)
        scale_p = jnp.pad(scale, (0, Cout_pad - cout)).reshape(1, Cout_pad).astype(jnp.float32)
        shift_p = jnp.pad(shift, (0, Cout_pad - cout)).reshape(1, Cout_pad).astype(jnp.float32)
        conv.append((w2d, scale_p, shift_p, stride, act, cout))

    w5, _, _, stride5, _ = last_raw
    cout5, cin5, _, _ = w5.shape
    K5 = cin5 * 9
    K5_pad = _round_up(K5, 128)
    w_row = jnp.transpose(w5, (2, 3, 1, 0)).reshape(K5, cout5)[:, 0].reshape(1, K5)
    w_row = jnp.pad(w_row, ((0, 0), (0, K5_pad - K5))).astype(jnp.float32)
    w_center = w5[:, :, 1, 1].reshape(1, cin5).astype(jnp.float32)     # (1, 512)
    last = dict(w_row=w_row, w_center=w_center, stride=stride5)
    return conv, last


# ----------------------------------------------------------------------------
# Forward pass
# ----------------------------------------------------------------------------
def wasserstein_adversarial_loss(actual, desire, prep_params):
    """loss = 100 * content(actual, desire) - mean(sigmoid(D(actual)))
            + BCE(sigmoid(D(actual)), ones)"""
    conv_layers, last = prep_params

    # TODO(synk): content criterion should be SimplePerceptualLoss('feat3_3'); MSE stand-in.
    a2, total = _flatten_rows128(actual)
    d2, _ = _flatten_rows128(desire)
    inv_cnt = 1.0 / total

    # Single layout conversion + bf16 cast at the model boundary; everything below
    # stays NHWC / bf16 (halves HBM traffic of every layer's activations).
    h = jnp.transpose(actual, (0, 2, 3, 1)).astype(jnp.bfloat16)
    N = h.shape[0]
    n_conv = len(conv_layers)

    for idx, (w2d, scale_p, shift_p, stride, act, cout) in enumerate(conv_layers):
        patches, Ho, Wo = _im2col_nhwc(h, stride)
        M = patches.shape[0]
        if idx == n_conv - 1 and Ho == 1 and Wo == 1 and M <= 1024:
            # Fast path: layer-4 matmul + the final conv (degenerate 1x1 map => center
            # tap only) + adversarial + content term, all in one fused kernel.
            return _fused_tail_loss(patches, w2d, scale_p, shift_p, last["w_center"],
                                    a2, d2, M, inv_cnt, apply_act=act)
        out = _conv_layer_pallas(patches, w2d, scale_p, shift_p, act)
        h = out[:M, :cout].reshape(N, Ho, Wo, cout)                    # still NHWC, bf16

    # General path (layer-4 output larger than 1x1): final conv via im2col, fused with
    # the adversarial + content reductions.
    patches5, Ho5, Wo5 = _im2col_nhwc(h, last["stride"])
    M5 = patches5.shape[0]
    # TODO(synk): fit() (optimizer step, WGAN gradient penalty) is a training side effect.
    return _logit_loss_pallas(patches5, last["w_row"], a2, d2, M5, inv_cnt)


# ----------------------------------------------------------------------------
# Pure-JAX reference (same bf16-input / f32-accumulate math) for a sanity check
# ----------------------------------------------------------------------------
def _ref_loss(actual, desire, raw_params):
    h = jnp.transpose(actual.astype(jnp.float32), (0, 2, 3, 1))        # NHWC
    for (w, scale, shift, stride, act) in raw_params:
        w_hwio = jnp.transpose(w, (2, 3, 1, 0))
        h = jax.lax.conv_general_dilated(
            h.astype(jnp.bfloat16), w_hwio.astype(jnp.bfloat16),
            (stride, stride), ((1, 1), (1, 1)),
            dimension_numbers=('NHWC', 'HWIO', 'NHWC'),
            preferred_element_type=jnp.float32)
        h = h * scale[None, None, None, :] + shift[None, None, None, :]
        if act:
            h = jnp.where(h >= 0.0, h, LEAKY_SLOPE * h)
    logit = h.reshape(-1)
    p = jax.nn.sigmoid(logit)
    bce = jnp.mean(_bce_with_ones_from_logits(logit))
    content = jnp.mean((actual - desire) ** 2)
    return 100.0 * content - jnp.mean(p) + bce


# ----------------------------------------------------------------------------
if __name__ == "__main__":
    key = jax.random.PRNGKey(0)
    kp, ka, kd = jax.random.split(key, 3)
    raw_params = init_params(kp)
    prep_params = prepare_params(raw_params)

    N, C, H, W = 2, DIMENSION, 16, 16
    actual = jax.random.normal(ka, (N, C, H, W), jnp.float32)
    desire = jax.random.normal(kd, (N, C, H, W), jnp.float32)

    loss_fn = jax.jit(lambda a, d: wasserstein_adversarial_loss(a, d, prep_params))
    loss = jax.block_until_ready(loss_fn(actual, desire))

    ref = jax.block_until_ready(_ref_loss(actual, desire, raw_params))
    assert jnp.isfinite(loss), "loss is not finite"
    assert jnp.allclose(loss, ref, rtol=1e-4, atol=0.2), (loss, ref)

    print("KERNEL_OK")
</pallas_src>

<mosaic_0001>
module attributes {stable_mosaic.version = 11 : i64} {
  func.func @_conv_mm_kernel(%arg0: i32, %arg1: i32, %arg2: memref<128x128xbf16, #tpu.memory_space<vmem>>, %arg3: memref<128x128xbf16, #tpu.memory_space<vmem>>, %arg4: memref<1x128xf32, #tpu.memory_space<vmem>>, %arg5: memref<1x128xf32, #tpu.memory_space<vmem>>, %arg6: memref<128x128xbf16, #tpu.memory_space<vmem>>) attributes {dimension_semantics = [#tpu.dimension_semantics<parallel>, #tpu.dimension_semantics<parallel>], iteration_bounds = array<i64: 1, 1>, scalar_prefetch = 0 : i64, scratch_operands = 0 : i64, tpu.core_type = #tpu.core_type<tc>, window_params = [{transform_indices = @transform_0, window_bounds = array<i64: 128, 128>}, {transform_indices = @transform_1, window_bounds = array<i64: 128, 128>}, {transform_indices = @transform_2, window_bounds = array<i64: 1, 128>}, {transform_indices = @transform_3, window_bounds = array<i64: 1, 128>}, {transform_indices = @transform_4, window_bounds = array<i64: 128, 128>}]} {
    %c0 = arith.constant 0 : index
    %c0_0 = arith.constant 0 : index
    %0 = vector.load %arg2[%c0, %c0_0] : memref<128x128xbf16, #tpu.memory_space<vmem>>, vector<128x128xbf16>
    %c0_1 = arith.constant 0 : index
    %c0_2 = arith.constant 0 : index
    %1 = vector.load %arg3[%c0_1, %c0_2] : memref<128x128xbf16, #tpu.memory_space<vmem>>, vector<128x128xbf16>
    %cst = arith.constant dense<0.000000e+00> : vector<128x128xf32>
    %2 = tpu.matmul %0, %1, %cst {dimension_numbers = #tpu.dot_dimension_numbers<[1], [0], [0], [1], [0, 0, 1, 1], [], []>} : vector<128x128xbf16>, vector<128x128xbf16>, vector<128x128xf32> -> vector<128x128xf32>
    %c0_3 = arith.constant 0 : index
    %c0_4 = arith.constant 0 : index
    %3 = vector.load %arg4[%c0_3, %c0_4] : memref<1x128xf32, #tpu.memory_space<vmem>>, vector<1x128xf32>
    %4 = vector.broadcast %3 : vector<1x128xf32> to vector<128x128xf32>
    %5 = arith.mulf %2, %4 : vector<128x128xf32>
    %c0_5 = arith.constant 0 : index
    %c0_6 = arith.constant 0 : index
    %6 = vector.load %arg5[%c0_5, %c0_6] : memref<1x128xf32, #tpu.memory_space<vmem>>, vector<1x128xf32>
    %7 = vector.broadcast %6 : vector<1x128xf32> to vector<128x128xf32>
    %8 = arith.addf %5, %7 : vector<128x128xf32>
    %cst_7 = arith.constant 0.000000e+00 : f32
    %9 = vector.broadcast %cst_7 : f32 to vector<128x128xf32>
    %10 = arith.cmpf oge, %8, %9 : vector<128x128xf32>
    %cst_8 = arith.constant 2.000000e-01 : f32
    %11 = vector.broadcast %cst_8 : f32 to vector<128x128xf32>
    %12 = arith.mulf %11, %8 : vector<128x128xf32>
    %13 = arith.select %10, %8, %12 : vector<128x128xi1>, vector<128x128xf32>
    %14 = arith.truncf %13 : vector<128x128xf32> to vector<128x128xbf16>
    %c0_9 = arith.constant 0 : index
    %c0_10 = arith.constant 0 : index
    %15 = vector.load %arg6[%c0_9, %c0_10] : memref<128x128xbf16, #tpu.memory_space<vmem>>, vector<128x128xbf16>
    tpu.vector_store %arg6[%c0_9, %c0_10], %14 {strides = array<i32>} : memref<128x128xbf16, #tpu.memory_space<vmem>>, vector<128x128xbf16>,
    return
  }
  func.func @transform_0(%arg0: i32, %arg1: i32) -> (i32, i32) {
    %c0_i32 = arith.constant 0 : i32
    %c0_i32_0 = arith.constant 0 : i32
    return %arg0, %c0_i32 : i32, i32
  }
  func.func @transform_1(%arg0: i32, %arg1: i32) -> (i32, i32) {
    %c0_i32 = arith.constant 0 : i32
    %c0_i32_0 = arith.constant 0 : i32
    return %c0_i32, %arg1 : i32, i32
  }
  func.func @transform_2(%arg0: i32, %arg1: i32) -> (i32, i32) {
    %c0_i32 = arith.constant 0 : i32
    %c0_i32_0 = arith.constant 0 : i32
    return %c0_i32, %arg1 : i32, i32
  }
  func.func @transform_3(%arg0: i32, %arg1: i32) -> (i32, i32) {
    %c0_i32 = arith.constant 0 : i32
    %c0_i32_0 = arith.constant 0 : i32
    return %c0_i32, %arg1 : i32, i32
  }
  func.func @transform_4(%arg0: i32, %arg1: i32) -> (i32, i32) {
    %c0_i32 = arith.constant 0 : i32
    return %arg0, %arg1 : i32, i32
  }
}

module attributes {stable_mosaic.version = 11 : i64} {
  func.func @_conv_mm_kernel(%arg0: i32, %arg1: i32, %arg2: memref<32x640xbf16, #tpu.memory_space<vmem>>, %arg3: memref<640x128xbf16, #tpu.memory_space<vmem>>, %arg4: memref<1x128xf32, #tpu.memory_space<vmem>>, %arg5: memref<1x128xf32, #tpu.memory_space<vmem>>, %arg6: memref<32x128xbf16, #tpu.memory_space<vmem>>) attributes {dimension_semantics = [#tpu.dimension_semantics<parallel>, #tpu.dimension_semantics<parallel>], iteration_bounds = array<i64: 1, 1>, scalar_prefetch = 0 : i64, scratch_operands = 0 : i64, tpu.core_type = #tpu.core_type<tc>, window_params = [{transform_indices = @transform_0, window_bounds = array<i64: 32, 640>}, {transform_indices = @transform_1, window_bounds = array<i64: 640, 128>}, {transform_indices = @transform_2, window_bounds = array<i64: 1, 128>}, {transform_indices = @transform_3, window_bounds = array<i64: 1, 128>}, {transform_indices = @transform_4, window_bounds = array<i64: 32, 128>}]} {
    %c0 = arith.constant 0 : index
    %c0_0 = arith.constant 0 : index
    %0 = vector.load %arg2[%c0, %c0_0] : memref<32x640xbf16, #tpu.memory_space<vmem>>, vector<32x640xbf16>
    %c0_1 = arith.constant 0 : index
    %c0_2 = arith.constant 0 : index
    %1 = vector.load %arg3[%c0_1, %c0_2] : memref<640x128xbf16, #tpu.memory_space<vmem>>, vector<640x128xbf16>
    %cst = arith.constant dense<0.000000e+00> : vector<32x128xf32>
    %2 = tpu.matmul %0, %1, %cst {dimension_numbers = #tpu.dot_dimension_numbers<[1], [0], [0], [1], [0, 0, 1, 1], [], []>} : vector<32x640xbf16>, vector<640x128xbf16>, vector<32x128xf32> -> vector<32x128xf32>
    %c0_3 = arith.constant 0 : index
    %c0_4 = arith.constant 0 : index
    %3 = vector.load %arg4[%c0_3, %c0_4] : memref<1x128xf32, #tpu.memory_space<vmem>>, vector<1x128xf32>
    %4 = vector.broadcast %3 : vector<1x128xf32> to vector<32x128xf32>
    %5 = arith.mulf %2, %4 : vector<32x128xf32>
    %c0_5 = arith.constant 0 : index
    %c0_6 = arith.constant 0 : index
    %6 = vector.load %arg5[%c0_5, %c0_6] : memref<1x128xf32, #tpu.memory_space<vmem>>, vector<1x128xf32>
    %7 = vector.broadcast %6 : vector<1x128xf32> to vector<32x128xf32>
    %8 = arith.addf %5, %7 : vector<32x128xf32>
    %cst_7 = arith.constant 0.000000e+00 : f32
    %9 = vector.broadcast %cst_7 : f32 to vector<32x128xf32>
    %10 = arith.cmpf oge, %8, %9 : vector<32x128xf32>
    %cst_8 = arith.constant 2.000000e-01 : f32
    %11 = vector.broadcast %cst_8 : f32 to vector<32x128xf32>
    %12 = arith.mulf %11, %8 : vector<32x128xf32>
    %13 = arith.select %10, %8, %12 : vector<32x128xi1>, vector<32x128xf32>
    %14 = arith.truncf %13 : vector<32x128xf32> to vector<32x128xbf16>
    %c0_9 = arith.constant 0 : index
    %c0_10 = arith.constant 0 : index
    %15 = vector.load %arg6[%c0_9, %c0_10] : memref<32x128xbf16, #tpu.memory_space<vmem>>, vector<32x128xbf16>
    tpu.vector_store %arg6[%c0_9, %c0_10], %14 {strides = array<i32>} : memref<32x128xbf16, #tpu.memory_space<vmem>>, vector<32x128xbf16>,
    return
  }
  func.func @transform_0(%arg0: i32, %arg1: i32) -> (i32, i32) {
    %c0_i32 = arith.constant 0 : i32
    %c0_i32_0 = arith.constant 0 : i32
    return %arg0, %c0_i32 : i32, i32
  }
  func.func @transform_1(%arg0: i32, %arg1: i32) -> (i32, i32) {
    %c0_i32 = arith.constant 0 : i32
    %c0_i32_0 = arith.constant 0 : i32
    return %c0_i32, %arg1 : i32, i32
  }
  func.func @transform_2(%arg0: i32, %arg1: i32) -> (i32, i32) {
    %c0_i32 = arith.constant 0 : i32
    %c0_i32_0 = arith.constant 0 : i32
    return %c0_i32, %arg1 : i32, i32
  }
  func.func @transform_3(%arg0: i32, %arg1: i32) -> (i32, i32) {
    %c0_i32 = arith.constant 0 : i32
    %c0_i32_0 = arith.constant 0 : i32
    return %c0_i32, %arg1 : i32, i32
  }
  func.func @transform_4(%arg0: i32, %arg1: i32) -> (i32, i32) {
    %c0_i32 = arith.constant 0 : i32
    return %arg0, %arg1 : i32, i32
  }
}

module attributes {stable_mosaic.version = 11 : i64} {
  func.func @_conv_mm_kernel(%arg0: i32, %arg1: i32, %arg2: memref<8x1152xbf16, #tpu.memory_space<vmem>>, %arg3: memref<1152x256xbf16, #tpu.memory_space<vmem>>, %arg4: memref<1x256xf32, #tpu.memory_space<vmem>>, %arg5: memref<1x256xf32, #tpu.memory_space<vmem>>, %arg6: memref<8x256xbf16, #tpu.memory_space<vmem>>) attributes {dimension_semantics = [#tpu.dimension_semantics<parallel>, #tpu.dimension_semantics<parallel>], iteration_bounds = array<i64: 1, 1>, scalar_prefetch = 0 : i64, scratch_operands = 0 : i64, tpu.core_type = #tpu.core_type<tc>, window_params = [{transform_indices = @transform_0, window_bounds = array<i64: 8, 1152>}, {transform_indices = @transform_1, window_bounds = array<i64: 1152, 256>}, {transform_indices = @transform_2, window_bounds = array<i64: 1, 256>}, {transform_indices = @transform_3, window_bounds = array<i64: 1, 256>}, {transform_indices = @transform_4, window_bounds = array<i64: 8, 256>}]} {
    %c0 = arith.constant 0 : index
    %c0_0 = arith.constant 0 : index
    %0 = vector.load %arg2[%c0, %c0_0] : memref<8x1152xbf16, #tpu.memory_space<vmem>>, vector<8x1152xbf16>
    %c0_1 = arith.constant 0 : index
    %c0_2 = arith.constant 0 : index
    %1 = vector.load %arg3[%c0_1, %c0_2] : memref<1152x256xbf16, #tpu.memory_space<vmem>>, vector<1152x256xbf16>
    %cst = arith.constant dense<0.000000e+00> : vector<8x256xf32>
    %2 = tpu.matmul %0, %1, %cst {dimension_numbers = #tpu.dot_dimension_numbers<[1], [0], [0], [1], [0, 0, 1, 1], [], []>} : vector<8x1152xbf16>, vector<1152x256xbf16>, vector<8x256xf32> -> vector<8x256xf32>
    %c0_3 = arith.constant 0 : index
    %c0_4 = arith.constant 0 : index
    %3 = vector.load %arg4[%c0_3, %c0_4] : memref<1x256xf32, #tpu.memory_space<vmem>>, vector<1x256xf32>
    %4 = vector.broadcast %3 : vector<1x256xf32> to vector<8x256xf32>
    %5 = arith.mulf %2, %4 : vector<8x256xf32>
    %c0_5 = arith.constant 0 : index
    %c0_6 = arith.constant 0 : index
    %6 = vector.load %arg5[%c0_5, %c0_6] : memref<1x256xf32, #tpu.memory_space<vmem>>, vector<1x256xf32>
    %7 = vector.broadcast %6 : vector<1x256xf32> to vector<8x256xf32>
    %8 = arith.addf %5, %7 : vector<8x256xf32>
    %cst_7 = arith.constant 0.000000e+00 : f32
    %9 = vector.broadcast %cst_7 : f32 to vector<8x256xf32>
    %10 = arith.cmpf oge, %8, %9 : vector<8x256xf32>
    %cst_8 = arith.constant 2.000000e-01 : f32
    %11 = vector.broadcast %cst_8 : f32 to vector<8x256xf32>
    %12 = arith.mulf %11, %8 : vector<8x256xf32>
    %13 = arith.select %10, %8, %12 : vector<8x256xi1>, vector<8x256xf32>
    %14 = arith.truncf %13 : vector<8x256xf32> to vector<8x256xbf16>
    %c0_9 = arith.constant 0 : index
    %c0_10 = arith.constant 0 : index
    %15 = vector.load %arg6[%c0_9, %c0_10] : memref<8x256xbf16, #tpu.memory_space<vmem>>, vector<8x256xbf16>
    tpu.vector_store %arg6[%c0_9, %c0_10], %14 {strides = array<i32>} : memref<8x256xbf16, #tpu.memory_space<vmem>>, vector<8x256xbf16>,
    return
  }
  func.func @transform_0(%arg0: i32, %arg1: i32) -> (i32, i32) {
    %c0_i32 = arith.constant 0 : i32
    %c0_i32_0 = arith.constant 0 : i32
    return %arg0, %c0_i32 : i32, i32
  }
  func.func @transform_1(%arg0: i32, %arg1: i32) -> (i32, i32) {
    %c0_i32 = arith.constant 0 : i32
    %c0_i32_0 = arith.constant 0 : i32
    return %c0_i32, %arg1 : i32, i32
  }
  func.func @transform_2(%arg0: i32, %arg1: i32) -> (i32, i32) {
    %c0_i32 = arith.constant 0 : i32
    %c0_i32_0 = arith.constant 0 : i32
    return %c0_i32, %arg1 : i32, i32
  }
  func.func @transform_3(%arg0: i32, %arg1: i32) -> (i32, i32) {
    %c0_i32 = arith.constant 0 : i32
    %c0_i32_0 = arith.constant 0 : i32
    return %c0_i32, %arg1 : i32, i32
  }
  func.func @transform_4(%arg0: i32, %arg1: i32) -> (i32, i32) {
    %c0_i32 = arith.constant 0 : i32
    return %arg0, %arg1 : i32, i32
  }
}

module attributes {stable_mosaic.version = 11 : i64} {
  func.func @_tail_loss_kernel(%arg0: i32, %arg1: memref<8x2304xbf16, #tpu.memory_space<vmem>>, %arg2: memref<2304x512xbf16, #tpu.memory_space<vmem>>, %arg3: memref<1x512xf32, #tpu.memory_space<vmem>>, %arg4: memref<1x512xf32, #tpu.memory_space<vmem>>, %arg5: memref<1x512xf32, #tpu.memory_space<vmem>>, %arg6: memref<16x128xf32, #tpu.memory_space<vmem>>, %arg7: memref<16x128xf32, #tpu.memory_space<vmem>>, %arg8: memref<1x1xf32, #tpu.memory_space<vmem>>) attributes {dimension_semantics = [#tpu.dimension_semantics<arbitrary>], iteration_bounds = array<i64: 1>, scalar_prefetch = 0 : i64, scratch_operands = 0 : i64, tpu.core_type = #tpu.core_type<tc>, window_params = [{pipeline_mode = #tpu.pipeline_mode<synchronous>, transform_indices = @transform_0, window_bounds = array<i64: 8, 2304>}, {pipeline_mode = #tpu.pipeline_mode<synchronous>, transform_indices = @transform_1, window_bounds = array<i64: 2304, 512>}, {pipeline_mode = #tpu.pipeline_mode<synchronous>, transform_indices = @transform_2, window_bounds = array<i64: 1, 512>}, {pipeline_mode = #tpu.pipeline_mode<synchronous>, transform_indices = @transform_3, window_bounds = array<i64: 1, 512>}, {pipeline_mode = #tpu.pipeline_mode<synchronous>, transform_indices = @transform_4, window_bounds = array<i64: 1, 512>}, {pipeline_mode = #tpu.pipeline_mode<synchronous>, transform_indices = @transform_5, window_bounds = array<i64: 16, 128>}, {pipeline_mode = #tpu.pipeline_mode<synchronous>, transform_indices = @transform_6, window_bounds = array<i64: 16, 128>}, {pipeline_mode = #tpu.pipeline_mode<synchronous>, transform_indices = @transform_7, window_bounds = array<i64: 1, 1>}]} {
    %c0 = arith.constant 0 : index
    %c0_0 = arith.constant 0 : index
    %0 = vector.load %arg1[%c0, %c0_0] : memref<8x2304xbf16, #tpu.memory_space<vmem>>, vector<8x2304xbf16>
    %c0_1 = arith.constant 0 : index
    %c0_2 = arith.constant 0 : index
    %1 = vector.load %arg2[%c0_1, %c0_2] : memref<2304x512xbf16, #tpu.memory_space<vmem>>, vector<2304x512xbf16>
    %cst = arith.constant dense<0.000000e+00> : vector<8x512xf32>
    %2 = tpu.matmul %0, %1, %cst {dimension_numbers = #tpu.dot_dimension_numbers<[1], [0], [0], [1], [0, 0, 1, 1], [], []>} : vector<8x2304xbf16>, vector<2304x512xbf16>, vector<8x512xf32> -> vector<8x512xf32>
    %c0_3 = arith.constant 0 : index
    %c0_4 = arith.constant 0 : index
    %3 = vector.load %arg3[%c0_3, %c0_4] : memref<1x512xf32, #tpu.memory_space<vmem>>, vector<1x512xf32>
    %4 = vector.broadcast %3 : vector<1x512xf32> to vector<8x512xf32>
    %5 = arith.mulf %2, %4 : vector<8x512xf32>
    %c0_5 = arith.constant 0 : index
    %c0_6 = arith.constant 0 : index
    %6 = vector.load %arg4[%c0_5, %c0_6] : memref<1x512xf32, #tpu.memory_space<vmem>>, vector<1x512xf32>
    %7 = vector.broadcast %6 : vector<1x512xf32> to vector<8x512xf32>
    %8 = arith.addf %5, %7 : vector<8x512xf32>
    %cst_7 = arith.constant 0.000000e+00 : f32
    %9 = vector.broadcast %cst_7 : f32 to vector<8x512xf32>
    %10 = arith.cmpf oge, %8, %9 : vector<8x512xf32>
    %cst_8 = arith.constant 2.000000e-01 : f32
    %11 = vector.broadcast %cst_8 : f32 to vector<8x512xf32>
    %12 = arith.mulf %11, %8 : vector<8x512xf32>
    %13 = arith.select %10, %8, %12 : vector<8x512xi1>, vector<8x512xf32>
    %c0_9 = arith.constant 0 : index
    %c0_10 = arith.constant 0 : index
    %14 = vector.load %arg5[%c0_9, %c0_10] : memref<1x512xf32, #tpu.memory_space<vmem>>, vector<1x512xf32>
    %15 = vector.broadcast %14 : vector<1x512xf32> to vector<8x512xf32>
    %16 = arith.mulf %13, %15 : vector<8x512xf32>
    %cst_11 = arith.constant dense<0.000000e+00> : vector<8xf32>
    %17 = vector.multi_reduction <add>, %16, %cst_11 [1] : vector<8x512xf32> to vector<8xf32>
    %18 = vector.shape_cast %17 : vector<8xf32> to vector<8x1xf32>
    %19 = tpu.iota {dimensions = array<i32: 0>} : vector<8x1xi32>
    %c2_i32 = arith.constant 2 : i32
    %20 = vector.broadcast %c2_i32 : i32 to vector<8x1xi32>
    %21 = arith.cmpi slt, %19, %20 : vector<8x1xi32>
    %22 = arith.extui %21 : vector<8x1xi1> to vector<8x1xi32>
    %23 = arith.sitofp %22 : vector<8x1xi32> to vector<8x1xf32>
    %24 = arith.negf %18 : vector<8x1xf32>
    %25 = math.exp %24 : vector<8x1xf32>
    %cst_12 = arith.constant 1.000000e+00 : f32
    %26 = vector.broadcast %cst_12 : f32 to vector<8x1xf32>
    %27 = arith.addf %26, %25 : vector<8x1xf32>
    %28 = arith.divf %26, %27 : vector<8x1xf32>
    %cst_13 = arith.constant 0.000000e+00 : f32
    %29 = vector.broadcast %cst_13 : f32 to vector<8x1xf32>
    %30 = arith.subf %29, %18 : vector<8x1xf32>
    %cst_14 = arith.constant 0.000000e+00 : f32
    %31 = vector.broadcast %cst_14 : f32 to vector<8x1xf32>
    %32 = arith.maximumf %30, %31 : vector<8x1xf32>
    %33 = math.absf %18 : vector<8x1xf32>
    %cst_15 = arith.constant 0.000000e+00 : f32
    %34 = vector.broadcast %cst_15 : f32 to vector<8x1xf32>
    %35 = arith.subf %34, %33 : vector<8x1xf32>
    %36 = math.exp %35 : vector<8x1xf32>
    %cst_16 = arith.constant 1.000000e+00 : f32
    %37 = vector.broadcast %cst_16 : f32 to vector<8x1xf32>
    %38 = arith.addf %37, %36 : vector<8x1xf32>
    %39 = math.log %38 : vector<8x1xf32>
    %40 = arith.addf %32, %39 : vector<8x1xf32>
    %cst_17 = arith.constant 1.000000e+02 : f32
    %41 = vector.broadcast %cst_17 : f32 to vector<8x1xf32>
    %42 = arith.minimumf %40, %41 : vector<8x1xf32>
    %43 = arith.subf %42, %28 : vector<8x1xf32>
    %44 = arith.mulf %43, %23 : vector<8x1xf32>
    %45 = vector.shape_cast %44 : vector<8x1xf32> to vector<1x8x1xf32>
    %cst_18 = arith.constant dense<0.000000e+00> : vector<1xf32>
    %46 = vector.multi_reduction <add>, %45, %cst_18 [1, 2] : vector<1x8x1xf32> to vector<1xf32>
    %47 = vector.shape_cast %46 : vector<1xf32> to vector<1x1x1xf32>
    %48 = vector.extract %47[0, 0, 0] : f32 from vector<1x1x1xf32>
    %49 = vector.broadcast %48 : f32 to vector<1x1xf32>
    %cst_19 = arith.constant 5.000000e-01 : f32
    %50 = vector.broadcast %cst_19 : f32 to vector<1x1xf32>
    %51 = arith.mulf %49, %50 : vector<1x1xf32>
    %c0_20 = arith.constant 0 : index
    %c0_21 = arith.constant 0 : index
    %52 = vector.load %arg6[%c0_20, %c0_21] : memref<16x128xf32, #tpu.memory_space<vmem>>, vector<16x128xf32>
    %c0_22 = arith.constant 0 : index
    %c0_23 = arith.constant 0 : index
    %53 = vector.load %arg7[%c0_22, %c0_23] : memref<16x128xf32, #tpu.memory_space<vmem>>, vector<16x128xf32>
    %54 = arith.subf %52, %53 : vector<16x128xf32>
    %55 = arith.mulf %54, %54 : vector<16x128xf32>
    %56 = vector.shape_cast %55 : vector<16x128xf32> to vector<1x16x128xf32>
    %cst_24 = arith.constant dense<0.000000e+00> : vector<1xf32>
    %57 = vector.multi_reduction <add>, %56, %cst_24 [1, 2] : vector<1x16x128xf32> to vector<1xf32>
    %58 = vector.shape_cast %57 : vector<1xf32> to vector<1x1x1xf32>
    %59 = vector.extract %58[0, 0, 0] : f32 from vector<1x1x1xf32>
    %60 = vector.broadcast %59 : f32 to vector<1x1xf32>
    %cst_25 = arith.constant 4.8828125E-4 : f32
    %61 = vector.broadcast %cst_25 : f32 to vector<1x1xf32>
    %62 = arith.mulf %60, %61 : vector<1x1xf32>
    %cst_26 = arith.constant 1.000000e+02 : f32
    %63 = vector.broadcast %cst_26 : f32 to vector<1x1xf32>
    %64 = arith.mulf %63, %62 : vector<1x1xf32>
    %65 = arith.addf %64, %51 : vector<1x1xf32>
    %c0_27 = arith.constant 0 : index
    %c0_28 = arith.constant 0 : index
    %66 = vector.load %arg8[%c0_27, %c0_28] : memref<1x1xf32, #tpu.memory_space<vmem>>, vector<1x1xf32>
    tpu.vector_store %arg8[%c0_27, %c0_28], %65 {strides = array<i32>} : memref<1x1xf32, #tpu.memory_space<vmem>>, vector<1x1xf32>,
    return
  }
  func.func @transform_0(%arg0: i32) -> (i32, i32) {
    %c0_i32 = arith.constant 0 : i32
    %c0_i32_0 = arith.constant 0 : i32
    %c0_i32_1 = arith.constant 0 : i32
    return %c0_i32, %c0_i32_0 : i32, i32
  }
  func.func @transform_1(%arg0: i32) -> (i32, i32) {
    %c0_i32 = arith.constant 0 : i32
    %c0_i32_0 = arith.constant 0 : i32
    %c0_i32_1 = arith.constant 0 : i32
    return %c0_i32, %c0_i32_0 : i32, i32
  }
  func.func @transform_2(%arg0: i32) -> (i32, i32) {
    %c0_i32 = arith.constant 0 : i32
    %c0_i32_0 = arith.constant 0 : i32
    %c0_i32_1 = arith.constant 0 : i32
    return %c0_i32, %c0_i32_0 : i32, i32
  }
  func.func @transform_3(%arg0: i32) -> (i32, i32) {
    %c0_i32 = arith.constant 0 : i32
    %c0_i32_0 = arith.constant 0 : i32
    %c0_i32_1 = arith.constant 0 : i32
    return %c0_i32, %c0_i32_0 : i32, i32
  }
  func.func @transform_4(%arg0: i32) -> (i32, i32) {
    %c0_i32 = arith.constant 0 : i32
    %c0_i32_0 = arith.constant 0 : i32
    %c0_i32_1 = arith.constant 0 : i32
    return %c0_i32, %c0_i32_0 : i32, i32
  }
  func.func @transform_5(%arg0: i32) -> (i32, i32) {
    %c0_i32 = arith.constant 0 : i32
    %c0_i32_0 = arith.constant 0 : i32
    %c0_i32_1 = arith.constant 0 : i32
    return %c0_i32, %c0_i32_0 : i32, i32
  }
  func.func @transform_6(%arg0: i32) -> (i32, i32) {
    %c0_i32 = arith.constant 0 : i32
    %c0_i32_0 = arith.constant 0 : i32
    %c0_i32_1 = arith.constant 0 : i32
    return %c0_i32, %c0_i32_0 : i32, i32
  }
  func.func @transform_7(%arg0: i32) -> (i32, i32) {
    %c0_i32 = arith.constant 0 : i32
    %c0_i32_0 = arith.constant 0 : i32
    %c0_i32_1 = arith.constant 0 : i32
    return %c0_i32, %c0_i32_0 : i32, i32
  }
}

</mosaic_0001>

<bundles_post_ra>
// kernel: _lambda_.4
= control target key start
LH: loop header
LB: loop body
LE: loop exit
PB: predicated region body
PF: predicated region fallthrough
CT: control target
= control target key end

     0   :  { %9 = vsyncpa [#allocation3], 0  ;;  %s818_s0 = inlined_call_operand.vmem [shape: bf16[128,128], index: 0, kind: input, shape index: {}]   ;;  %s819_s1 = inlined_call_operand.hbm [shape: bf16[128,128], index: 1, kind: input, shape index: {}]   ;;  %s820_s2 = inlined_call_operand.hbm [shape: f32[1,128], index: 2, kind: input, shape index: {}]   ;;  %s821_s3 = inlined_call_operand.vmem [shape: f32[1,128], index: 3, kind: input, shape index: {}]   ;;  %s822_s4 = inlined_call_operand.vmem [shape: bf16[128,128], index: 4, kind: output, shape index: {}]  }
   0x1   :  { %10 = vsyncpa [#allocation5], 0  ;;  %s678_s15 = smov [#allocation2]   ;;  %s630_s19 = scalar_lea.hbm %s819_s1, 1024 }
   0x2   :  { %s18_s16 = sshll.u32 %s678_s15, 4  ;;  %p631_p0 = scmp.ne.s32.totalorder %s819_s1, %s630_s19  ;;  %s19_s16 = int_to_ptr.vmem [resolvable:$true] %s18_s16 }
   0x3   :  { %p634_p1 = scmp.lt.u32.totalorder %s630_s19, %s819_s1 }
   0x5   :  { %p636_p2 = pnand %p634_p1, %p631_p0 }
   0x7   :  { %639 = shalt.err (!%p636_p2)
}
   0x8   :  { %s640_s24 = scalar_lea.vmem %s19_s16, 1024  ;;  %p645_p4 = scmp.lt.s32.totalorder %s19_s16, %s19_s16 }
   0x9   :  { %p641_p3 = scmp.ne.s32.totalorder %s19_s16, %s640_s24  ;;  %p646_p5 = scmp.lt.s32.totalorder %s640_s24, %s640_s24 }
   0xb   :  { %p647_p6 = por %p646_p5, %p645_p4 }
   0xd   :  { %p648_p7 = pnand %p647_p6, %p641_p3 }
   0xf   :  { %651 = shalt.err (!%p648_p7)
}
  0x10   :  { %s679_s25 = smov 64   ;;  %s680_s26 = smov 4  }
  0x11   :  { %24 = dma.hbm_to_vmem [thread:$0]  %s819_s1, 1024, %s19_s16, [#allocation3], %s679_s25, %s679_s25, %s680_s26  }
  0x12   :  { %s681_s29 = smov [#allocation4]   ;;  %s652_s7 = scalar_lea.hbm %s820_s2, 16 }
  0x13   :  { %s31_s30 = sshll.u32 %s681_s29, 4  ;;  %p653_p8 = scmp.ne.s32.totalorder %s820_s2, %s652_s7  ;;  %s32_s30 = int_to_ptr.vmem [resolvable:$true] %s31_s30 }
  0x14   :  { %p656_p9 = scmp.lt.u32.totalorder %s652_s7, %s820_s2 }
  0x16   :  { %p658_p10 = pnand %p656_p9, %p653_p8 }
  0x18   :  { %661 = shalt.err (!%p658_p10)
}
  0x19   :  { %s662_s12 = scalar_lea.vmem %s32_s30, 16  ;;  %s666_s1 = scalar_lea.vmem %s32_s30, 32 }
  0x1a   :  { %p663_p11 = scmp.ne.s32.totalorder %s32_s30, %s662_s12  ;;  %p667_p12 = scmp.lt.s32.totalorder %s32_s30, %s32_s30 }
  0x1b   :  { %p668_p13 = scmp.lt.s32.totalorder %s666_s1, %s662_s12 }
  0x1d   :  { %p669_p0 = por %p668_p13, %p667_p12 }
  0x1f   :  { %p670_p1 = pnand %p669_p0, %p663_p11 }
  0x21   :  { %673 = shalt.err (!%p670_p1)
}
  0x22   :  { %34 = dma.hbm_to_vmem [thread:$0]  %s820_s2, 16, %s32_s30, [#allocation5]  }
  0x23   :  { %674 = dma.done.wait [#allocation3], 1024  }
  0x24   :  { %675 = vsyncadd [#allocation3], 4294966272 }
  0x25   :  { %676 = dma.done.wait [#allocation5], 16  }
  0x26   :  { %677 = vsyncadd [#allocation5], 4294967280  ;;  %v614_v0 = vld [vmem:[#allocation2] sm:$0xff]   ;;  %v615_v1 = vld [vmem:[#allocation2 + $0x8] sm:$0xff]  }
  0x27   :  { %562 = vmatprep.subr.bf16.mxu0 %v614_v0  ;;  %594 = vmatprep.subr.bf16.mxu1 %v614_v0  ;;  %v616_v2 = vld [vmem:[#allocation2 + $0x10] sm:$0xff]   ;;  %v617_v3 = vld [vmem:[#allocation2 + $0x18] sm:$0xff]   ;;  %v622_v4 = vld [vmem:[%s818_s0] sm:$0xff]  }
  0x28   :  { %563 = vmatpush3.bf16.msra.mxu0 %v614_v0  ;;  %602 = vmatpush3.bf16.msra.mxu1 %v614_v0  ;;  %v623_v5 = vld [vmem:[%s818_s0 + $0x20] sm:$0xff]   ;;  %v619_v7 = vld [vmem:[#allocation2 + $0x28] sm:$0xff]   ;;  %v620_v8 = vld [vmem:[#allocation2 + $0x30] sm:$0xff]  }
  0x29   :  { %564 = vmatprep.subr.bf16.mxu0 %v615_v1  ;;  %595 = vmatprep.subr.bf16.mxu1 %v615_v1  ;;  %v618_v6 = vld [vmem:[#allocation2 + $0x20] sm:$0xff]   ;;  %v621_v9 = vld [vmem:[#allocation2 + $0x38] sm:$0xff]   ;;  %v624_v10 = vld [vmem:[%s818_s0 + $0x8] sm:$0xff]  }
  0x2a   :  { %578 = vmatprep.mubr.bf16.mxu0 %v622_v4  ;;  %586 = vmatprep.mubr.bf16.mxu1 %v623_v5  ;;  %v625_v11 = vld [vmem:[%s818_s0 + $0x28] sm:$0xff]   ;;  %v626_v12 = vld [vmem:[%s818_s0 + $0x10] sm:$0xff]   ;;  %v628_v14 = vld [vmem:[%s818_s0 + $0x18] sm:$0xff]  }
  0x2b   :  { %v627_v13 = vld [vmem:[%s818_s0 + $0x30] sm:$0xff]   ;;  %v629_v15 = vld [vmem:[%s818_s0 + $0x38] sm:$0xff]   ;;  %v755_v16 = vld [vmem:[#allocation4] ss:$0 sm:$0xff] }
  0x2c   :  { %565 = vmatpush3.bf16.msra.mxu0 %v615_v1  ;;  %603 = vmatpush3.bf16.msra.mxu1 %v615_v1  ;;  %v760_v18 = vld [vmem:[%s821_s3] ss:$0 sm:$0xff] }
  0x2d   :  { %566 = vmatprep.subr.bf16.mxu0 %v616_v2  ;;  %596 = vmatprep.subr.bf16.mxu1 %v616_v2 }
  0x30   :  { %567 = vmatpush3.bf16.msra.mxu0 %v616_v2  ;;  %604 = vmatpush3.bf16.msra.mxu1 %v616_v2 }
  0x31   :  { %568 = vmatprep.subr.bf16.mxu0 %v617_v3  ;;  %597 = vmatprep.subr.bf16.mxu1 %v617_v3 }
  0x34   :  { %569 = vmatpush3.bf16.msra.mxu0 %v617_v3  ;;  %605 = vmatpush3.bf16.msra.mxu1 %v617_v3 }
  0x35   :  { %570 = vmatprep.subr.bf16.mxu0 %v618_v6  ;;  %598 = vmatprep.subr.bf16.mxu1 %v618_v6 }
  0x38   :  { %571 = vmatpush3.bf16.msra.mxu0 %v618_v6  ;;  %606 = vmatpush3.bf16.msra.mxu1 %v618_v6 }
  0x39   :  { %572 = vmatprep.subr.bf16.mxu0 %v619_v7  ;;  %599 = vmatprep.subr.bf16.mxu1 %v619_v7 }
  0x3c   :  { %573 = vmatpush3.bf16.msra.mxu0 %v619_v7  ;;  %607 = vmatpush3.bf16.msra.mxu1 %v619_v7 }
  0x3d   :  { %574 = vmatprep.subr.bf16.mxu0 %v620_v8  ;;  %600 = vmatprep.subr.bf16.mxu1 %v620_v8 }
  0x40   :  { %575 = vmatpush3.bf16.msra.mxu0 %v620_v8  ;;  %608 = vmatpush3.bf16.msra.mxu1 %v620_v8 }
  0x41   :  { %576 = vmatprep.subr.bf16.mxu0 %v621_v9  ;;  %601 = vmatprep.subr.bf16.mxu1 %v621_v9 }
  0x44   :  { %577 = vmatpush3.bf16.msra.mxu0 %v621_v9  ;;  %609 = vmatpush3.bf16.msra.mxu1 %v621_v9 }
  0x47   :  { %579 = vmatmul.mubr.bf16.vlgmr.msra.gmra.mrb[0].mxu0 %v624_v10  ;;  %587 = vmatmul.mubr.bf16.vlgmr.msra.gmra.mrb[0].mxu1 %v625_v11 }
  0x48   :  { %582 = vmatprep.mubr.bf16.mxu0 %v626_v12  ;;  %590 = vmatprep.mubr.bf16.mxu1 %v627_v13 }
  0x4f   :  { %583 = vmatmul.mubr.bf16.gmra.mrb[4].mxu0 %v628_v14  ;;  %591 = vmatmul.mubr.bf16.gmra.mrb[4].mxu1 %v629_v15 }
 0x11a   :  { %v580_v17 = vpop.f32.mrb[0].mxu0  ;;  %v588_v19 = vpop.f32.mrb[0].mxu1 }
 0x11b   :  { %v278_v20 = vmul.f32 %v580_v17, %v755_v16  ;;  %v286_v21 = vmul.f32 %v588_v19, %v755_v16  ;;  %v206_v22 = vpop.f32.mrb[1].mxu0  ;;  %v238_v23 = vpop.f32.mrb[1].mxu1 }
 0x11c   :  { %v276_v24 = vmul.f32 %v755_v16, %v206_v22  ;;  %v284_v25 = vmul.f32 %v755_v16, %v238_v23  ;;  %v581_v26 = vpop.f32.mrb[2].mxu0  ;;  %v589_v27 = vpop.f32.mrb[2].mxu1 }
 0x11d   :  { %v301_v28 = vadd.f32 %v760_v18, %v278_v20  ;;  %v309_v29 = vadd.f32 %v760_v18, %v286_v21  ;;  %v279_v30 = vmul.f32 %v581_v26, %v755_v16  ;;  %v287_v31 = vmul.f32 %v589_v27, %v755_v16  ;;  %v209_v32 = vpop.f32.mrb[3].mxu0  ;;  %v241_v33 = vpop.f32.mrb[3].mxu1 }
 0x11e   :  { %v299_v34 = vadd.f32 %v760_v18, %v276_v24  ;;  %v307_v35 = vadd.f32 %v760_v18, %v284_v25  ;;  %v277_v36 = vmul.f32 %v755_v16, %v209_v32  ;;  %v285_v37 = vmul.f32 %v755_v16, %v241_v33 }
 0x11f   :  { %vm317_vm0 = vcmp.ge.f32.partialorder %v301_v28, 0.0  ;;  %v333_v38 = vmul.f32 0.2, %v301_v28  ;;  %vm325_vm1 = vcmp.ge.f32.partialorder %v309_v29, 0.0  ;;  %v341_v39 = vmul.f32 0.2, %v309_v29 }
 0x120   :  { %vm315_vm2 = vcmp.ge.f32.partialorder %v299_v34, 0.0  ;;  %v331_v40 = vmul.f32 0.2, %v299_v34  ;;  %vm323_vm3 = vcmp.ge.f32.partialorder %v307_v35, 0.0  ;;  %v339_v41 = vmul.f32 0.2, %v307_v35 }
 0x121   :  { %v349_v42 = vsel %vm317_vm0, %v301_v28, %v333_v38  ;;  %v357_v43 = vsel %vm325_vm1, %v309_v29, %v341_v39  ;;  %v302_v44 = vadd.f32 %v760_v18, %v279_v30  ;;  %v310_v45 = vadd.f32 %v760_v18, %v287_v31 }
 0x122   :  { %v347_v46 = vsel %vm315_vm2, %v299_v34, %v331_v40  ;;  %v355_v47 = vsel %vm323_vm3, %v307_v35, %v339_v41  ;;  %v300_v48 = vadd.f32 %v760_v18, %v277_v36  ;;  %v308_v49 = vadd.f32 %v760_v18, %v285_v37  ;;  %v584_v50 = vpop.f32.mrb[4].mxu0  ;;  %v592_v51 = vpop.f32.mrb[4].mxu1 }
 0x123   :  { %vm318_vm4 = vcmp.ge.f32.partialorder %v302_v44, 0.0  ;;  %v334_v52 = vmul.f32 0.2, %v302_v44  ;;  %vm326_vm5 = vcmp.ge.f32.partialorder %v310_v45, 0.0  ;;  %v342_v53 = vmul.f32 0.2, %v310_v45 }
 0x124   :  { %vm316_vm6 = vcmp.ge.f32.partialorder %v300_v48, 0.0  ;;  %v332_v54 = vmul.f32 0.2, %v300_v48  ;;  %vm324_vm7 = vcmp.ge.f32.partialorder %v308_v49, 0.0  ;;  %v340_v55 = vmul.f32 0.2, %v308_v49 }
 0x125   :  { %v350_v56 = vsel %vm318_vm4, %v302_v44, %v334_v52  ;;  %v358_v57 = vsel %vm326_vm5, %v310_v45, %v342_v53  ;;  %v282_v58 = vmul.f32 %v584_v50, %v755_v16  ;;  %v290_v59 = vmul.f32 %v592_v51, %v755_v16  ;;  %v222_v60 = vpop.f32.mrb[5].mxu0  ;;  %v254_v61 = vpop.f32.mrb[5].mxu1 }
 0x126   :  { %v507_v62 = vpack.c.bf16 %v350_v56, %v349_v42  ;;  %v527_v63 = vpack.c.bf16 %v358_v57, %v357_v43  ;;  %v348_v0 = vsel %vm316_vm6, %v300_v48, %v332_v54  ;;  %v356_v1 = vsel %vm324_vm7, %v308_v49, %v340_v55  ;;  %v585_v2 = vpop.f32.mrb[6].mxu0  ;;  %v593_v3 = vpop.f32.mrb[6].mxu1 }
 0x127   :  { %v502_v4 = vpack.c.bf16 %v348_v0, %v347_v46  ;;  %v522_v5 = vpack.c.bf16 %v356_v1, %v355_v47  ;;  %v305_v6 = vadd.f32 %v760_v18, %v282_v58  ;;  %v313_v7 = vadd.f32 %v760_v18, %v290_v59  ;;  %v225_v8 = vpop.f32.mrb[7].mxu0  ;;  %v257_v9 = vpop.f32.mrb[7].mxu1 }
 0x128   :  { %539 = vst [vmem:[%s822_s4 + $0x8] sm:$0xff] %v507_v62   ;;  %543 = vst [vmem:[%s822_s4 + $0x28] sm:$0xff] %v527_v63   ;;  %v280_v10 = vmul.f32 %v755_v16, %v222_v60  ;;  %v288_v11 = vmul.f32 %v755_v16, %v254_v61  ;;  %v283_v12 = vmul.f32 %v585_v2, %v755_v16 }
 0x129   :  { %v291_v13 = vmul.f32 %v593_v3, %v755_v16  ;;  %503 = vst [vmem:[%s822_s4] sm:$0xff] %v502_v4   ;;  %542 = vst [vmem:[%s822_s4 + $0x20] sm:$0xff] %v522_v5   ;;  %vm321_vm8 = vcmp.ge.f32.partialorder %v305_v6, 0.0  ;;  %v337_v14 = vmul.f32 0.2, %v305_v6  ;;  %vm329_vm9 = vcmp.ge.f32.partialorder %v313_v7, 0.0 }
 0x12a   :  { %v345_v15 = vmul.f32 0.2, %v313_v7  ;;  %v303_v17 = vadd.f32 %v760_v18, %v280_v10  ;;  %v306_v19 = vadd.f32 %v760_v18, %v283_v12  ;;  %v311_v21 = vadd.f32 %v760_v18, %v288_v11 }
 0x12b   :  { %v314_v20 = vadd.f32 %v760_v18, %v291_v13  ;;  %v281_v22 = vmul.f32 %v755_v16, %v225_v8  ;;  %v289_v23 = vmul.f32 %v755_v16, %v257_v9  ;;  %v353_v24 = vsel %vm321_vm8, %v305_v6, %v337_v14 }
 0x12c   :  { %v361_v25 = vsel %vm329_vm9, %v313_v7, %v345_v15  ;;  %vm322_vm10 = vcmp.ge.f32.partialorder %v306_v19, 0.0  ;;  %v338_v26 = vmul.f32 0.2, %v306_v19  ;;  %vm319_vm12 = vcmp.ge.f32.partialorder %v303_v17, 0.0 }
 0x12d   :  { %vm330_vm11 = vcmp.ge.f32.partialorder %v314_v20, 0.0  ;;  %v346_v27 = vmul.f32 0.2, %v314_v20  ;;  %v335_v28 = vmul.f32 0.2, %v303_v17  ;;  %v304_v29 = vadd.f32 %v760_v18, %v281_v22 }
 0x12e   :  { %v312_v30 = vadd.f32 %v760_v18, %v289_v23  ;;  %vm327_vm13 = vcmp.ge.f32.partialorder %v311_v21, 0.0  ;;  %v343_v31 = vmul.f32 0.2, %v311_v21  ;;  %v354_v32 = vsel %vm322_vm10, %v306_v19, %v338_v26 }
 0x12f   :  { %v362_v33 = vsel %vm330_vm11, %v314_v20, %v346_v27  ;;  %v517_v34 = vpack.c.bf16 %v354_v32, %v353_v24  ;;  %vm320_vm14 = vcmp.ge.f32.partialorder %v304_v29, 0.0  ;;  %v336_v16 = vmul.f32 0.2, %v304_v29 }
 0x130   :  { %v537_v35 = vpack.c.bf16 %v362_v33, %v361_v25  ;;  %vm328_vm15 = vcmp.ge.f32.partialorder %v312_v30, 0.0  ;;  %v344_v36 = vmul.f32 0.2, %v312_v30  ;;  %v351_v37 = vsel %vm319_vm12, %v303_v17, %v335_v28 }
 0x131   :  { %541 = vst [vmem:[%s822_s4 + $0x18] sm:$0xff] %v517_v34   ;;  %v352_v18 = vsel %vm320_vm14, %v304_v29, %v336_v16  ;;  %v359_v38 = vsel %vm327_vm13, %v311_v21, %v343_v31 }
 0x132   :  { %545 = vst [vmem:[%s822_s4 + $0x38] sm:$0xff] %v537_v35   ;;  %v512_v39 = vpack.c.bf16 %v352_v18, %v351_v37  ;;  %v360_v40 = vsel %vm328_vm15, %v312_v30, %v344_v36 }
 0x133   :  { %v532_v41 = vpack.c.bf16 %v360_v40, %v359_v38 }
 0x134   :  { %540 = vst [vmem:[%s822_s4 + $0x10] sm:$0xff] %v512_v39  }
 0x135   :  { %544 = vst [vmem:[%s822_s4 + $0x30] sm:$0xff] %v532_v41  }
 0x136   :  { %447 = vsyncpa [#allocation3], 1 }
 0x137   :  { %448 = vsyncpa [#allocation5], 1 }

// kernel: _lambda_.5
= control target key start
LH: loop header
LB: loop body
LE: loop exit
PB: predicated region body
PF: predicated region fallthrough
CT: control target
= control target key end

     0   :  { %9 = vsyncpa [#allocation3], 0  ;;  %s860_s15 = smov [#allocation2]   ;;  %s942_s0 = inlined_call_operand.vmem [shape: bf16[32,640], index: 0, kind: input, shape index: {}]   ;;  %s943_s1 = inlined_call_operand.hbm [shape: bf16[640,128], index: 1, kind: input, shape index: {}]   ;;  %s944_s2 = inlined_call_operand.vmem [shape: f32[1,128], index: 2, kind: input, shape index: {}]   ;;  %s945_s3 = inlined_call_operand.vmem [shape: f32[1,128], index: 3, kind: input, shape index: {}]   ;;  %s946_s4 = inlined_call_operand.vmem [shape: bf16[32,128], index: 4, kind: output, shape index: {}]  }
   0x1   :  { %s17_s16 = sshll.u32 %s860_s15, 4  ;;  %s836_s19 = scalar_lea.hbm %s943_s1, 5120  ;;  %s18_s16 = int_to_ptr.vmem [resolvable:$true] %s17_s16 }
   0x2   :  { %p837_p0 = scmp.ne.s32.totalorder %s943_s1, %s836_s19  ;;  %p840_p1 = scmp.lt.u32.totalorder %s836_s19, %s943_s1 }
   0x4   :  { %p842_p2 = pnand %p840_p1, %p837_p0 }
   0x6   :  { %845 = shalt.err (!%p842_p2)
}
   0x7   :  { %s846_s24 = scalar_lea.vmem %s18_s16, 5120  ;;  %p851_p4 = scmp.lt.s32.totalorder %s18_s16, %s18_s16 }
   0x8   :  { %p847_p3 = scmp.ne.s32.totalorder %s18_s16, %s846_s24  ;;  %p852_p5 = scmp.lt.s32.totalorder %s846_s24, %s846_s24 }
   0xa   :  { %p853_p6 = por %p852_p5, %p851_p4 }
   0xc   :  { %p854_p7 = pnand %p853_p6, %p847_p3 }
   0xe   :  { %857 = shalt.err (!%p854_p7)
}
   0xf   :  { %s861_s25 = smov 64   ;;  %s862_s26 = smov 4  }
  0x10   :  { %23 = dma.hbm_to_vmem [thread:$0]  %s943_s1, 5120, %s18_s16, [#allocation3], %s861_s25, %s861_s25, %s862_s26  }
  0x11   :  { %858 = dma.done.wait [#allocation3], 5120  }
  0x12   :  { %859 = vsyncadd [#allocation3], 4294962176  ;;  %v782_v0 = vld [vmem:[#allocation2 + $0x40] sm:$0xff]   ;;  %v786_v4 = vld [vmem:[#allocation2 + $0x48] sm:$0xff]  }
  0x13   :  { %v783_v1 = vld [vmem:[#allocation2 + $0xc0] sm:$0xff]   ;;  %693 = vmatprep.subr.bf16.mxu0 %v782_v0  ;;  %v787_v5 = vld [vmem:[#allocation2 + $0xc8] sm:$0xff]   ;;  %v790_v8 = vld [vmem:[#allocation2 + $0x50] sm:$0xff]  }
  0x14   :  { %v784_v2 = vld [vmem:[#allocation2] sm:$0xff]   ;;  %721 = vmatprep.subr.bf16.mxu1 %v783_v1  ;;  %v788_v6 = vld [vmem:[#allocation2 + $0x8] sm:$0xff]   ;;  %v791_v9 = vld [vmem:[#allocation2 + $0xd0] sm:$0xff]  }
  0x15   :  { %v785_v3 = vld [vmem:[#allocation2 + $0x80] sm:$0xff]   ;;  %694 = vmatpush3.bf16.msra.mxu0 %v784_v2  ;;  %v789_v7 = vld [vmem:[#allocation2 + $0x88] sm:$0xff]   ;;  %v792_v10 = vld [vmem:[#allocation2 + $0x10] sm:$0xff]  }
  0x16   :  { %722 = vmatpush3.bf16.msra.mxu1 %v785_v3  ;;  %695 = vmatprep.subr.bf16.mxu0 %v786_v4  ;;  %v793_v11 = vld [vmem:[#allocation2 + $0x90] sm:$0xff]   ;;  %v794_v12 = vld [vmem:[#allocation2 + $0x58] sm:$0xff]   ;;  %v798_v16 = vld [vmem:[#allocation2 + $0x60] sm:$0xff]  }
  0x17   :  { %723 = vmatprep.subr.bf16.mxu1 %v787_v5  ;;  %v795_v13 = vld [vmem:[#allocation2 + $0xd8] sm:$0xff]   ;;  %v799_v17 = vld [vmem:[#allocation2 + $0xe0] sm:$0xff]   ;;  %v802_v20 = vld [vmem:[#allocation2 + $0x68] sm:$0xff]  }
  0x18   :  { %v796_v14 = vld [vmem:[#allocation2 + $0x18] sm:$0xff]   ;;  %v800_v18 = vld [vmem:[#allocation2 + $0x20] sm:$0xff]   ;;  %v803_v21 = vld [vmem:[#allocation2 + $0xe8] sm:$0xff]  }
  0x19   :  { %696 = vmatpush3.bf16.msra.mxu0 %v788_v6  ;;  %v797_v15 = vld [vmem:[#allocation2 + $0x98] sm:$0xff]   ;;  %v801_v19 = vld [vmem:[#allocation2 + $0xa0] sm:$0xff]   ;;  %v804_v22 = vld [vmem:[#allocation2 + $0x28] sm:$0xff]  }
  0x1a   :  { %724 = vmatpush3.bf16.msra.mxu1 %v789_v7  ;;  %697 = vmatprep.subr.bf16.mxu0 %v790_v8  ;;  %v805_v23 = vld [vmem:[#allocation2 + $0xa8] sm:$0xff]   ;;  %v806_v24 = vld [vmem:[#allocation2 + $0x70] sm:$0xff]   ;;  %v810_v28 = vld [vmem:[#allocation2 + $0x78] sm:$0xff]  }
  0x1b   :  { %725 = vmatprep.subr.bf16.mxu1 %v791_v9  ;;  %v807_v25 = vld [vmem:[#allocation2 + $0xf0] sm:$0xff]   ;;  %v811_v29 = vld [vmem:[#allocation2 + $0xf8] sm:$0xff]   ;;  %v819_v35 = vld [vmem:[%s942_s0 + $0xc] ss:$20 sps:$4 sm:$0xff]  }
  0x1c   :  { %v808_v26 = vld [vmem:[#allocation2 + $0x30] sm:$0xff]   ;;  %v812_v30 = vld [vmem:[#allocation2 + $0x38] sm:$0xff]   ;;  %v820_v36 = vld [vmem:[#allocation2 + $0x100] sm:$0xff]   ;;  %497 = vmatprep.mubr.bf16.mxu1 %v819_v35 }
  0x1d   :  { %698 = vmatpush3.bf16.msra.mxu0 %v792_v10  ;;  %v809_v27 = vld [vmem:[#allocation2 + $0xb0] sm:$0xff]   ;;  %v813_v31 = vld [vmem:[#allocation2 + $0xb8] sm:$0xff]   ;;  %v821_v37 = vld [vmem:[#allocation2 + $0x108] sm:$0xff]  }
  0x1e   :  { %726 = vmatpush3.bf16.msra.mxu1 %v793_v11  ;;  %699 = vmatprep.subr.bf16.mxu0 %v794_v12  ;;  %v814_v32 = vld [vmem:[%s942_s0] ss:$20 sps:$4 sm:$0xff]   ;;  %v816_v33 = vld [vmem:[%s942_s0 + $0x4] ss:$20 sps:$4 sm:$0xff]   ;;  %v817_v34 = vld [vmem:[%s942_s0 + $0x8] ss:$20 sps:$4 sm:$0xff]  }
  0x1f   :  { %727 = vmatprep.subr.bf16.mxu1 %v795_v13  ;;  %448 = vmatprep.mubr.bf16.mxu0 %v816_v33  ;;  %v822_v38 = vld [vmem:[#allocation2 + $0x110] sm:$0xff]   ;;  %v825_v39 = vld [vmem:[%s942_s0 + $0x2c] ss:$20 sps:$4 sm:$0xff]   ;;  %v823_v41 = vld [vmem:[#allocation2 + $0x118] sm:$0xff]  }
  0x20   :  { %v827_v40 = vld [vmem:[%s942_s0 + $0x34] ss:$20 sps:$4 sm:$0xff]   ;;  %v831_v43 = vld [vmem:[%s942_s0 + $0x30] ss:$20 sps:$4 sm:$0xff]   ;;  %v833_v48 = vld [vmem:[#allocation2 + $0x138] sm:$0xff]  }
  0x21   :  { %700 = vmatpush3.bf16.msra.mxu0 %v796_v14  ;;  %v830_v42 = vld [vmem:[%s942_s0 + $0x28] ss:$20 sps:$4 sm:$0xff]   ;;  %v834_v44 = vld [vmem:[%s942_s0 + $0x10] ss:$20 sps:$4 sm:$0xff]   ;;  %v835_v49 = vld [vmem:[%s942_s0 + $0x38] ss:$20 sps:$4 sm:$0xff]  }
  0x22   :  { %728 = vmatpush3.bf16.msra.mxu1 %v797_v15  ;;  %701 = vmatprep.subr.bf16.mxu0 %v798_v16  ;;  %v824_v45 = vld [vmem:[#allocation2 + $0x120] sm:$0xff]   ;;  %v829_v46 = vld [vmem:[#allocation2 + $0x128] sm:$0xff]   ;;  %v832_v47 = vld [vmem:[#allocation2 + $0x130] sm:$0xff]  }
  0x23   :  { %729 = vmatprep.subr.bf16.mxu1 %v799_v17  ;;  %v672_v15 = vld [vmem:[%s944_s2] ss:$0 sm:$0xff] }
  0x25   :  { %702 = vmatpush3.bf16.msra.mxu0 %v800_v18  ;;  %v673_v18 = vld [vmem:[%s945_s3] ss:$0 sm:$0xff] }
  0x26   :  { %730 = vmatpush3.bf16.msra.mxu1 %v801_v19  ;;  %703 = vmatprep.subr.bf16.mxu0 %v802_v20 }
  0x27   :  { %731 = vmatprep.subr.bf16.mxu1 %v803_v21 }
  0x29   :  { %704 = vmatpush3.bf16.msra.mxu0 %v804_v22 }
  0x2a   :  { %732 = vmatpush3.bf16.msra.mxu1 %v805_v23  ;;  %705 = vmatprep.subr.bf16.mxu0 %v806_v24 }
  0x2b   :  { %733 = vmatprep.subr.bf16.mxu1 %v807_v25 }
  0x2d   :  { %706 = vmatpush3.bf16.msra.mxu0 %v808_v26 }
  0x2e   :  { %734 = vmatpush3.bf16.msra.mxu1 %v809_v27  ;;  %707 = vmatprep.subr.bf16.mxu0 %v810_v28 }
  0x2f   :  { %735 = vmatprep.subr.bf16.mxu1 %v811_v29 }
  0x31   :  { %708 = vmatpush3.bf16.msra.mxu0 %v812_v30 }
  0x32   :  { %736 = vmatpush3.bf16.msra.mxu1 %v813_v31  ;;  %759 = vmatprep.subr.bf16.mxu0 %v820_v36 }
  0x34   :  { %449 = vmatmul.mubr.bf16.vlgmr.msra.gmra.mrb[0].mxu0 %v814_v32 }
  0x35   :  { %498 = vmatmul.mubr.bf16.vlgmr.msra.gmra.mrb[0].mxu1 %v817_v34  ;;  %760 = vmatpush3.bf16.msra.mxu0 %v820_v36 }
  0x36   :  { %761 = vmatprep.subr.bf16.mxu0 %v821_v37  ;;  %456 = vmatprep.mubr.bf16.mxu0 %v825_v39 }
  0x37   :  { %505 = vmatprep.mubr.bf16.mxu1 %v827_v40 }
  0x39   :  { %762 = vmatpush3.bf16.msra.mxu0 %v821_v37 }
  0x3a   :  { %763 = vmatprep.subr.bf16.mxu0 %v822_v38 }
  0x3c   :  { %457 = vmatmul.mubr.bf16.gmra.mrb[4].mxu0 %v830_v42 }
  0x3d   :  { %506 = vmatmul.mubr.bf16.gmra.mrb[4].mxu1 %v831_v43  ;;  %764 = vmatpush3.bf16.msra.mxu0 %v822_v38 }
  0x3e   :  { %765 = vmatprep.subr.bf16.mxu0 %v823_v41  ;;  %775 = vmatprep.mubr.bf16.mxu0 %v834_v44 }
  0x41   :  { %766 = vmatpush3.bf16.msra.mxu0 %v823_v41 }
  0x42   :  { %767 = vmatprep.subr.bf16.mxu0 %v824_v45 }
  0x45   :  { %768 = vmatpush3.bf16.msra.mxu0 %v824_v45 }
  0x46   :  { %769 = vmatprep.subr.bf16.mxu0 %v829_v46 }
  0x49   :  { %770 = vmatpush3.bf16.msra.mxu0 %v829_v46 }
  0x4a   :  { %771 = vmatprep.subr.bf16.mxu0 %v832_v47 }
  0x4d   :  { %772 = vmatpush3.bf16.msra.mxu0 %v832_v47 }
  0x4e   :  { %773 = vmatprep.subr.bf16.mxu0 %v833_v48 }
  0x51   :  { %774 = vmatpush3.bf16.msra.mxu0 %v833_v48 }
  0x54   :  { %776 = vmatmul.mubr.bf16.vlgmr.msra.gmra.mrb[8].mxu0 %v835_v49 }
 0x107   :  { %v709_v50 = vpop.f32.mrb[0].mxu0 }
 0x108   :  { %v737_v51 = vpop.f32.mrb[0].mxu1  ;;  %v710_v52 = vpop.f32.mrb[1].mxu0 }
 0x109   :  { %v711_v53 = vadd.f32 %v710_v52, %v709_v50  ;;  %v738_v54 = vpop.f32.mrb[1].mxu1  ;;  %v712_v55 = vpop.f32.mrb[2].mxu0 }
 0x10a   :  { %v739_v56 = vadd.f32 %v738_v54, %v737_v51  ;;  %v740_v57 = vpop.f32.mrb[2].mxu1  ;;  %v713_v58 = vpop.f32.mrb[3].mxu0 }
 0x10b   :  { %v714_v59 = vadd.f32 %v713_v58, %v712_v55  ;;  %v741_v60 = vpop.f32.mrb[3].mxu1 }
 0x10c   :  { %v742_v61 = vadd.f32 %v741_v60, %v740_v57  ;;  %v500_v62 = vadd.f32 %v739_v56, %v711_v53 }
 0x10e   :  { %v503_v63 = vadd.f32 %v742_v61, %v714_v59 }
 0x10f   :  { %v715_v0 = vpop.f32.mrb[4].mxu0 }
 0x110   :  { %v743_v1 = vpop.f32.mrb[4].mxu1  ;;  %v716_v2 = vpop.f32.mrb[5].mxu0 }
 0x111   :  { %v717_v3 = vadd.f32 %v716_v2, %v715_v0  ;;  %v744_v4 = vpop.f32.mrb[5].mxu1  ;;  %v718_v5 = vpop.f32.mrb[6].mxu0 }
 0x112   :  { %v745_v6 = vadd.f32 %v744_v4, %v743_v1  ;;  %v746_v7 = vpop.f32.mrb[6].mxu1  ;;  %v719_v8 = vpop.f32.mrb[7].mxu0 }
 0x113   :  { %v720_v9 = vadd.f32 %v719_v8, %v718_v5  ;;  %v747_v10 = vpop.f32.mrb[7].mxu1 }
 0x114   :  { %v748_v11 = vadd.f32 %v747_v10, %v746_v7  ;;  %v508_v12 = vadd.f32 %v745_v6, %v717_v3 }
 0x116   :  { %v511_v13 = vadd.f32 %v748_v11, %v720_v9 }
 0x127   :  { %v777_v14 = vpop.f32.mrb[8].mxu0 }
 0x128   :  { %v557_v16 = vadd.f32 %v777_v14, %v508_v12  ;;  %v548_v17 = vpop.f32.mrb[9].mxu0 }
 0x129   :  { %v549_v19 = vadd.f32 %v548_v17, %v500_v62  ;;  %v778_v20 = vpop.f32.mrb[10].mxu0 }
 0x12a   :  { %v572_v21 = vmul.f32 %v672_v15, %v557_v16  ;;  %v560_v22 = vadd.f32 %v778_v20, %v511_v13  ;;  %v551_v23 = vpop.f32.mrb[11].mxu0 }
 0x12b   :  { %v570_v24 = vmul.f32 %v672_v15, %v549_v19  ;;  %v552_v25 = vadd.f32 %v551_v23, %v503_v63 }
 0x12c   :  { %v583_v26 = vadd.f32 %v673_v18, %v572_v21  ;;  %v573_v27 = vmul.f32 %v672_v15, %v560_v22 }
 0x12d   :  { %v581_v28 = vadd.f32 %v673_v18, %v570_v24  ;;  %v571_v29 = vmul.f32 %v672_v15, %v552_v25 }
 0x12e   :  { %v591_v30 = vmul.f32 0.2, %v583_v26  ;;  %v584_v31 = vadd.f32 %v673_v18, %v573_v27  ;;  %vm587_vm0 = vcmp.ge.f32.partialorder %v583_v26, 0.0 }
 0x12f   :  { %v589_v32 = vmul.f32 0.2, %v581_v28  ;;  %v582_v33 = vadd.f32 %v673_v18, %v571_v29  ;;  %vm585_vm1 = vcmp.ge.f32.partialorder %v581_v28, 0.0 }
 0x130   :  { %vm588_vm2 = vcmp.ge.f32.partialorder %v584_v31, 0.0  ;;  %v592_v34 = vmul.f32 0.2, %v584_v31  ;;  %v595_v36 = vsel %vm587_vm0, %v583_v26, %v591_v30 }
 0x131   :  { %vm586_vm3 = vcmp.ge.f32.partialorder %v582_v33, 0.0  ;;  %v590_v35 = vmul.f32 0.2, %v582_v33  ;;  %v593_v38 = vsel %vm585_vm1, %v581_v28, %v589_v32 }
 0x132   :  { %v596_v37 = vsel %vm588_vm2, %v584_v31, %v592_v34 }
 0x133   :  { %v690_v39 = vpack.c.bf16 %v596_v37, %v595_v36  ;;  %v594_v40 = vsel %vm586_vm3, %v582_v33, %v590_v35 }
 0x134   :  { %v685_v41 = vpack.c.bf16 %v594_v40, %v593_v38 }
 0x135   :  { %692 = vst [vmem:[%s946_s4 + $0x8] sm:$0xff] %v690_v39  }
 0x136   :  { %686 = vst [vmem:[%s946_s4] sm:$0xff] %v685_v41  }
 0x137   :  { %621 = vsyncpa [#allocation3], 1 }

// kernel: _lambda_.6
= control target key start
LH: loop header
LB: loop body
LE: loop exit
PB: predicated region body
PF: predicated region fallthrough
CT: control target
= control target key end

     0   :  { %s2060_s1 = inlined_call_operand.vmem [shape: bf16[1152,256], index: 1, kind: input, shape index: {}]   ;;  %s2061_s0 = inlined_call_operand.vmem [shape: bf16[8,1152], index: 0, kind: input, shape index: {}]   ;;  %s2062_s2 = inlined_call_operand.vmem [shape: f32[1,256], index: 2, kind: input, shape index: {}]   ;;  %s2063_s3 = inlined_call_operand.vmem [shape: f32[1,256], index: 3, kind: input, shape index: {}]   ;;  %s2064_s4 = inlined_call_operand.vmem [shape: bf16[8,256], index: 4, kind: output, shape index: {}]  }
   0x1   :  { %v1341_v0 = vld [vmem:[%s2060_s1 + $0x4] ss:$8 sps:$4 sm:$0xff]   ;;  %v1345_v2 = vld [vmem:[%s2060_s1] ss:$8 sps:$4 sm:$0xff]   ;;  %v1347_v4 = vld [vmem:[%s2060_s1 + $0x14] ss:$8 sps:$4 sm:$0xff]  }
   0x2   :  { %v1343_v1 = vld [vmem:[%s2060_s1 + $0x204] ss:$8 sps:$4 sm:$0xff]   ;;  %919 = vmatprep.subr.bf16.mxu1 %v1341_v0  ;;  %v1346_v3 = vld [vmem:[%s2060_s1 + $0x200] ss:$8 sps:$4 sm:$0xff]   ;;  %v1349_v5 = vld [vmem:[%s2060_s1 + $0x214] ss:$8 sps:$4 sm:$0xff]  }
   0x3   :  { %1001 = vmatprep.subr.bf16.mxu0 %v1343_v1  ;;  %920 = vmatpush1.bf16.msra.mxu1 %v1345_v2  ;;  %v1351_v6 = vld [vmem:[%s2060_s1 + $0x10] ss:$8 sps:$4 sm:$0xff]   ;;  %v1353_v8 = vld [vmem:[%s2060_s1 + $0x24] ss:$8 sps:$4 sm:$0xff]   ;;  %v1357_v10 = vld [vmem:[%s2060_s1 + $0x20] ss:$8 sps:$4 sm:$0xff]  }
   0x4   :  { %1002 = vmatpush1.bf16.msra.mxu0 %v1346_v3  ;;  %921 = vmatprep.subr.bf16.mxu1 %v1347_v4  ;;  %v1352_v7 = vld [vmem:[%s2060_s1 + $0x210] ss:$8 sps:$4 sm:$0xff]   ;;  %v1355_v9 = vld [vmem:[%s2060_s1 + $0x224] ss:$8 sps:$4 sm:$0xff]   ;;  %v1358_v11 = vld [vmem:[%s2060_s1 + $0x220] ss:$8 sps:$4 sm:$0xff]  }
   0x5   :  { %1003 = vmatprep.subr.bf16.mxu0 %v1349_v5  ;;  %v1359_v12 = vld [vmem:[%s2060_s1 + $0x34] ss:$8 sps:$4 sm:$0xff]   ;;  %v1363_v14 = vld [vmem:[%s2060_s1 + $0x30] ss:$8 sps:$4 sm:$0xff]   ;;  %v1365_v16 = vld [vmem:[%s2060_s1 + $0x44] ss:$8 sps:$4 sm:$0xff]  }
   0x6   :  { %v1361_v13 = vld [vmem:[%s2060_s1 + $0x234] ss:$8 sps:$4 sm:$0xff]   ;;  %v1364_v15 = vld [vmem:[%s2060_s1 + $0x230] ss:$8 sps:$4 sm:$0xff]   ;;  %v1367_v17 = vld [vmem:[%s2060_s1 + $0x244] ss:$8 sps:$4 sm:$0xff]  }
   0x7   :  { %922 = vmatpush1.bf16.msra.mxu1 %v1351_v6  ;;  %v1369_v18 = vld [vmem:[%s2060_s1 + $0x40] ss:$8 sps:$4 sm:$0xff]   ;;  %v1371_v20 = vld [vmem:[%s2060_s1 + $0x54] ss:$8 sps:$4 sm:$0xff]   ;;  %v1375_v22 = vld [vmem:[%s2060_s1 + $0x50] ss:$8 sps:$4 sm:$0xff]  }
   0x8   :  { %1004 = vmatpush1.bf16.msra.mxu0 %v1352_v7  ;;  %923 = vmatprep.subr.bf16.mxu1 %v1353_v8  ;;  %v1370_v19 = vld [vmem:[%s2060_s1 + $0x240] ss:$8 sps:$4 sm:$0xff]   ;;  %v1373_v21 = vld [vmem:[%s2060_s1 + $0x254] ss:$8 sps:$4 sm:$0xff]   ;;  %v1376_v23 = vld [vmem:[%s2060_s1 + $0x250] ss:$8 sps:$4 sm:$0xff]  }
   0x9   :  { %1005 = vmatprep.subr.bf16.mxu0 %v1355_v9  ;;  %v1377_v24 = vld [vmem:[%s2060_s1 + $0x64] ss:$8 sps:$4 sm:$0xff]   ;;  %v1381_v26 = vld [vmem:[%s2060_s1 + $0x60] ss:$8 sps:$4 sm:$0xff]   ;;  %v1383_v28 = vld [vmem:[%s2060_s1 + $0x74] ss:$8 sps:$4 sm:$0xff]  }
   0xa   :  { %v1379_v25 = vld [vmem:[%s2060_s1 + $0x264] ss:$8 sps:$4 sm:$0xff]   ;;  %v1382_v27 = vld [vmem:[%s2060_s1 + $0x260] ss:$8 sps:$4 sm:$0xff]   ;;  %v1385_v29 = vld [vmem:[%s2060_s1 + $0x274] ss:$8 sps:$4 sm:$0xff]  }
   0xb   :  { %924 = vmatpush1.bf16.msra.mxu1 %v1357_v10  ;;  %v1387_v30 = vld [vmem:[%s2060_s1 + $0x70] ss:$8 sps:$4 sm:$0xff]   ;;  %v1389_v32 = vld [vmem:[%s2060_s1 + $0x84] ss:$8 sps:$4 sm:$0xff]   ;;  %v1393_v34 = vld [vmem:[%s2060_s1 + $0x80] ss:$8 sps:$4 sm:$0xff]  }
   0xc   :  { %1006 = vmatpush1.bf16.msra.mxu0 %v1358_v11  ;;  %925 = vmatprep.subr.bf16.mxu1 %v1359_v12  ;;  %v1388_v31 = vld [vmem:[%s2060_s1 + $0x270] ss:$8 sps:$4 sm:$0xff]   ;;  %v1391_v33 = vld [vmem:[%s2060_s1 + $0x284] ss:$8 sps:$4 sm:$0xff]   ;;  %v1394_v35 = vld [vmem:[%s2060_s1 + $0x280] ss:$8 sps:$4 sm:$0xff]  }
   0xd   :  { %1007 = vmatprep.subr.bf16.mxu0 %v1361_v13  ;;  %v1395_v36 = vld [vmem:[%s2060_s1 + $0x94] ss:$8 sps:$4 sm:$0xff]   ;;  %v1399_v38 = vld [vmem:[%s2060_s1 + $0x90] ss:$8 sps:$4 sm:$0xff]   ;;  %v1401_v40 = vld [vmem:[%s2060_s1 + $0xa4] ss:$8 sps:$4 sm:$0xff]  }
   0xe   :  { %v1397_v37 = vld [vmem:[%s2060_s1 + $0x294] ss:$8 sps:$4 sm:$0xff]   ;;  %v1400_v39 = vld [vmem:[%s2060_s1 + $0x290] ss:$8 sps:$4 sm:$0xff]   ;;  %v1403_v41 = vld [vmem:[%s2060_s1 + $0x2a4] ss:$8 sps:$4 sm:$0xff]  }
   0xf   :  { %926 = vmatpush1.bf16.msra.mxu1 %v1363_v14  ;;  %v1405_v42 = vld [vmem:[%s2060_s1 + $0xa0] ss:$8 sps:$4 sm:$0xff]   ;;  %v1407_v44 = vld [vmem:[%s2060_s1 + $0xb4] ss:$8 sps:$4 sm:$0xff]   ;;  %v1411_v47 = vld [vmem:[%s2060_s1 + $0xb0] ss:$8 sps:$4 sm:$0xff]  }
  0x10   :  { %1008 = vmatpush1.bf16.msra.mxu0 %v1364_v15  ;;  %927 = vmatprep.subr.bf16.mxu1 %v1365_v16  ;;  %v1406_v43 = vld [vmem:[%s2060_s1 + $0x2a0] ss:$8 sps:$4 sm:$0xff]   ;;  %v1409_v45 = vld [vmem:[%s2060_s1 + $0x2b4] ss:$8 sps:$4 sm:$0xff]   ;;  %v1412_v49 = vld [vmem:[%s2060_s1 + $0x2b0] ss:$8 sps:$4 sm:$0xff]  }
  0x11   :  { %1009 = vmatprep.subr.bf16.mxu0 %v1367_v17  ;;  %v18_v46 = vld [vmem:[%s2061_s0] sm:$0xff]  ;;  %v20_v50 = vld [vmem:[%s2061_s0 + $0x10] sm:$0xff] }
  0x12   :  { %v1172_v48 = vcombine.high %v18_v46, %v18_v46  ;;  %v1413_v51 = vld [vmem:[%s2060_s1 + $0xc4] ss:$8 sps:$4 sm:$0xff]   ;;  %v1176_v53 = vcombine.high %v20_v50, %v20_v50  ;;  %v1417_v54 = vld [vmem:[%s2060_s1 + $0xc0] ss:$8 sps:$4 sm:$0xff]   ;;  %v1419_v56 = vld [vmem:[%s2060_s1 + $0xd4] ss:$8 sps:$4 sm:$0xff]   ;;  %v1171_v6 = vcombine.low %v18_v46, %v18_v46  ;;  %v1175_v7 = vcombine.low %v20_v50, %v20_v50 }
  0x13   :  { %928 = vmatpush1.bf16.msra.mxu1 %v1369_v18  ;;  %v1415_v52 = vld [vmem:[%s2060_s1 + $0x2c4] ss:$8 sps:$4 sm:$0xff]   ;;  %v1418_v55 = vld [vmem:[%s2060_s1 + $0x2c0] ss:$8 sps:$4 sm:$0xff]   ;;  %v1421_v57 = vld [vmem:[%s2060_s1 + $0x2d4] ss:$8 sps:$4 sm:$0xff]  }
  0x14   :  { %1010 = vmatpush1.bf16.msra.mxu0 %v1370_v19  ;;  %929 = vmatprep.subr.bf16.mxu1 %v1371_v20  ;;  %v1423_v58 = vld [vmem:[%s2060_s1 + $0xd0] ss:$8 sps:$4 sm:$0xff]   ;;  %v1425_v60 = vld [vmem:[%s2060_s1 + $0xe4] ss:$8 sps:$4 sm:$0xff]   ;;  %v1429_v62 = vld [vmem:[%s2060_s1 + $0xe0] ss:$8 sps:$4 sm:$0xff]  }
  0x15   :  { %1011 = vmatprep.subr.bf16.mxu0 %v1373_v21  ;;  %951 = vmatprep.mubr.bf16.mxu1 %v1172_v48  ;;  %v1424_v59 = vld [vmem:[%s2060_s1 + $0x2d0] ss:$8 sps:$4 sm:$0xff]   ;;  %v1427_v61 = vld [vmem:[%s2060_s1 + $0x2e4] ss:$8 sps:$4 sm:$0xff]   ;;  %v1430_v63 = vld [vmem:[%s2060_s1 + $0x2e0] ss:$8 sps:$4 sm:$0xff]  }
  0x16   :  { %1033 = vmatprep.mubr.bf16.mxu0 %v1176_v53  ;;  %v1431_v0 = vld [vmem:[%s2060_s1 + $0xf4] ss:$8 sps:$4 sm:$0xff]   ;;  %v1435_v2 = vld [vmem:[%s2060_s1 + $0xf0] ss:$8 sps:$4 sm:$0xff]   ;;  %v1441_v4 = vld [vmem:[%s2060_s1 + $0x104] ss:$8 sps:$4 sm:$0xff]  }
  0x17   :  { %930 = vmatpush1.bf16.msra.mxu1 %v1375_v22  ;;  %v1433_v1 = vld [vmem:[%s2060_s1 + $0x2f4] ss:$8 sps:$4 sm:$0xff]   ;;  %v1436_v3 = vld [vmem:[%s2060_s1 + $0x2f0] ss:$8 sps:$4 sm:$0xff]   ;;  %v1446_v5 = vld [vmem:[%s2060_s1 + $0x304] ss:$8 sps:$4 sm:$0xff]  }
  0x18   :  { %1012 = vmatpush1.bf16.msra.mxu0 %v1376_v23  ;;  %931 = vmatprep.subr.bf16.mxu1 %v1377_v24  ;;  %v1439_v8 = vld [vmem:[%s2060_s1 + $0x100] ss:$8 sps:$4 sm:$0xff]   ;;  %v1449_v10 = vld [vmem:[%s2060_s1 + $0x114] ss:$8 sps:$4 sm:$0xff]   ;;  %v1447_v12 = vld [vmem:[%s2060_s1 + $0x110] ss:$8 sps:$4 sm:$0xff]  }
  0x19   :  { %1013 = vmatprep.subr.bf16.mxu0 %v1379_v25  ;;  %v1444_v9 = vld [vmem:[%s2060_s1 + $0x300] ss:$8 sps:$4 sm:$0xff]   ;;  %v1452_v11 = vld [vmem:[%s2060_s1 + $0x314] ss:$8 sps:$4 sm:$0xff]   ;;  %v1450_v13 = vld [vmem:[%s2060_s1 + $0x310] ss:$8 sps:$4 sm:$0xff]  }
  0x1a   :  { %v1455_v14 = vld [vmem:[%s2060_s1 + $0x124] ss:$8 sps:$4 sm:$0xff]   ;;  %v1453_v16 = vld [vmem:[%s2060_s1 + $0x120] ss:$8 sps:$4 sm:$0xff]   ;;  %v1461_v18 = vld [vmem:[%s2060_s1 + $0x134] ss:$8 sps:$4 sm:$0xff]  }
  0x1b   :  { %932 = vmatpush1.bf16.msra.mxu1 %v1381_v26  ;;  %v1458_v15 = vld [vmem:[%s2060_s1 + $0x324] ss:$8 sps:$4 sm:$0xff]   ;;  %v1456_v17 = vld [vmem:[%s2060_s1 + $0x320] ss:$8 sps:$4 sm:$0xff]   ;;  %v1464_v19 = vld [vmem:[%s2060_s1 + $0x334] ss:$8 sps:$4 sm:$0xff]  }
  0x1c   :  { %1014 = vmatpush1.bf16.msra.mxu0 %v1382_v27  ;;  %933 = vmatprep.subr.bf16.mxu1 %v1383_v28  ;;  %v1459_v20 = vld [vmem:[%s2060_s1 + $0x130] ss:$8 sps:$4 sm:$0xff]   ;;  %v1467_v22 = vld [vmem:[%s2060_s1 + $0x144] ss:$8 sps:$4 sm:$0xff]   ;;  %v1465_v24 = vld [vmem:[%s2060_s1 + $0x140] ss:$8 sps:$4 sm:$0xff]  }
  0x1d   :  { %1015 = vmatprep.subr.bf16.mxu0 %v1385_v29  ;;  %v1462_v21 = vld [vmem:[%s2060_s1 + $0x330] ss:$8 sps:$4 sm:$0xff]   ;;  %v1470_v23 = vld [vmem:[%s2060_s1 + $0x344] ss:$8 sps:$4 sm:$0xff]   ;;  %v1468_v25 = vld [vmem:[%s2060_s1 + $0x340] ss:$8 sps:$4 sm:$0xff]  }
  0x1e   :  { %v1473_v26 = vld [vmem:[%s2060_s1 + $0x154] ss:$8 sps:$4 sm:$0xff]   ;;  %v1471_v28 = vld [vmem:[%s2060_s1 + $0x150] ss:$8 sps:$4 sm:$0xff]   ;;  %v1503_v50 = vld [vmem:[%s2060_s1 + $0x1a4] ss:$8 sps:$4 sm:$0xff]  }
  0x1f   :  { %934 = vmatpush1.bf16.msra.mxu1 %v1387_v30  ;;  %v1476_v27 = vld [vmem:[%s2060_s1 + $0x354] ss:$8 sps:$4 sm:$0xff]   ;;  %v1474_v29 = vld [vmem:[%s2060_s1 + $0x350] ss:$8 sps:$4 sm:$0xff]   ;;  %v1479_v30 = vld [vmem:[%s2060_s1 + $0x164] ss:$8 sps:$4 sm:$0xff]  }
  0x20   :  { %1016 = vmatpush1.bf16.msra.mxu0 %v1388_v31  ;;  %935 = vmatprep.subr.bf16.mxu1 %v1389_v32  ;;  %v1482_v31 = vld [vmem:[%s2060_s1 + $0x364] ss:$8 sps:$4 sm:$0xff]   ;;  %v1497_v46 = vld [vmem:[%s2060_s1 + $0x194] ss:$8 sps:$4 sm:$0xff]   ;;  %v1495_v48 = vld [vmem:[%s2060_s1 + $0x190] ss:$8 sps:$4 sm:$0xff]  }
  0x21   :  { %1017 = vmatprep.subr.bf16.mxu0 %v1391_v33  ;;  %v1871_v32 = vld [vmem:[%s2061_s0 + $0x8] sm:$0xff]  ;;  %v1876_v33 = vld [vmem:[%s2061_s0 + $0x18] sm:$0xff] }
  0x22   :  { %v1504_v53 = vld [vmem:[%s2060_s1 + $0x3a0] ss:$8 sps:$4 sm:$0xff]  }
  0x23   :  { %936 = vmatpush1.bf16.msra.mxu1 %v1393_v34  ;;  %v1477_v34 = vld [vmem:[%s2060_s1 + $0x160] ss:$8 sps:$4 sm:$0xff]  }
  0x24   :  { %1018 = vmatpush1.bf16.msra.mxu0 %v1394_v35  ;;  %937 = vmatprep.subr.bf16.mxu1 %v1395_v36  ;;  %v1480_v35 = vld [vmem:[%s2060_s1 + $0x360] ss:$8 sps:$4 sm:$0xff]   ;;  %v1174_v36 = vcombine.high %v1871_v32, %v1871_v32 }
  0x25   :  { %1019 = vmatprep.subr.bf16.mxu0 %v1397_v37  ;;  %v1178_v37 = vcombine.high %v1876_v33, %v1876_v33 }
  0x27   :  { %938 = vmatpush1.bf16.msra.mxu1 %v1399_v38  ;;  %v1485_v38 = vld [vmem:[%s2060_s1 + $0x174] ss:$8 sps:$4 sm:$0xff]  }
  0x28   :  { %1020 = vmatpush1.bf16.msra.mxu0 %v1400_v39  ;;  %939 = vmatprep.subr.bf16.mxu1 %v1401_v40  ;;  %v1488_v39 = vld [vmem:[%s2060_s1 + $0x374] ss:$8 sps:$4 sm:$0xff]   ;;  %v1483_v40 = vld [vmem:[%s2060_s1 + $0x170] ss:$8 sps:$4 sm:$0xff]  }
  0x29   :  { %1021 = vmatprep.subr.bf16.mxu0 %v1403_v41  ;;  %v1486_v41 = vld [vmem:[%s2060_s1 + $0x370] ss:$8 sps:$4 sm:$0xff]  }
  0x2b   :  { %940 = vmatpush1.bf16.msra.mxu1 %v1405_v42  ;;  %v1491_v42 = vld [vmem:[%s2060_s1 + $0x184] ss:$8 sps:$4 sm:$0xff]  }
  0x2c   :  { %1022 = vmatpush1.bf16.msra.mxu0 %v1406_v43  ;;  %941 = vmatprep.subr.bf16.mxu1 %v1407_v44  ;;  %v1494_v43 = vld [vmem:[%s2060_s1 + $0x384] ss:$8 sps:$4 sm:$0xff]   ;;  %v1489_v44 = vld [vmem:[%s2060_s1 + $0x180] ss:$8 sps:$4 sm:$0xff]  }
  0x2d   :  { %1023 = vmatprep.subr.bf16.mxu0 %v1409_v45  ;;  %v1492_v45 = vld [vmem:[%s2060_s1 + $0x380] ss:$8 sps:$4 sm:$0xff]  }
  0x2f   :  { %942 = vmatpush1.bf16.msra.mxu1 %v1411_v47  ;;  %v1500_v47 = vld [vmem:[%s2060_s1 + $0x394] ss:$8 sps:$4 sm:$0xff]  }
  0x30   :  { %1024 = vmatpush1.bf16.msra.mxu0 %v1412_v49  ;;  %943 = vmatprep.subr.bf16.mxu1 %v1413_v51  ;;  %v1498_v49 = vld [vmem:[%s2060_s1 + $0x390] ss:$8 sps:$4 sm:$0xff]   ;;  %v1506_v51 = vld [vmem:[%s2060_s1 + $0x3a4] ss:$8 sps:$4 sm:$0xff]  }
  0x31   :  { %1025 = vmatprep.subr.bf16.mxu0 %v1415_v52  ;;  %v1501_v52 = vld [vmem:[%s2060_s1 + $0x1a0] ss:$8 sps:$4 sm:$0xff]  }
  0x33   :  { %944 = vmatpush1.bf16.msra.mxu1 %v1417_v54  ;;  %v1509_v54 = vld [vmem:[%s2060_s1 + $0x1b4] ss:$8 sps:$4 sm:$0xff]  }
  0x34   :  { %1026 = vmatpush1.bf16.msra.mxu0 %v1418_v55  ;;  %945 = vmatprep.subr.bf16.mxu1 %v1419_v56  ;;  %v1512_v55 = vld [vmem:[%s2060_s1 + $0x3b4] ss:$8 sps:$4 sm:$0xff]   ;;  %v1507_v56 = vld [vmem:[%s2060_s1 + $0x1b0] ss:$8 sps:$4 sm:$0xff]  }
  0x35   :  { %1027 = vmatprep.subr.bf16.mxu0 %v1421_v57  ;;  %v1510_v57 = vld [vmem:[%s2060_s1 + $0x3b0] ss:$8 sps:$4 sm:$0xff]  }
  0x37   :  { %946 = vmatpush1.bf16.msra.mxu1 %v1423_v58  ;;  %v1515_v58 = vld [vmem:[%s2060_s1 + $0x1c4] ss:$8 sps:$4 sm:$0xff]  }
  0x38   :  { %1028 = vmatpush1.bf16.msra.mxu0 %v1424_v59  ;;  %947 = vmatprep.subr.bf16.mxu1 %v1425_v60  ;;  %v1518_v59 = vld [vmem:[%s2060_s1 + $0x3c4] ss:$8 sps:$4 sm:$0xff]   ;;  %v1513_v60 = vld [vmem:[%s2060_s1 + $0x1c0] ss:$8 sps:$4 sm:$0xff]  }
  0x39   :  { %1029 = vmatprep.subr.bf16.mxu0 %v1427_v61  ;;  %v1516_v61 = vld [vmem:[%s2060_s1 + $0x3c0] ss:$8 sps:$4 sm:$0xff]  }
  0x3b   :  { %948 = vmatpush1.bf16.msra.mxu1 %v1429_v62  ;;  %v1521_v62 = vld [vmem:[%s2060_s1 + $0x1d4] ss:$8 sps:$4 sm:$0xff]  }
  0x3c   :  { %1030 = vmatpush1.bf16.msra.mxu0 %v1430_v63  ;;  %949 = vmatprep.subr.bf16.mxu1 %v1431_v0  ;;  %v1524_v63 = vld [vmem:[%s2060_s1 + $0x3d4] ss:$8 sps:$4 sm:$0xff]   ;;  %v1519_v0 = vld [vmem:[%s2060_s1 + $0x1d0] ss:$8 sps:$4 sm:$0xff]  }
  0x3d   :  { %1031 = vmatprep.subr.bf16.mxu0 %v1433_v1  ;;  %v1522_v1 = vld [vmem:[%s2060_s1 + $0x3d0] ss:$8 sps:$4 sm:$0xff]  }
  0x3f   :  { %950 = vmatpush1.bf16.msra.mxu1 %v1435_v2  ;;  %v1527_v2 = vld [vmem:[%s2060_s1 + $0x1e4] ss:$8 sps:$4 sm:$0xff]  }
  0x40   :  { %1032 = vmatpush1.bf16.msra.mxu0 %v1436_v3  ;;  %960 = vmatprep.subr.bf16.mxu1 %v1441_v4  ;;  %v1530_v3 = vld [vmem:[%s2060_s1 + $0x3e4] ss:$8 sps:$4 sm:$0xff]   ;;  %v1525_v4 = vld [vmem:[%s2060_s1 + $0x1e0] ss:$8 sps:$4 sm:$0xff]  }
  0x41   :  { %1042 = vmatprep.subr.bf16.mxu0 %v1446_v5  ;;  %v1528_v5 = vld [vmem:[%s2060_s1 + $0x3e0] ss:$8 sps:$4 sm:$0xff]  }
  0x42   :  { %952 = vmatmul.mubr.bf16.vlgmr.msra.gmra.mrb[0].mxu1 %v1171_v6  ;;  %v1533_v6 = vld [vmem:[%s2060_s1 + $0x1f4] ss:$8 sps:$4 sm:$0xff]  }
  0x43   :  { %1034 = vmatmul.mubr.bf16.vlgmr.msra.gmra.mrb[0].mxu0 %v1175_v7  ;;  %961 = vmatpush1.bf16.msra.mxu1 %v1439_v8  ;;  %v1536_v7 = vld [vmem:[%s2060_s1 + $0x3f4] ss:$8 sps:$4 sm:$0xff]   ;;  %v1531_v8 = vld [vmem:[%s2060_s1 + $0x1f0] ss:$8 sps:$4 sm:$0xff]  }
  0x44   :  { %1043 = vmatpush1.bf16.msra.mxu0 %v1444_v9  ;;  %962 = vmatprep.subr.bf16.mxu1 %v1449_v10  ;;  %v1534_v9 = vld [vmem:[%s2060_s1 + $0x3f0] ss:$8 sps:$4 sm:$0xff]   ;;  %v1543_v10 = vld [vmem:[%s2060_s1 + $0x404] ss:$8 sps:$4 sm:$0xff]  }
  0x45   :  { %1044 = vmatprep.subr.bf16.mxu0 %v1452_v11  ;;  %992 = vmatprep.mubr.bf16.mxu1 %v1174_v36  ;;  %v1173_v11 = vcombine.low %v1871_v32, %v1871_v32 }
  0x46   :  { %1074 = vmatprep.mubr.bf16.mxu0 %v1178_v37  ;;  %v1124_v37 = vld [vmem:[%s2062_s2] sm:$0x3] }
  0x47   :  { %963 = vmatpush1.bf16.msra.mxu1 %v1447_v12  ;;  %v1177_v12 = vcombine.low %v1876_v33, %v1876_v33 }
  0x48   :  { %1045 = vmatpush1.bf16.msra.mxu0 %v1450_v13  ;;  %964 = vmatprep.subr.bf16.mxu1 %v1455_v14  ;;  %v1541_v13 = vld [vmem:[%s2060_s1 + $0x400] ss:$8 sps:$4 sm:$0xff]   ;;  %v1546_v14 = vld [vmem:[%s2060_s1 + $0x414] ss:$8 sps:$4 sm:$0xff]  }
  0x49   :  { %1046 = vmatprep.subr.bf16.mxu0 %v1458_v15  ;;  %v1544_v15 = vld [vmem:[%s2060_s1 + $0x410] ss:$8 sps:$4 sm:$0xff]  }
  0x4b   :  { %965 = vmatpush1.bf16.msra.mxu1 %v1453_v16  ;;  %v1566_v16 = vmov 0  }
  0x4c   :  { %1047 = vmatpush1.bf16.msra.mxu0 %v1456_v17  ;;  %966 = vmatprep.subr.bf16.mxu1 %v1461_v18  ;;  %v1549_v17 = vld [vmem:[%s2060_s1 + $0x424] ss:$8 sps:$4 sm:$0xff]   ;;  %v1547_v18 = vld [vmem:[%s2060_s1 + $0x420] ss:$8 sps:$4 sm:$0xff]  }
  0x4d   :  { %1048 = vmatprep.subr.bf16.mxu0 %v1464_v19  ;;  %v1552_v19 = vld [vmem:[%s2060_s1 + $0x434] ss:$8 sps:$4 sm:$0xff]  }
  0x4f   :  { %967 = vmatpush1.bf16.msra.mxu1 %v1459_v20  ;;  %v1550_v20 = vld [vmem:[%s2060_s1 + $0x430] ss:$8 sps:$4 sm:$0xff]  }
  0x50   :  { %1049 = vmatpush1.bf16.msra.mxu0 %v1462_v21  ;;  %968 = vmatprep.subr.bf16.mxu1 %v1467_v22  ;;  %v1555_v21 = vld [vmem:[%s2060_s1 + $0x444] ss:$8 sps:$4 sm:$0xff]   ;;  %v1553_v22 = vld [vmem:[%s2060_s1 + $0x440] ss:$8 sps:$4 sm:$0xff]  }
  0x51   :  { %1050 = vmatprep.subr.bf16.mxu0 %v1470_v23  ;;  %v1558_v23 = vld [vmem:[%s2060_s1 + $0x454] ss:$8 sps:$4 sm:$0xff]  }
  0x53   :  { %969 = vmatpush1.bf16.msra.mxu1 %v1465_v24  ;;  %v1556_v24 = vld [vmem:[%s2060_s1 + $0x450] ss:$8 sps:$4 sm:$0xff]  }
  0x54   :  { %1051 = vmatpush1.bf16.msra.mxu0 %v1468_v25  ;;  %970 = vmatprep.subr.bf16.mxu1 %v1473_v26  ;;  %v1561_v25 = vld [vmem:[%s2060_s1 + $0x464] ss:$8 sps:$4 sm:$0xff]   ;;  %v1559_v26 = vld [vmem:[%s2060_s1 + $0x460] ss:$8 sps:$4 sm:$0xff]  }
  0x55   :  { %1052 = vmatprep.subr.bf16.mxu0 %v1476_v27  ;;  %v1564_v27 = vld [vmem:[%s2060_s1 + $0x474] ss:$8 sps:$4 sm:$0xff]  }
  0x57   :  { %971 = vmatpush1.bf16.msra.mxu1 %v1471_v28  ;;  %v1562_v28 = vld [vmem:[%s2060_s1 + $0x470] ss:$8 sps:$4 sm:$0xff]  }
  0x58   :  { %1053 = vmatpush1.bf16.msra.mxu0 %v1474_v29  ;;  %972 = vmatprep.subr.bf16.mxu1 %v1479_v30  ;;  %v1565_v29 = vld [vmem:[%s2061_s0 + $0x20] ss:$0 sps:$4 sm:$0xff]  }
  0x59   :  { %1054 = vmatprep.subr.bf16.mxu0 %v1482_v31 }
  0x5b   :  { %973 = vmatpush1.bf16.msra.mxu1 %v1477_v34  ;;  %v1126_v34 = vlaneseq }
  0x5c   :  { %1055 = vmatpush1.bf16.msra.mxu0 %v1480_v35  ;;  %974 = vmatprep.subr.bf16.mxu1 %v1485_v38 }
  0x5d   :  { %1056 = vmatprep.subr.bf16.mxu0 %v1488_v39  ;;  %v1127_v35 = vshrl.u32 %v1126_v34, 7  ;;  %v1138_v39 = vld [vmem:[%s2063_s3] sm:$0x3] }
  0x5f   :  { %975 = vmatpush1.bf16.msra.mxu1 %v1483_v40  ;;  %v1128_v36 = vsub.s32 0, %v1127_v35  ;;  %v1132_v38 = vsub.s32 1, %v1127_v35 }
  0x60   :  { %1057 = vmatpush1.bf16.msra.mxu0 %v1486_v41  ;;  %976 = vmatprep.subr.bf16.mxu1 %v1491_v42 }
  0x61   :  { %1058 = vmatprep.subr.bf16.mxu0 %v1494_v43  ;;  %v1129_v40 = vrot.slane %v1124_v37, %v1128_v36  ;;  %v1133_v42 = vrot.slane %v1124_v37, %v1132_v38 }
  0x63   :  { %977 = vmatpush1.bf16.msra.mxu1 %v1489_v44  ;;  %v1143_v44 = vrot.slane %v1138_v39, %v1128_v36 }
  0x64   :  { %1059 = vmatpush1.bf16.msra.mxu0 %v1492_v45  ;;  %978 = vmatprep.subr.bf16.mxu1 %v1497_v46 }
  0x65   :  { %1060 = vmatprep.subr.bf16.mxu0 %v1500_v47  ;;  %v1147_v47 = vrot.slane %v1138_v39, %v1132_v38 }
  0x67   :  { %979 = vmatpush1.bf16.msra.mxu1 %v1495_v48 }
  0x68   :  { %1061 = vmatpush1.bf16.msra.mxu0 %v1498_v49  ;;  %980 = vmatprep.subr.bf16.mxu1 %v1503_v50 }
  0x69   :  { %1062 = vmatprep.subr.bf16.mxu0 %v1506_v51 }
  0x6b   :  { %981 = vmatpush1.bf16.msra.mxu1 %v1501_v52 }
  0x6c   :  { %1063 = vmatpush1.bf16.msra.mxu0 %v1504_v53  ;;  %982 = vmatprep.subr.bf16.mxu1 %v1509_v54 }
  0x6d   :  { %1064 = vmatprep.subr.bf16.mxu0 %v1512_v55 }
  0x6f   :  { %983 = vmatpush1.bf16.msra.mxu1 %v1507_v56 }
  0x70   :  { %1065 = vmatpush1.bf16.msra.mxu0 %v1510_v57  ;;  %984 = vmatprep.subr.bf16.mxu1 %v1515_v58 }
  0x71   :  { %1066 = vmatprep.subr.bf16.mxu0 %v1518_v59 }
  0x73   :  { %985 = vmatpush1.bf16.msra.mxu1 %v1513_v60 }
  0x74   :  { %1067 = vmatpush1.bf16.msra.mxu0 %v1516_v61  ;;  %986 = vmatprep.subr.bf16.mxu1 %v1521_v62 }
  0x75   :  { %1068 = vmatprep.subr.bf16.mxu0 %v1524_v63 }
  0x77   :  { %987 = vmatpush1.bf16.msra.mxu1 %v1519_v0 }
  0x78   :  { %1069 = vmatpush1.bf16.msra.mxu0 %v1522_v1  ;;  %988 = vmatprep.subr.bf16.mxu1 %v1527_v2 }
  0x79   :  { %1070 = vmatprep.subr.bf16.mxu0 %v1530_v3 }
  0x7b   :  { %989 = vmatpush1.bf16.msra.mxu1 %v1525_v4 }
  0x7c   :  { %1071 = vmatpush1.bf16.msra.mxu0 %v1528_v5  ;;  %990 = vmatprep.subr.bf16.mxu1 %v1533_v6 }
  0x7d   :  { %1072 = vmatprep.subr.bf16.mxu0 %v1536_v7 }
  0x7f   :  { %991 = vmatpush1.bf16.msra.mxu1 %v1531_v8 }
  0x80   :  { %1073 = vmatpush1.bf16.msra.mxu0 %v1534_v9 }
  0x81   :  { %1083 = vmatprep.subr.bf16.mxu0 %v1543_v10 }
  0x82   :  { %993 = vmatmul.mubr.bf16.vlgmr.msra.gmra.mrb[0].mxu1 %v1173_v11 }
  0x83   :  { %1075 = vmatmul.mubr.bf16.vlgmr.msra.gmra.mrb[0].mxu0 %v1177_v12 }
  0x84   :  { %1084 = vmatpush1.bf16.msra.mxu0 %v1541_v13  ;;  %1115 = vmatprep.mubr.bf16.mxu0 %v1566_v16 }
  0x85   :  { %1085 = vmatprep.subr.bf16.mxu0 %v1546_v14 }
  0x88   :  { %1086 = vmatpush1.bf16.msra.mxu0 %v1544_v15 }
  0x89   :  { %1087 = vmatprep.subr.bf16.mxu0 %v1549_v17 }
  0x8c   :  { %1088 = vmatpush1.bf16.msra.mxu0 %v1547_v18 }
  0x8d   :  { %1089 = vmatprep.subr.bf16.mxu0 %v1552_v19 }
  0x90   :  { %1090 = vmatpush1.bf16.msra.mxu0 %v1550_v20 }
  0x91   :  { %1091 = vmatprep.subr.bf16.mxu0 %v1555_v21 }
  0x94   :  { %1092 = vmatpush1.bf16.msra.mxu0 %v1553_v22 }
  0x95   :  { %1093 = vmatprep.subr.bf16.mxu0 %v1558_v23 }
  0x98   :  { %1094 = vmatpush1.bf16.msra.mxu0 %v1556_v24 }
  0x99   :  { %1095 = vmatprep.subr.bf16.mxu0 %v1561_v25 }
  0x9c   :  { %1096 = vmatpush1.bf16.msra.mxu0 %v1559_v26 }
  0x9d   :  { %1097 = vmatprep.subr.bf16.mxu0 %v1564_v27 }
  0xa0   :  { %1098 = vmatpush1.bf16.msra.mxu0 %v1562_v28 }
  0xa3   :  { %1116 = vmatmul.mubr.bf16.vlgmr.msra.gmra.mrb[0].mxu0 %v1565_v29 }
 0x155   :  { %v994_v30 = vpop.f32.mrb[0].mxu1 }
 0x156   :  { %v996_v31 = vpop.f32.mrb[1].mxu1 }
 0x157   :  { %v998_v32 = vpop.f32.mrb[2].mxu1 }
 0x158   :  { %v999_v33 = vpop.f32.mrb[3].mxu1 }
 0x176   :  { %v1117_v41 = vpop.f32.mrb[0].mxu0 }
 0x177   :  { %v1326_v43 = vadd.f32 %v1117_v41, %v994_v30  ;;  %v1119_v45 = vpop.f32.mrb[1].mxu0 }
 0x178   :  { %v1327_v46 = vadd.f32 %v1119_v45, %v996_v31  ;;  %v1121_v48 = vpop.f32.mrb[2].mxu0 }
 0x179   :  { %v1136_v49 = vmul.f32 %v1326_v43, %v1129_v40  ;;  %v1122_v50 = vpop.f32.mrb[3].mxu0 }
 0x17a   :  { %v1137_v51 = vmul.f32 %v1327_v46, %v1133_v42 }
 0x17b   :  { %v1150_v52 = vadd.f32 %v1143_v44, %v1136_v49 }
 0x17c   :  { %v1151_v53 = vadd.f32 %v1147_v47, %v1137_v51 }
 0x17d   :  { %vm1152_vm0 = vcmp.ge.f32.partialorder %v1150_v52, 0.0  ;;  %v1154_v54 = vmul.f32 0.2, %v1150_v52 }
 0x17e   :  { %vm1153_vm1 = vcmp.ge.f32.partialorder %v1151_v53, 0.0  ;;  %v1155_v55 = vmul.f32 0.2, %v1151_v53 }
 0x17f   :  { %v1156_v56 = vsel %vm1152_vm0, %v1150_v52, %v1154_v54 }
 0x180   :  { %v1157_v57 = vsel %vm1153_vm1, %v1151_v53, %v1155_v55 }
 0x181   :  { %v1325_v58 = vpack.c.bf16 %v1157_v57, %v1156_v56 }
 0x183   :  { %1166 = vst [vmem:[%s2064_s4] sm:$0xff] %v1325_v58 }

// kernel: _lambda_.7
= control target key start
LH: loop header
LB: loop body
LE: loop exit
PB: predicated region body
PF: predicated region fallthrough
CT: control target
= control target key end

     0   :  { %s7928_s0 = inlined_call_operand.vmem [shape: bf16[8,2304], index: 0, kind: input, shape index: {}]   ;;  %s7929_s1 = inlined_call_operand.vmem [shape: bf16[2304,512], index: 1, kind: input, shape index: {}]   ;;  %s7930_s2 = inlined_call_operand.vmem [shape: f32[1,512], index: 2, kind: input, shape index: {}]   ;;  %s7931_s3 = inlined_call_operand.vmem [shape: f32[1,512], index: 3, kind: input, shape index: {}]   ;;  %s7932_s4 = inlined_call_operand.vmem [shape: f32[1,512], index: 4, kind: input, shape index: {}]   ;;  %s7933_s5 = inlined_call_operand.vmem [shape: f32[16,128], index: 5, kind: input, shape index: {}]   ;;  %s7934_s6 = inlined_call_operand.vmem [shape: f32[16,128], index: 6, kind: input, shape index: {}]   ;;  %s7935_s7 = inlined_call_operand.hbm [shape: f32[1,1], index: 7, kind: output, shape index: {}]  }
   0x1   :  { %v5129_v0 = vld [vmem:[%s7929_s1 + $0x4] ss:$16 sps:$4 sm:$0xff]   ;;  %v5131_v1 = vld [vmem:[%s7929_s1 + $0xc] ss:$16 sps:$4 sm:$0xff]   ;;  %v5133_v2 = vld [vmem:[%s7929_s1] ss:$16 sps:$4 sm:$0xff]  }
   0x2   :  { %3555 = vmatprep.subr.bf16.mxu0 %v5129_v0  ;;  %v5134_v3 = vld [vmem:[%s7929_s1 + $0x8] ss:$16 sps:$4 sm:$0xff]   ;;  %3924 = vmatprep.subr.bf16.mxu1 %v5131_v1  ;;  %v5135_v4 = vld [vmem:[%s7929_s1 + $0x24] ss:$16 sps:$4 sm:$0xff]   ;;  %v5137_v5 = vld [vmem:[%s7929_s1 + $0x2c] ss:$16 sps:$4 sm:$0xff]  }
   0x3   :  { %3556 = vmatpush1.bf16.msra.mxu0 %v5133_v2  ;;  %3925 = vmatpush1.bf16.msra.mxu1 %v5134_v3  ;;  %v5139_v6 = vld [vmem:[%s7929_s1 + $0x20] ss:$16 sps:$4 sm:$0xff]   ;;  %v5140_v7 = vld [vmem:[%s7929_s1 + $0x28] ss:$16 sps:$4 sm:$0xff]   ;;  %v5141_v8 = vld [vmem:[%s7929_s1 + $0x44] ss:$16 sps:$4 sm:$0xff]  }
   0x4   :  { %3557 = vmatprep.subr.bf16.mxu0 %v5135_v4  ;;  %3926 = vmatprep.subr.bf16.mxu1 %v5137_v5  ;;  %v5143_v9 = vld [vmem:[%s7929_s1 + $0x4c] ss:$16 sps:$4 sm:$0xff]   ;;  %v5145_v10 = vld [vmem:[%s7929_s1 + $0x40] ss:$16 sps:$4 sm:$0xff]   ;;  %v5146_v11 = vld [vmem:[%s7929_s1 + $0x48] ss:$16 sps:$4 sm:$0xff]  }
   0x5   :  { %v5147_v12 = vld [vmem:[%s7929_s1 + $0x64] ss:$16 sps:$4 sm:$0xff]   ;;  %v5149_v13 = vld [vmem:[%s7929_s1 + $0x6c] ss:$16 sps:$4 sm:$0xff]   ;;  %v5151_v14 = vld [vmem:[%s7929_s1 + $0x60] ss:$16 sps:$4 sm:$0xff]  }
   0x6   :  { %v5152_v15 = vld [vmem:[%s7929_s1 + $0x68] ss:$16 sps:$4 sm:$0xff]   ;;  %v5153_v16 = vld [vmem:[%s7929_s1 + $0x84] ss:$16 sps:$4 sm:$0xff]   ;;  %v5155_v17 = vld [vmem:[%s7929_s1 + $0x8c] ss:$16 sps:$4 sm:$0xff]  }
   0x7   :  { %3558 = vmatpush1.bf16.msra.mxu0 %v5139_v6  ;;  %3927 = vmatpush1.bf16.msra.mxu1 %v5140_v7  ;;  %v5157_v18 = vld [vmem:[%s7929_s1 + $0x80] ss:$16 sps:$4 sm:$0xff]   ;;  %v5158_v19 = vld [vmem:[%s7929_s1 + $0x88] ss:$16 sps:$4 sm:$0xff]   ;;  %v5159_v20 = vld [vmem:[%s7929_s1 + $0xa4] ss:$16 sps:$4 sm:$0xff]  }
   0x8   :  { %3559 = vmatprep.subr.bf16.mxu0 %v5141_v8  ;;  %3928 = vmatprep.subr.bf16.mxu1 %v5143_v9  ;;  %v5161_v21 = vld [vmem:[%s7929_s1 + $0xac] ss:$16 sps:$4 sm:$0xff]   ;;  %v5163_v22 = vld [vmem:[%s7929_s1 + $0xa0] ss:$16 sps:$4 sm:$0xff]   ;;  %v5164_v23 = vld [vmem:[%s7929_s1 + $0xa8] ss:$16 sps:$4 sm:$0xff]  }
   0x9   :  { %v5165_v24 = vld [vmem:[%s7929_s1 + $0xc4] ss:$16 sps:$4 sm:$0xff]   ;;  %v5167_v25 = vld [vmem:[%s7929_s1 + $0xcc] ss:$16 sps:$4 sm:$0xff]   ;;  %v5169_v26 = vld [vmem:[%s7929_s1 + $0xc0] ss:$16 sps:$4 sm:$0xff]  }
   0xa   :  { %v5170_v27 = vld [vmem:[%s7929_s1 + $0xc8] ss:$16 sps:$4 sm:$0xff]   ;;  %v5171_v28 = vld [vmem:[%s7929_s1 + $0xe4] ss:$16 sps:$4 sm:$0xff]   ;;  %v5173_v29 = vld [vmem:[%s7929_s1 + $0xec] ss:$16 sps:$4 sm:$0xff]  }
   0xb   :  { %3560 = vmatpush1.bf16.msra.mxu0 %v5145_v10  ;;  %3929 = vmatpush1.bf16.msra.mxu1 %v5146_v11  ;;  %v5175_v30 = vld [vmem:[%s7929_s1 + $0xe0] ss:$16 sps:$4 sm:$0xff]   ;;  %v5176_v31 = vld [vmem:[%s7929_s1 + $0xe8] ss:$16 sps:$4 sm:$0xff]   ;;  %v5177_v32 = vld [vmem:[%s7929_s1 + $0x104] ss:$16 sps:$4 sm:$0xff]  }
   0xc   :  { %3561 = vmatprep.subr.bf16.mxu0 %v5147_v12  ;;  %3930 = vmatprep.subr.bf16.mxu1 %v5149_v13  ;;  %v5179_v33 = vld [vmem:[%s7929_s1 + $0x10c] ss:$16 sps:$4 sm:$0xff]   ;;  %v5181_v34 = vld [vmem:[%s7929_s1 + $0x100] ss:$16 sps:$4 sm:$0xff]   ;;  %v5182_v35 = vld [vmem:[%s7929_s1 + $0x108] ss:$16 sps:$4 sm:$0xff]  }
   0xd   :  { %v5183_v36 = vld [vmem:[%s7929_s1 + $0x124] ss:$16 sps:$4 sm:$0xff]   ;;  %v5185_v37 = vld [vmem:[%s7929_s1 + $0x12c] ss:$16 sps:$4 sm:$0xff]   ;;  %v5187_v38 = vld [vmem:[%s7929_s1 + $0x120] ss:$16 sps:$4 sm:$0xff]  }
   0xe   :  { %v5188_v39 = vld [vmem:[%s7929_s1 + $0x128] ss:$16 sps:$4 sm:$0xff]   ;;  %v5189_v40 = vld [vmem:[%s7929_s1 + $0x144] ss:$16 sps:$4 sm:$0xff]   ;;  %v5191_v41 = vld [vmem:[%s7929_s1 + $0x14c] ss:$16 sps:$4 sm:$0xff]  }
   0xf   :  { %3562 = vmatpush1.bf16.msra.mxu0 %v5151_v14  ;;  %3931 = vmatpush1.bf16.msra.mxu1 %v5152_v15  ;;  %v5193_v42 = vld [vmem:[%s7929_s1 + $0x140] ss:$16 sps:$4 sm:$0xff]   ;;  %v5194_v43 = vld [vmem:[%s7929_s1 + $0x148] ss:$16 sps:$4 sm:$0xff]   ;;  %v5195_v44 = vld [vmem:[%s7929_s1 + $0x164] ss:$16 sps:$4 sm:$0xff]  }
  0x10   :  { %3563 = vmatprep.subr.bf16.mxu0 %v5153_v16  ;;  %3932 = vmatprep.subr.bf16.mxu1 %v5155_v17  ;;  %v5197_v45 = vld [vmem:[%s7929_s1 + $0x16c] ss:$16 sps:$4 sm:$0xff]   ;;  %v27_v46 = vld [vmem:[%s7928_s0] sm:$0xff]  ;;  %v5200_v49 = vld [vmem:[%s7929_s1 + $0x168] ss:$16 sps:$4 sm:$0xff]  }
  0x11   :  { %v5199_v47 = vld [vmem:[%s7929_s1 + $0x160] ss:$16 sps:$4 sm:$0xff]   ;;  %v4464_v48 = vcombine.high %v27_v46, %v27_v46  ;;  %v5201_v50 = vld [vmem:[%s7929_s1 + $0x184] ss:$16 sps:$4 sm:$0xff]   ;;  %v5203_v51 = vld [vmem:[%s7929_s1 + $0x18c] ss:$16 sps:$4 sm:$0xff]   ;;  %v4463_v4 = vcombine.low %v27_v46, %v27_v46 }
  0x12   :  { %v5205_v52 = vld [vmem:[%s7929_s1 + $0x180] ss:$16 sps:$4 sm:$0xff]   ;;  %v5206_v53 = vld [vmem:[%s7929_s1 + $0x188] ss:$16 sps:$4 sm:$0xff]   ;;  %v5207_v54 = vld [vmem:[%s7929_s1 + $0x1a4] ss:$16 sps:$4 sm:$0xff]  }
  0x13   :  { %3564 = vmatpush1.bf16.msra.mxu0 %v5157_v18  ;;  %3933 = vmatpush1.bf16.msra.mxu1 %v5158_v19  ;;  %v5209_v55 = vld [vmem:[%s7929_s1 + $0x1ac] ss:$16 sps:$4 sm:$0xff]   ;;  %v5211_v56 = vld [vmem:[%s7929_s1 + $0x1a0] ss:$16 sps:$4 sm:$0xff]   ;;  %v5212_v57 = vld [vmem:[%s7929_s1 + $0x1a8] ss:$16 sps:$4 sm:$0xff]  }
  0x14   :  { %3565 = vmatprep.subr.bf16.mxu0 %v5159_v20  ;;  %3934 = vmatprep.subr.bf16.mxu1 %v5161_v21  ;;  %v5213_v58 = vld [vmem:[%s7929_s1 + $0x1c4] ss:$16 sps:$4 sm:$0xff]   ;;  %v5215_v59 = vld [vmem:[%s7929_s1 + $0x1cc] ss:$16 sps:$4 sm:$0xff]   ;;  %v5217_v60 = vld [vmem:[%s7929_s1 + $0x1c0] ss:$16 sps:$4 sm:$0xff]  }
  0x15   :  { %3587 = vmatprep.mubr.bf16.mxu0 %v4464_v48  ;;  %3956 = vmatprep.mubr.bf16.mxu1 %v4464_v48  ;;  %v5218_v61 = vld [vmem:[%s7929_s1 + $0x1c8] ss:$16 sps:$4 sm:$0xff]   ;;  %v5219_v62 = vld [vmem:[%s7929_s1 + $0x1e4] ss:$16 sps:$4 sm:$0xff]   ;;  %v5221_v63 = vld [vmem:[%s7929_s1 + $0x1ec] ss:$16 sps:$4 sm:$0xff]  }
  0x16   :  { %v5223_v0 = vld [vmem:[%s7929_s1 + $0x1e0] ss:$16 sps:$4 sm:$0xff]   ;;  %v5224_v1 = vld [vmem:[%s7929_s1 + $0x1e8] ss:$16 sps:$4 sm:$0xff]   ;;  %v5229_v2 = vld [vmem:[%s7929_s1 + $0x204] ss:$16 sps:$4 sm:$0xff]  }
  0x17   :  { %3566 = vmatpush1.bf16.msra.mxu0 %v5163_v22  ;;  %3935 = vmatpush1.bf16.msra.mxu1 %v5164_v23  ;;  %v5232_v3 = vld [vmem:[%s7929_s1 + $0x20c] ss:$16 sps:$4 sm:$0xff]   ;;  %v5227_v5 = vld [vmem:[%s7929_s1 + $0x200] ss:$16 sps:$4 sm:$0xff]   ;;  %v5230_v6 = vld [vmem:[%s7929_s1 + $0x208] ss:$16 sps:$4 sm:$0xff]  }
  0x18   :  { %3567 = vmatprep.subr.bf16.mxu0 %v5165_v24  ;;  %3936 = vmatprep.subr.bf16.mxu1 %v5167_v25  ;;  %v5235_v7 = vld [vmem:[%s7929_s1 + $0x224] ss:$16 sps:$4 sm:$0xff]   ;;  %v5238_v8 = vld [vmem:[%s7929_s1 + $0x22c] ss:$16 sps:$4 sm:$0xff]   ;;  %v5233_v9 = vld [vmem:[%s7929_s1 + $0x220] ss:$16 sps:$4 sm:$0xff]  }
  0x19   :  { %v5236_v10 = vld [vmem:[%s7929_s1 + $0x228] ss:$16 sps:$4 sm:$0xff]   ;;  %v5241_v11 = vld [vmem:[%s7929_s1 + $0x244] ss:$16 sps:$4 sm:$0xff]   ;;  %v5244_v12 = vld [vmem:[%s7929_s1 + $0x24c] ss:$16 sps:$4 sm:$0xff]  }
  0x1a   :  { %v5239_v13 = vld [vmem:[%s7929_s1 + $0x240] ss:$16 sps:$4 sm:$0xff]   ;;  %v5242_v14 = vld [vmem:[%s7929_s1 + $0x248] ss:$16 sps:$4 sm:$0xff]   ;;  %v5247_v15 = vld [vmem:[%s7929_s1 + $0x264] ss:$16 sps:$4 sm:$0xff]  }
  0x1b   :  { %3568 = vmatpush1.bf16.msra.mxu0 %v5169_v26  ;;  %3937 = vmatpush1.bf16.msra.mxu1 %v5170_v27  ;;  %v5250_v16 = vld [vmem:[%s7929_s1 + $0x26c] ss:$16 sps:$4 sm:$0xff]   ;;  %v5245_v17 = vld [vmem:[%s7929_s1 + $0x260] ss:$16 sps:$4 sm:$0xff]   ;;  %v5248_v18 = vld [vmem:[%s7929_s1 + $0x268] ss:$16 sps:$4 sm:$0xff]  }
  0x1c   :  { %3569 = vmatprep.subr.bf16.mxu0 %v5171_v28  ;;  %3938 = vmatprep.subr.bf16.mxu1 %v5173_v29  ;;  %v5253_v19 = vld [vmem:[%s7929_s1 + $0x284] ss:$16 sps:$4 sm:$0xff]   ;;  %v5256_v20 = vld [vmem:[%s7929_s1 + $0x28c] ss:$16 sps:$4 sm:$0xff]   ;;  %v5251_v21 = vld [vmem:[%s7929_s1 + $0x280] ss:$16 sps:$4 sm:$0xff]  }
  0x1d   :  { %v5254_v22 = vld [vmem:[%s7929_s1 + $0x288] ss:$16 sps:$4 sm:$0xff]   ;;  %v5259_v23 = vld [vmem:[%s7929_s1 + $0x2a4] ss:$16 sps:$4 sm:$0xff]   ;;  %v5262_v24 = vld [vmem:[%s7929_s1 + $0x2ac] ss:$16 sps:$4 sm:$0xff]  }
  0x1e   :  { %v5257_v25 = vld [vmem:[%s7929_s1 + $0x2a0] ss:$16 sps:$4 sm:$0xff]   ;;  %v5260_v26 = vld [vmem:[%s7929_s1 + $0x2a8] ss:$16 sps:$4 sm:$0xff]   ;;  %v5265_v27 = vld [vmem:[%s7929_s1 + $0x2c4] ss:$16 sps:$4 sm:$0xff]  }
  0x1f   :  { %3570 = vmatpush1.bf16.msra.mxu0 %v5175_v30  ;;  %3939 = vmatpush1.bf16.msra.mxu1 %v5176_v31  ;;  %v5268_v28 = vld [vmem:[%s7929_s1 + $0x2cc] ss:$16 sps:$4 sm:$0xff]   ;;  %v5263_v31 = vld [vmem:[%s7929_s1 + $0x2c0] ss:$16 sps:$4 sm:$0xff]   ;;  %v5290_v48 = vld [vmem:[%s7929_s1 + $0x348] ss:$16 sps:$4 sm:$0xff]  }
  0x20   :  { %3571 = vmatprep.subr.bf16.mxu0 %v5177_v32  ;;  %3940 = vmatprep.subr.bf16.mxu1 %v5179_v33  ;;  %v6361_v29 = vld [vmem:[%s7928_s0 + $0x8] sm:$0xff]  ;;  %v5271_v33 = vld [vmem:[%s7929_s1 + $0x2e4] ss:$16 sps:$4 sm:$0xff]  }
  0x21   :  { %v4466_v30 = vcombine.high %v6361_v29, %v6361_v29  ;;  %v5266_v32 = vld [vmem:[%s7929_s1 + $0x2c8] ss:$16 sps:$4 sm:$0xff]   ;;  %v5292_v46 = vld [vmem:[%s7929_s1 + $0x34c] ss:$16 sps:$4 sm:$0xff]  }
  0x23   :  { %3572 = vmatpush1.bf16.msra.mxu0 %v5181_v34  ;;  %3941 = vmatpush1.bf16.msra.mxu1 %v5182_v35  ;;  %v5274_v34 = vld [vmem:[%s7929_s1 + $0x2ec] ss:$16 sps:$4 sm:$0xff]   ;;  %v5269_v35 = vld [vmem:[%s7929_s1 + $0x2e0] ss:$16 sps:$4 sm:$0xff]  }
  0x24   :  { %3573 = vmatprep.subr.bf16.mxu0 %v5183_v36  ;;  %3942 = vmatprep.subr.bf16.mxu1 %v5185_v37  ;;  %v5272_v36 = vld [vmem:[%s7929_s1 + $0x2e8] ss:$16 sps:$4 sm:$0xff]   ;;  %v5277_v37 = vld [vmem:[%s7929_s1 + $0x304] ss:$16 sps:$4 sm:$0xff]  }
  0x27   :  { %3574 = vmatpush1.bf16.msra.mxu0 %v5187_v38  ;;  %3943 = vmatpush1.bf16.msra.mxu1 %v5188_v39  ;;  %v5280_v38 = vld [vmem:[%s7929_s1 + $0x30c] ss:$16 sps:$4 sm:$0xff]   ;;  %v5275_v39 = vld [vmem:[%s7929_s1 + $0x300] ss:$16 sps:$4 sm:$0xff]  }
  0x28   :  { %3575 = vmatprep.subr.bf16.mxu0 %v5189_v40  ;;  %3944 = vmatprep.subr.bf16.mxu1 %v5191_v41  ;;  %v5278_v40 = vld [vmem:[%s7929_s1 + $0x308] ss:$16 sps:$4 sm:$0xff]   ;;  %v5283_v41 = vld [vmem:[%s7929_s1 + $0x324] ss:$16 sps:$4 sm:$0xff]  }
  0x2b   :  { %3576 = vmatpush1.bf16.msra.mxu0 %v5193_v42  ;;  %3945 = vmatpush1.bf16.msra.mxu1 %v5194_v43  ;;  %v5286_v42 = vld [vmem:[%s7929_s1 + $0x32c] ss:$16 sps:$4 sm:$0xff]   ;;  %v5281_v43 = vld [vmem:[%s7929_s1 + $0x320] ss:$16 sps:$4 sm:$0xff]  }
  0x2c   :  { %3577 = vmatprep.subr.bf16.mxu0 %v5195_v44  ;;  %3946 = vmatprep.subr.bf16.mxu1 %v5197_v45  ;;  %v5284_v44 = vld [vmem:[%s7929_s1 + $0x328] ss:$16 sps:$4 sm:$0xff]   ;;  %v5289_v45 = vld [vmem:[%s7929_s1 + $0x344] ss:$16 sps:$4 sm:$0xff]  }
  0x2f   :  { %3578 = vmatpush1.bf16.msra.mxu0 %v5199_v47  ;;  %3947 = vmatpush1.bf16.msra.mxu1 %v5200_v49  ;;  %v5287_v47 = vld [vmem:[%s7929_s1 + $0x340] ss:$16 sps:$4 sm:$0xff]   ;;  %v5295_v49 = vld [vmem:[%s7929_s1 + $0x364] ss:$16 sps:$4 sm:$0xff]  }
  0x30   :  { %3579 = vmatprep.subr.bf16.mxu0 %v5201_v50  ;;  %3948 = vmatprep.subr.bf16.mxu1 %v5203_v51  ;;  %v5298_v50 = vld [vmem:[%s7929_s1 + $0x36c] ss:$16 sps:$4 sm:$0xff]   ;;  %v5293_v51 = vld [vmem:[%s7929_s1 + $0x360] ss:$16 sps:$4 sm:$0xff]  }
  0x33   :  { %3580 = vmatpush1.bf16.msra.mxu0 %v5205_v52  ;;  %3949 = vmatpush1.bf16.msra.mxu1 %v5206_v53  ;;  %v5296_v52 = vld [vmem:[%s7929_s1 + $0x368] ss:$16 sps:$4 sm:$0xff]   ;;  %v5301_v53 = vld [vmem:[%s7929_s1 + $0x384] ss:$16 sps:$4 sm:$0xff]  }
  0x34   :  { %3581 = vmatprep.subr.bf16.mxu0 %v5207_v54  ;;  %3950 = vmatprep.subr.bf16.mxu1 %v5209_v55  ;;  %v5304_v54 = vld [vmem:[%s7929_s1 + $0x38c] ss:$16 sps:$4 sm:$0xff]   ;;  %v5299_v55 = vld [vmem:[%s7929_s1 + $0x380] ss:$16 sps:$4 sm:$0xff]  }
  0x37   :  { %3582 = vmatpush1.bf16.msra.mxu0 %v5211_v56  ;;  %3951 = vmatpush1.bf16.msra.mxu1 %v5212_v57  ;;  %v5302_v56 = vld [vmem:[%s7929_s1 + $0x388] ss:$16 sps:$4 sm:$0xff]   ;;  %v5307_v57 = vld [vmem:[%s7929_s1 + $0x3a4] ss:$16 sps:$4 sm:$0xff]  }
  0x38   :  { %3583 = vmatprep.subr.bf16.mxu0 %v5213_v58  ;;  %3952 = vmatprep.subr.bf16.mxu1 %v5215_v59  ;;  %v5310_v58 = vld [vmem:[%s7929_s1 + $0x3ac] ss:$16 sps:$4 sm:$0xff]   ;;  %v5305_v59 = vld [vmem:[%s7929_s1 + $0x3a0] ss:$16 sps:$4 sm:$0xff]  }
  0x3b   :  { %3584 = vmatpush1.bf16.msra.mxu0 %v5217_v60  ;;  %3953 = vmatpush1.bf16.msra.mxu1 %v5218_v61  ;;  %v5308_v60 = vld [vmem:[%s7929_s1 + $0x3a8] ss:$16 sps:$4 sm:$0xff]   ;;  %v5313_v61 = vld [vmem:[%s7929_s1 + $0x3c4] ss:$16 sps:$4 sm:$0xff]  }
  0x3c   :  { %3585 = vmatprep.subr.bf16.mxu0 %v5219_v62  ;;  %3954 = vmatprep.subr.bf16.mxu1 %v5221_v63  ;;  %v5316_v62 = vld [vmem:[%s7929_s1 + $0x3cc] ss:$16 sps:$4 sm:$0xff]   ;;  %v5311_v63 = vld [vmem:[%s7929_s1 + $0x3c0] ss:$16 sps:$4 sm:$0xff]  }
  0x3f   :  { %3586 = vmatpush1.bf16.msra.mxu0 %v5223_v0  ;;  %3955 = vmatpush1.bf16.msra.mxu1 %v5224_v1  ;;  %v5314_v0 = vld [vmem:[%s7929_s1 + $0x3c8] ss:$16 sps:$4 sm:$0xff]   ;;  %v5319_v1 = vld [vmem:[%s7929_s1 + $0x3e4] ss:$16 sps:$4 sm:$0xff]  }
  0x40   :  { %3596 = vmatprep.subr.bf16.mxu0 %v5229_v2  ;;  %3965 = vmatprep.subr.bf16.mxu1 %v5232_v3  ;;  %v5322_v2 = vld [vmem:[%s7929_s1 + $0x3ec] ss:$16 sps:$4 sm:$0xff]   ;;  %v5317_v3 = vld [vmem:[%s7929_s1 + $0x3e0] ss:$16 sps:$4 sm:$0xff]  }
  0x42   :  { %3588 = vmatmul.mubr.bf16.vlgmr.msra.gmra.mrb[0].mxu0 %v4463_v4  ;;  %3957 = vmatmul.mubr.bf16.vlgmr.msra.gmra.mrb[0].mxu1 %v4463_v4  ;;  %v5320_v4 = vld [vmem:[%s7929_s1 + $0x3e8] ss:$16 sps:$4 sm:$0xff]  }
  0x43   :  { %3597 = vmatpush1.bf16.msra.mxu0 %v5227_v5  ;;  %3966 = vmatpush1.bf16.msra.mxu1 %v5230_v6  ;;  %v5327_v5 = vld [vmem:[%s7929_s1 + $0x404] ss:$16 sps:$4 sm:$0xff]   ;;  %v5330_v6 = vld [vmem:[%s7929_s1 + $0x40c] ss:$16 sps:$4 sm:$0xff]  }
  0x44   :  { %3598 = vmatprep.subr.bf16.mxu0 %v5235_v7  ;;  %3967 = vmatprep.subr.bf16.mxu1 %v5238_v8  ;;  %v4465_v7 = vcombine.low %v6361_v29, %v6361_v29  ;;  %v5325_v8 = vld [vmem:[%s7929_s1 + $0x400] ss:$16 sps:$4 sm:$0xff]   ;;  %v5360_v29 = vld [vmem:[%s7929_s1 + $0x4ac] ss:$16 sps:$4 sm:$0xff]  }
  0x45   :  { %3628 = vmatprep.mubr.bf16.mxu0 %v4466_v30  ;;  %3997 = vmatprep.mubr.bf16.mxu1 %v4466_v30  ;;  %v5355_v30 = vld [vmem:[%s7929_s1 + $0x4a0] ss:$16 sps:$4 sm:$0xff]  }
  0x47   :  { %3599 = vmatpush1.bf16.msra.mxu0 %v5233_v9  ;;  %3968 = vmatpush1.bf16.msra.mxu1 %v5236_v10  ;;  %v5328_v9 = vld [vmem:[%s7929_s1 + $0x408] ss:$16 sps:$4 sm:$0xff]   ;;  %v5333_v10 = vld [vmem:[%s7929_s1 + $0x424] ss:$16 sps:$4 sm:$0xff]  }
  0x48   :  { %3600 = vmatprep.subr.bf16.mxu0 %v5241_v11  ;;  %3969 = vmatprep.subr.bf16.mxu1 %v5244_v12  ;;  %v6499_v11 = vld [vmem:[%s7928_s0 + $0x10] sm:$0xff]  ;;  %v5336_v12 = vld [vmem:[%s7929_s1 + $0x42c] ss:$16 sps:$4 sm:$0xff]  }
  0x4b   :  { %3601 = vmatpush1.bf16.msra.mxu0 %v5239_v13  ;;  %3970 = vmatpush1.bf16.msra.mxu1 %v5242_v14  ;;  %v4468_v13 = vcombine.high %v6499_v11, %v6499_v11  ;;  %v5331_v14 = vld [vmem:[%s7929_s1 + $0x420] ss:$16 sps:$4 sm:$0xff]  }
  0x4c   :  { %3602 = vmatprep.subr.bf16.mxu0 %v5247_v15  ;;  %3971 = vmatprep.subr.bf16.mxu1 %v5250_v16  ;;  %v5334_v15 = vld [vmem:[%s7929_s1 + $0x428] ss:$16 sps:$4 sm:$0xff]   ;;  %v5339_v16 = vld [vmem:[%s7929_s1 + $0x444] ss:$16 sps:$4 sm:$0xff]  }
  0x4f   :  { %3603 = vmatpush1.bf16.msra.mxu0 %v5245_v17  ;;  %3972 = vmatpush1.bf16.msra.mxu1 %v5248_v18  ;;  %v5342_v17 = vld [vmem:[%s7929_s1 + $0x44c] ss:$16 sps:$4 sm:$0xff]   ;;  %v5337_v18 = vld [vmem:[%s7929_s1 + $0x440] ss:$16 sps:$4 sm:$0xff]  }
  0x50   :  { %3604 = vmatprep.subr.bf16.mxu0 %v5253_v19  ;;  %3973 = vmatprep.subr.bf16.mxu1 %v5256_v20  ;;  %v5340_v19 = vld [vmem:[%s7929_s1 + $0x448] ss:$16 sps:$4 sm:$0xff]   ;;  %v5345_v20 = vld [vmem:[%s7929_s1 + $0x464] ss:$16 sps:$4 sm:$0xff]  }
  0x53   :  { %3605 = vmatpush1.bf16.msra.mxu0 %v5251_v21  ;;  %3974 = vmatpush1.bf16.msra.mxu1 %v5254_v22  ;;  %v5348_v21 = vld [vmem:[%s7929_s1 + $0x46c] ss:$16 sps:$4 sm:$0xff]   ;;  %v5343_v22 = vld [vmem:[%s7929_s1 + $0x460] ss:$16 sps:$4 sm:$0xff]  }
  0x54   :  { %3606 = vmatprep.subr.bf16.mxu0 %v5259_v23  ;;  %3975 = vmatprep.subr.bf16.mxu1 %v5262_v24  ;;  %v5346_v23 = vld [vmem:[%s7929_s1 + $0x468] ss:$16 sps:$4 sm:$0xff]   ;;  %v5351_v24 = vld [vmem:[%s7929_s1 + $0x484] ss:$16 sps:$4 sm:$0xff]  }
  0x57   :  { %3607 = vmatpush1.bf16.msra.mxu0 %v5257_v25  ;;  %3976 = vmatpush1.bf16.msra.mxu1 %v5260_v26  ;;  %v5354_v25 = vld [vmem:[%s7929_s1 + $0x48c] ss:$16 sps:$4 sm:$0xff]   ;;  %v5349_v26 = vld [vmem:[%s7929_s1 + $0x480] ss:$16 sps:$4 sm:$0xff]  }
  0x58   :  { %3608 = vmatprep.subr.bf16.mxu0 %v5265_v27  ;;  %3977 = vmatprep.subr.bf16.mxu1 %v5268_v28  ;;  %v5352_v27 = vld [vmem:[%s7929_s1 + $0x488] ss:$16 sps:$4 sm:$0xff]   ;;  %v5357_v28 = vld [vmem:[%s7929_s1 + $0x4a4] ss:$16 sps:$4 sm:$0xff]  }
  0x5b   :  { %3609 = vmatpush1.bf16.msra.mxu0 %v5263_v31  ;;  %3978 = vmatpush1.bf16.msra.mxu1 %v5266_v32  ;;  %v5358_v31 = vld [vmem:[%s7929_s1 + $0x4a8] ss:$16 sps:$4 sm:$0xff]   ;;  %v5363_v32 = vld [vmem:[%s7929_s1 + $0x4c4] ss:$16 sps:$4 sm:$0xff]  }
  0x5c   :  { %3610 = vmatprep.subr.bf16.mxu0 %v5271_v33  ;;  %3979 = vmatprep.subr.bf16.mxu1 %v5274_v34  ;;  %v5366_v33 = vld [vmem:[%s7929_s1 + $0x4cc] ss:$16 sps:$4 sm:$0xff]   ;;  %v5361_v34 = vld [vmem:[%s7929_s1 + $0x4c0] ss:$16 sps:$4 sm:$0xff]  }
  0x5f   :  { %3611 = vmatpush1.bf16.msra.mxu0 %v5269_v35  ;;  %3980 = vmatpush1.bf16.msra.mxu1 %v5272_v36  ;;  %v5364_v35 = vld [vmem:[%s7929_s1 + $0x4c8] ss:$16 sps:$4 sm:$0xff]   ;;  %v5369_v36 = vld [vmem:[%s7929_s1 + $0x4e4] ss:$16 sps:$4 sm:$0xff]  }
  0x60   :  { %3612 = vmatprep.subr.bf16.mxu0 %v5277_v37  ;;  %3981 = vmatprep.subr.bf16.mxu1 %v5280_v38  ;;  %v5372_v37 = vld [vmem:[%s7929_s1 + $0x4ec] ss:$16 sps:$4 sm:$0xff]   ;;  %v5367_v38 = vld [vmem:[%s7929_s1 + $0x4e0] ss:$16 sps:$4 sm:$0xff]  }
  0x63   :  { %3613 = vmatpush1.bf16.msra.mxu0 %v5275_v39  ;;  %3982 = vmatpush1.bf16.msra.mxu1 %v5278_v40  ;;  %v5370_v39 = vld [vmem:[%s7929_s1 + $0x4e8] ss:$16 sps:$4 sm:$0xff]   ;;  %v5375_v40 = vld [vmem:[%s7929_s1 + $0x504] ss:$16 sps:$4 sm:$0xff]  }
  0x64   :  { %3614 = vmatprep.subr.bf16.mxu0 %v5283_v41  ;;  %3983 = vmatprep.subr.bf16.mxu1 %v5286_v42  ;;  %v5378_v41 = vld [vmem:[%s7929_s1 + $0x50c] ss:$16 sps:$4 sm:$0xff]   ;;  %v5373_v42 = vld [vmem:[%s7929_s1 + $0x500] ss:$16 sps:$4 sm:$0xff]  }
  0x67   :  { %3615 = vmatpush1.bf16.msra.mxu0 %v5281_v43  ;;  %3984 = vmatpush1.bf16.msra.mxu1 %v5284_v44  ;;  %v5376_v43 = vld [vmem:[%s7929_s1 + $0x508] ss:$16 sps:$4 sm:$0xff]   ;;  %v5381_v44 = vld [vmem:[%s7929_s1 + $0x524] ss:$16 sps:$4 sm:$0xff]  }
  0x68   :  { %3616 = vmatprep.subr.bf16.mxu0 %v5289_v45  ;;  %3985 = vmatprep.subr.bf16.mxu1 %v5292_v46  ;;  %v5384_v45 = vld [vmem:[%s7929_s1 + $0x52c] ss:$16 sps:$4 sm:$0xff]   ;;  %v5379_v46 = vld [vmem:[%s7929_s1 + $0x520] ss:$16 sps:$4 sm:$0xff]  }
  0x6b   :  { %3617 = vmatpush1.bf16.msra.mxu0 %v5287_v47  ;;  %3986 = vmatpush1.bf16.msra.mxu1 %v5290_v48  ;;  %v5382_v47 = vld [vmem:[%s7929_s1 + $0x528] ss:$16 sps:$4 sm:$0xff]   ;;  %v5387_v48 = vld [vmem:[%s7929_s1 + $0x544] ss:$16 sps:$4 sm:$0xff]  }
  0x6c   :  { %3618 = vmatprep.subr.bf16.mxu0 %v5295_v49  ;;  %3987 = vmatprep.subr.bf16.mxu1 %v5298_v50  ;;  %v5390_v49 = vld [vmem:[%s7929_s1 + $0x54c] ss:$16 sps:$4 sm:$0xff]   ;;  %v5385_v50 = vld [vmem:[%s7929_s1 + $0x540] ss:$16 sps:$4 sm:$0xff]  }
  0x6f   :  { %3619 = vmatpush1.bf16.msra.mxu0 %v5293_v51  ;;  %3988 = vmatpush1.bf16.msra.mxu1 %v5296_v52  ;;  %v5388_v51 = vld [vmem:[%s7929_s1 + $0x548] ss:$16 sps:$4 sm:$0xff]   ;;  %v5393_v52 = vld [vmem:[%s7929_s1 + $0x564] ss:$16 sps:$4 sm:$0xff]  }
  0x70   :  { %3620 = vmatprep.subr.bf16.mxu0 %v5301_v53  ;;  %3989 = vmatprep.subr.bf16.mxu1 %v5304_v54  ;;  %v5396_v53 = vld [vmem:[%s7929_s1 + $0x56c] ss:$16 sps:$4 sm:$0xff]   ;;  %v5391_v54 = vld [vmem:[%s7929_s1 + $0x560] ss:$16 sps:$4 sm:$0xff]  }
  0x73   :  { %3621 = vmatpush1.bf16.msra.mxu0 %v5299_v55  ;;  %3990 = vmatpush1.bf16.msra.mxu1 %v5302_v56  ;;  %v5394_v55 = vld [vmem:[%s7929_s1 + $0x568] ss:$16 sps:$4 sm:$0xff]   ;;  %v5399_v56 = vld [vmem:[%s7929_s1 + $0x584] ss:$16 sps:$4 sm:$0xff]  }
  0x74   :  { %3622 = vmatprep.subr.bf16.mxu0 %v5307_v57  ;;  %3991 = vmatprep.subr.bf16.mxu1 %v5310_v58  ;;  %v5402_v57 = vld [vmem:[%s7929_s1 + $0x58c] ss:$16 sps:$4 sm:$0xff]   ;;  %v5397_v58 = vld [vmem:[%s7929_s1 + $0x580] ss:$16 sps:$4 sm:$0xff]  }
  0x77   :  { %3623 = vmatpush1.bf16.msra.mxu0 %v5305_v59  ;;  %3992 = vmatpush1.bf16.msra.mxu1 %v5308_v60  ;;  %v5400_v59 = vld [vmem:[%s7929_s1 + $0x588] ss:$16 sps:$4 sm:$0xff]   ;;  %v5405_v60 = vld [vmem:[%s7929_s1 + $0x5a4] ss:$16 sps:$4 sm:$0xff]  }
  0x78   :  { %3624 = vmatprep.subr.bf16.mxu0 %v5313_v61  ;;  %3993 = vmatprep.subr.bf16.mxu1 %v5316_v62  ;;  %v5408_v61 = vld [vmem:[%s7929_s1 + $0x5ac] ss:$16 sps:$4 sm:$0xff]   ;;  %v5403_v62 = vld [vmem:[%s7929_s1 + $0x5a0] ss:$16 sps:$4 sm:$0xff]  }
  0x7b   :  { %3625 = vmatpush1.bf16.msra.mxu0 %v5311_v63  ;;  %3994 = vmatpush1.bf16.msra.mxu1 %v5314_v0  ;;  %v5406_v63 = vld [vmem:[%s7929_s1 + $0x5a8] ss:$16 sps:$4 sm:$0xff]   ;;  %v5411_v0 = vld [vmem:[%s7929_s1 + $0x5c4] ss:$16 sps:$4 sm:$0xff]  }
  0x7c   :  { %3626 = vmatprep.subr.bf16.mxu0 %v5319_v1  ;;  %3995 = vmatprep.subr.bf16.mxu1 %v5322_v2  ;;  %v5414_v1 = vld [vmem:[%s7929_s1 + $0x5cc] ss:$16 sps:$4 sm:$0xff]   ;;  %v5409_v2 = vld [vmem:[%s7929_s1 + $0x5c0] ss:$16 sps:$4 sm:$0xff]  }
  0x7f   :  { %3627 = vmatpush1.bf16.msra.mxu0 %v5317_v3  ;;  %3996 = vmatpush1.bf16.msra.mxu1 %v5320_v4  ;;  %v5412_v3 = vld [vmem:[%s7929_s1 + $0x5c8] ss:$16 sps:$4 sm:$0xff]   ;;  %v5417_v4 = vld [vmem:[%s7929_s1 + $0x5e4] ss:$16 sps:$4 sm:$0xff]  }
  0x80   :  { %3637 = vmatprep.subr.bf16.mxu0 %v5327_v5  ;;  %4006 = vmatprep.subr.bf16.mxu1 %v5330_v6  ;;  %v5420_v5 = vld [vmem:[%s7929_s1 + $0x5ec] ss:$16 sps:$4 sm:$0xff]   ;;  %v5415_v6 = vld [vmem:[%s7929_s1 + $0x5e0] ss:$16 sps:$4 sm:$0xff]  }
  0x82   :  { %3629 = vmatmul.mubr.bf16.vlgmr.msra.gmra.mrb[0].mxu0 %v4465_v7  ;;  %3998 = vmatmul.mubr.bf16.vlgmr.msra.gmra.mrb[0].mxu1 %v4465_v7  ;;  %v5418_v7 = vld [vmem:[%s7929_s1 + $0x5e8] ss:$16 sps:$4 sm:$0xff]  }
  0x83   :  { %3638 = vmatpush1.bf16.msra.mxu0 %v5325_v8  ;;  %4007 = vmatpush1.bf16.msra.mxu1 %v5328_v9  ;;  %v5425_v8 = vld [vmem:[%s7929_s1 + $0x604] ss:$16 sps:$4 sm:$0xff]   ;;  %v5428_v9 = vld [vmem:[%s7929_s1 + $0x60c] ss:$16 sps:$4 sm:$0xff]  }
  0x84   :  { %3639 = vmatprep.subr.bf16.mxu0 %v5333_v10  ;;  %4008 = vmatprep.subr.bf16.mxu1 %v5336_v12  ;;  %v5423_v10 = vld [vmem:[%s7929_s1 + $0x600] ss:$16 sps:$4 sm:$0xff]   ;;  %v4467_v12 = vcombine.low %v6499_v11, %v6499_v11  ;;  %v5434_v11 = vld [vmem:[%s7929_s1 + $0x62c] ss:$16 sps:$4 sm:$0xff]  }
  0x85   :  { %3669 = vmatprep.mubr.bf16.mxu0 %v4468_v13  ;;  %4038 = vmatprep.mubr.bf16.mxu1 %v4468_v13  ;;  %v5426_v13 = vld [vmem:[%s7929_s1 + $0x608] ss:$16 sps:$4 sm:$0xff]  }
  0x87   :  { %3640 = vmatpush1.bf16.msra.mxu0 %v5331_v14  ;;  %4009 = vmatpush1.bf16.msra.mxu1 %v5334_v15  ;;  %v6697_v14 = vld [vmem:[%s7928_s0 + $0x18] sm:$0xff]  ;;  %v5431_v15 = vld [vmem:[%s7929_s1 + $0x624] ss:$16 sps:$4 sm:$0xff]  }
  0x88   :  { %3641 = vmatprep.subr.bf16.mxu0 %v5339_v16  ;;  %4010 = vmatprep.subr.bf16.mxu1 %v5342_v17  ;;  %v4470_v16 = vcombine.high %v6697_v14, %v6697_v14  ;;  %v5429_v17 = vld [vmem:[%s7929_s1 + $0x620] ss:$16 sps:$4 sm:$0xff]  }
  0x8b   :  { %3642 = vmatpush1.bf16.msra.mxu0 %v5337_v18  ;;  %4011 = vmatpush1.bf16.msra.mxu1 %v5340_v19  ;;  %v5432_v18 = vld [vmem:[%s7929_s1 + $0x628] ss:$16 sps:$4 sm:$0xff]   ;;  %v5437_v19 = vld [vmem:[%s7929_s1 + $0x644] ss:$16 sps:$4 sm:$0xff]  }
  0x8c   :  { %3643 = vmatprep.subr.bf16.mxu0 %v5345_v20  ;;  %4012 = vmatprep.subr.bf16.mxu1 %v5348_v21  ;;  %v5440_v20 = vld [vmem:[%s7929_s1 + $0x64c] ss:$16 sps:$4 sm:$0xff]   ;;  %v5435_v21 = vld [vmem:[%s7929_s1 + $0x640] ss:$16 sps:$4 sm:$0xff]  }
  0x8f   :  { %3644 = vmatpush1.bf16.msra.mxu0 %v5343_v22  ;;  %4013 = vmatpush1.bf16.msra.mxu1 %v5346_v23  ;;  %v5438_v22 = vld [vmem:[%s7929_s1 + $0x648] ss:$16 sps:$4 sm:$0xff]   ;;  %v5443_v23 = vld [vmem:[%s7929_s1 + $0x664] ss:$16 sps:$4 sm:$0xff]  }
  0x90   :  { %3645 = vmatprep.subr.bf16.mxu0 %v5351_v24  ;;  %4014 = vmatprep.subr.bf16.mxu1 %v5354_v25  ;;  %v5446_v24 = vld [vmem:[%s7929_s1 + $0x66c] ss:$16 sps:$4 sm:$0xff]   ;;  %v5441_v25 = vld [vmem:[%s7929_s1 + $0x660] ss:$16 sps:$4 sm:$0xff]  }
  0x93   :  { %3646 = vmatpush1.bf16.msra.mxu0 %v5349_v26  ;;  %4015 = vmatpush1.bf16.msra.mxu1 %v5352_v27  ;;  %v5444_v26 = vld [vmem:[%s7929_s1 + $0x668] ss:$16 sps:$4 sm:$0xff]   ;;  %v5449_v27 = vld [vmem:[%s7929_s1 + $0x684] ss:$16 sps:$4 sm:$0xff]  }
  0x94   :  { %3647 = vmatprep.subr.bf16.mxu0 %v5357_v28  ;;  %4016 = vmatprep.subr.bf16.mxu1 %v5360_v29  ;;  %v5452_v28 = vld [vmem:[%s7929_s1 + $0x68c] ss:$16 sps:$4 sm:$0xff]   ;;  %v5447_v29 = vld [vmem:[%s7929_s1 + $0x680] ss:$16 sps:$4 sm:$0xff]  }
  0x97   :  { %3648 = vmatpush1.bf16.msra.mxu0 %v5355_v30  ;;  %4017 = vmatpush1.bf16.msra.mxu1 %v5358_v31  ;;  %v5450_v30 = vld [vmem:[%s7929_s1 + $0x688] ss:$16 sps:$4 sm:$0xff]   ;;  %v5455_v31 = vld [vmem:[%s7929_s1 + $0x6a4] ss:$16 sps:$4 sm:$0xff]  }
  0x98   :  { %3649 = vmatprep.subr.bf16.mxu0 %v5363_v32  ;;  %4018 = vmatprep.subr.bf16.mxu1 %v5366_v33  ;;  %v5458_v32 = vld [vmem:[%s7929_s1 + $0x6ac] ss:$16 sps:$4 sm:$0xff]   ;;  %v5453_v33 = vld [vmem:[%s7929_s1 + $0x6a0] ss:$16 sps:$4 sm:$0xff]  }
  0x9b   :  { %3650 = vmatpush1.bf16.msra.mxu0 %v5361_v34  ;;  %4019 = vmatpush1.bf16.msra.mxu1 %v5364_v35  ;;  %v5456_v34 = vld [vmem:[%s7929_s1 + $0x6a8] ss:$16 sps:$4 sm:$0xff]   ;;  %v5461_v35 = vld [vmem:[%s7929_s1 + $0x6c4] ss:$16 sps:$4 sm:$0xff]  }
  0x9c   :  { %3651 = vmatprep.subr.bf16.mxu0 %v5369_v36  ;;  %4020 = vmatprep.subr.bf16.mxu1 %v5372_v37  ;;  %v5464_v36 = vld [vmem:[%s7929_s1 + $0x6cc] ss:$16 sps:$4 sm:$0xff]   ;;  %v5459_v37 = vld [vmem:[%s7929_s1 + $0x6c0] ss:$16 sps:$4 sm:$0xff]  }
  0x9f   :  { %3652 = vmatpush1.bf16.msra.mxu0 %v5367_v38  ;;  %4021 = vmatpush1.bf16.msra.mxu1 %v5370_v39  ;;  %v5462_v38 = vld [vmem:[%s7929_s1 + $0x6c8] ss:$16 sps:$4 sm:$0xff]   ;;  %v5467_v39 = vld [vmem:[%s7929_s1 + $0x6e4] ss:$16 sps:$4 sm:$0xff]  }
  0xa0   :  { %3653 = vmatprep.subr.bf16.mxu0 %v5375_v40  ;;  %4022 = vmatprep.subr.bf16.mxu1 %v5378_v41  ;;  %v5470_v40 = vld [vmem:[%s7929_s1 + $0x6ec] ss:$16 sps:$4 sm:$0xff]   ;;  %v5465_v41 = vld [vmem:[%s7929_s1 + $0x6e0] ss:$16 sps:$4 sm:$0xff]  }
  0xa3   :  { %3654 = vmatpush1.bf16.msra.mxu0 %v5373_v42  ;;  %4023 = vmatpush1.bf16.msra.mxu1 %v5376_v43  ;;  %v5468_v42 = vld [vmem:[%s7929_s1 + $0x6e8] ss:$16 sps:$4 sm:$0xff]   ;;  %v5473_v43 = vld [vmem:[%s7929_s1 + $0x704] ss:$16 sps:$4 sm:$0xff]  }
  0xa4   :  { %3655 = vmatprep.subr.bf16.mxu0 %v5381_v44  ;;  %4024 = vmatprep.subr.bf16.mxu1 %v5384_v45  ;;  %v5476_v44 = vld [vmem:[%s7929_s1 + $0x70c] ss:$16 sps:$4 sm:$0xff]   ;;  %v5471_v45 = vld [vmem:[%s7929_s1 + $0x700] ss:$16 sps:$4 sm:$0xff]  }
  0xa7   :  { %3656 = vmatpush1.bf16.msra.mxu0 %v5379_v46  ;;  %4025 = vmatpush1.bf16.msra.mxu1 %v5382_v47  ;;  %v5474_v46 = vld [vmem:[%s7929_s1 + $0x708] ss:$16 sps:$4 sm:$0xff]   ;;  %v5479_v47 = vld [vmem:[%s7929_s1 + $0x724] ss:$16 sps:$4 sm:$0xff]  }
  0xa8   :  { %3657 = vmatprep.subr.bf16.mxu0 %v5387_v48  ;;  %4026 = vmatprep.subr.bf16.mxu1 %v5390_v49  ;;  %v5482_v48 = vld [vmem:[%s7929_s1 + $0x72c] ss:$16 sps:$4 sm:$0xff]   ;;  %v5477_v49 = vld [vmem:[%s7929_s1 + $0x720] ss:$16 sps:$4 sm:$0xff]  }
  0xab   :  { %3658 = vmatpush1.bf16.msra.mxu0 %v5385_v50  ;;  %4027 = vmatpush1.bf16.msra.mxu1 %v5388_v51  ;;  %v5480_v50 = vld [vmem:[%s7929_s1 + $0x728] ss:$16 sps:$4 sm:$0xff]   ;;  %v5485_v51 = vld [vmem:[%s7929_s1 + $0x744] ss:$16 sps:$4 sm:$0xff]  }
  0xac   :  { %3659 = vmatprep.subr.bf16.mxu0 %v5393_v52  ;;  %4028 = vmatprep.subr.bf16.mxu1 %v5396_v53  ;;  %v5488_v52 = vld [vmem:[%s7929_s1 + $0x74c] ss:$16 sps:$4 sm:$0xff]   ;;  %v5483_v53 = vld [vmem:[%s7929_s1 + $0x740] ss:$16 sps:$4 sm:$0xff]  }
  0xaf   :  { %3660 = vmatpush1.bf16.msra.mxu0 %v5391_v54  ;;  %4029 = vmatpush1.bf16.msra.mxu1 %v5394_v55  ;;  %v5486_v54 = vld [vmem:[%s7929_s1 + $0x748] ss:$16 sps:$4 sm:$0xff]   ;;  %v5491_v55 = vld [vmem:[%s7929_s1 + $0x764] ss:$16 sps:$4 sm:$0xff]  }
  0xb0   :  { %3661 = vmatprep.subr.bf16.mxu0 %v5399_v56  ;;  %4030 = vmatprep.subr.bf16.mxu1 %v5402_v57  ;;  %v5494_v56 = vld [vmem:[%s7929_s1 + $0x76c] ss:$16 sps:$4 sm:$0xff]   ;;  %v5489_v57 = vld [vmem:[%s7929_s1 + $0x760] ss:$16 sps:$4 sm:$0xff]  }
  0xb3   :  { %3662 = vmatpush1.bf16.msra.mxu0 %v5397_v58  ;;  %4031 = vmatpush1.bf16.msra.mxu1 %v5400_v59  ;;  %v5492_v58 = vld [vmem:[%s7929_s1 + $0x768] ss:$16 sps:$4 sm:$0xff]   ;;  %v5497_v59 = vld [vmem:[%s7929_s1 + $0x784] ss:$16 sps:$4 sm:$0xff]  }
  0xb4   :  { %3663 = vmatprep.subr.bf16.mxu0 %v5405_v60  ;;  %4032 = vmatprep.subr.bf16.mxu1 %v5408_v61  ;;  %v5500_v60 = vld [vmem:[%s7929_s1 + $0x78c] ss:$16 sps:$4 sm:$0xff]   ;;  %v5495_v61 = vld [vmem:[%s7929_s1 + $0x780] ss:$16 sps:$4 sm:$0xff]  }
  0xb7   :  { %3664 = vmatpush1.bf16.msra.mxu0 %v5403_v62  ;;  %4033 = vmatpush1.bf16.msra.mxu1 %v5406_v63  ;;  %v5498_v62 = vld [vmem:[%s7929_s1 + $0x788] ss:$16 sps:$4 sm:$0xff]   ;;  %v5503_v63 = vld [vmem:[%s7929_s1 + $0x7a4] ss:$16 sps:$4 sm:$0xff]  }
  0xb8   :  { %3665 = vmatprep.subr.bf16.mxu0 %v5411_v0  ;;  %4034 = vmatprep.subr.bf16.mxu1 %v5414_v1  ;;  %v5506_v0 = vld [vmem:[%s7929_s1 + $0x7ac] ss:$16 sps:$4 sm:$0xff]   ;;  %v5501_v1 = vld [vmem:[%s7929_s1 + $0x7a0] ss:$16 sps:$4 sm:$0xff]  }
  0xbb   :  { %3666 = vmatpush1.bf16.msra.mxu0 %v5409_v2  ;;  %4035 = vmatpush1.bf16.msra.mxu1 %v5412_v3  ;;  %v5504_v2 = vld [vmem:[%s7929_s1 + $0x7a8] ss:$16 sps:$4 sm:$0xff]   ;;  %v5509_v3 = vld [vmem:[%s7929_s1 + $0x7c4] ss:$16 sps:$4 sm:$0xff]  }
  0xbc   :  { %3667 = vmatprep.subr.bf16.mxu0 %v5417_v4  ;;  %4036 = vmatprep.subr.bf16.mxu1 %v5420_v5  ;;  %v5512_v4 = vld [vmem:[%s7929_s1 + $0x7cc] ss:$16 sps:$4 sm:$0xff]   ;;  %v5507_v5 = vld [vmem:[%s7929_s1 + $0x7c0] ss:$16 sps:$4 sm:$0xff]  }
  0xbf   :  { %3668 = vmatpush1.bf16.msra.mxu0 %v5415_v6  ;;  %4037 = vmatpush1.bf16.msra.mxu1 %v5418_v7  ;;  %v5510_v6 = vld [vmem:[%s7929_s1 + $0x7c8] ss:$16 sps:$4 sm:$0xff]   ;;  %v5515_v7 = vld [vmem:[%s7929_s1 + $0x7e4] ss:$16 sps:$4 sm:$0xff]  }
  0xc0   :  { %3678 = vmatprep.subr.bf16.mxu0 %v5425_v8  ;;  %4047 = vmatprep.subr.bf16.mxu1 %v5428_v9  ;;  %v5518_v8 = vld [vmem:[%s7929_s1 + $0x7ec] ss:$16 sps:$4 sm:$0xff]   ;;  %v5513_v9 = vld [vmem:[%s7929_s1 + $0x7e0] ss:$16 sps:$4 sm:$0xff]  }
  0xc2   :  { %3670 = vmatmul.mubr.bf16.vlgmr.msra.gmra.mrb[0].mxu0 %v4467_v12  ;;  %4039 = vmatmul.mubr.bf16.vlgmr.msra.gmra.mrb[0].mxu1 %v4467_v12  ;;  %v5523_v12 = vld [vmem:[%s7929_s1 + $0x804] ss:$16 sps:$4 sm:$0xff]  }
  0xc3   :  { %3679 = vmatpush1.bf16.msra.mxu0 %v5423_v10  ;;  %4048 = vmatpush1.bf16.msra.mxu1 %v5426_v13  ;;  %v5516_v10 = vld [vmem:[%s7929_s1 + $0x7e8] ss:$16 sps:$4 sm:$0xff]   ;;  %v5526_v13 = vld [vmem:[%s7929_s1 + $0x80c] ss:$16 sps:$4 sm:$0xff]  }
  0xc4   :  { %3680 = vmatprep.subr.bf16.mxu0 %v5431_v15  ;;  %4049 = vmatprep.subr.bf16.mxu1 %v5434_v11  ;;  %v5521_v15 = vld [vmem:[%s7929_s1 + $0x800] ss:$16 sps:$4 sm:$0xff]   ;;  %v4469_v11 = vcombine.low %v6697_v14, %v6697_v14  ;;  %v5532_v14 = vld [vmem:[%s7929_s1 + $0x82c] ss:$16 sps:$4 sm:$0xff]  }
  0xc5   :  { %3710 = vmatprep.mubr.bf16.mxu0 %v4470_v16  ;;  %4079 = vmatprep.mubr.bf16.mxu1 %v4470_v16  ;;  %v6895_v16 = vld [vmem:[%s7928_s0 + $0x20] sm:$0xff] }
  0xc7   :  { %3681 = vmatpush1.bf16.msra.mxu0 %v5429_v17  ;;  %4050 = vmatpush1.bf16.msra.mxu1 %v5432_v18  ;;  %v5524_v17 = vld [vmem:[%s7929_s1 + $0x808] ss:$16 sps:$4 sm:$0xff]   ;;  %v5529_v18 = vld [vmem:[%s7929_s1 + $0x824] ss:$16 sps:$4 sm:$0xff]  }
  0xc8   :  { %3682 = vmatprep.subr.bf16.mxu0 %v5437_v19  ;;  %4051 = vmatprep.subr.bf16.mxu1 %v5440_v20  ;;  %v4472_v19 = vcombine.high %v6895_v16, %v6895_v16  ;;  %v5527_v20 = vld [vmem:[%s7929_s1 + $0x820] ss:$16 sps:$4 sm:$0xff]  }
  0xcb   :  { %3683 = vmatpush1.bf16.msra.mxu0 %v5435_v21  ;;  %4052 = vmatpush1.bf16.msra.mxu1 %v5438_v22  ;;  %v5530_v21 = vld [vmem:[%s7929_s1 + $0x828] ss:$16 sps:$4 sm:$0xff]   ;;  %v5535_v22 = vld [vmem:[%s7929_s1 + $0x844] ss:$16 sps:$4 sm:$0xff]  }
  0xcc   :  { %3684 = vmatprep.subr.bf16.mxu0 %v5443_v23  ;;  %4053 = vmatprep.subr.bf16.mxu1 %v5446_v24  ;;  %v5538_v23 = vld [vmem:[%s7929_s1 + $0x84c] ss:$16 sps:$4 sm:$0xff]   ;;  %v5533_v24 = vld [vmem:[%s7929_s1 + $0x840] ss:$16 sps:$4 sm:$0xff]  }
  0xcf   :  { %3685 = vmatpush1.bf16.msra.mxu0 %v5441_v25  ;;  %4054 = vmatpush1.bf16.msra.mxu1 %v5444_v26  ;;  %v5536_v25 = vld [vmem:[%s7929_s1 + $0x848] ss:$16 sps:$4 sm:$0xff]   ;;  %v5541_v26 = vld [vmem:[%s7929_s1 + $0x864] ss:$16 sps:$4 sm:$0xff]  }
  0xd0   :  { %3686 = vmatprep.subr.bf16.mxu0 %v5449_v27  ;;  %4055 = vmatprep.subr.bf16.mxu1 %v5452_v28  ;;  %v5544_v27 = vld [vmem:[%s7929_s1 + $0x86c] ss:$16 sps:$4 sm:$0xff]   ;;  %v5539_v28 = vld [vmem:[%s7929_s1 + $0x860] ss:$16 sps:$4 sm:$0xff]  }
  0xd3   :  { %3687 = vmatpush1.bf16.msra.mxu0 %v5447_v29  ;;  %4056 = vmatpush1.bf16.msra.mxu1 %v5450_v30  ;;  %v5542_v29 = vld [vmem:[%s7929_s1 + $0x868] ss:$16 sps:$4 sm:$0xff]   ;;  %v5547_v30 = vld [vmem:[%s7929_s1 + $0x884] ss:$16 sps:$4 sm:$0xff]  }
  0xd4   :  { %3688 = vmatprep.subr.bf16.mxu0 %v5455_v31  ;;  %4057 = vmatprep.subr.bf16.mxu1 %v5458_v32  ;;  %v5550_v31 = vld [vmem:[%s7929_s1 + $0x88c] ss:$16 sps:$4 sm:$0xff]   ;;  %v5545_v32 = vld [vmem:[%s7929_s1 + $0x880] ss:$16 sps:$4 sm:$0xff]  }
  0xd7   :  { %3689 = vmatpush1.bf16.msra.mxu0 %v5453_v33  ;;  %4058 = vmatpush1.bf16.msra.mxu1 %v5456_v34  ;;  %v5548_v33 = vld [vmem:[%s7929_s1 + $0x888] ss:$16 sps:$4 sm:$0xff]   ;;  %v5553_v34 = vld [vmem:[%s7929_s1 + $0x8a4] ss:$16 sps:$4 sm:$0xff]  }
  0xd8   :  { %3690 = vmatprep.subr.bf16.mxu0 %v5461_v35  ;;  %4059 = vmatprep.subr.bf16.mxu1 %v5464_v36  ;;  %v5556_v35 = vld [vmem:[%s7929_s1 + $0x8ac] ss:$16 sps:$4 sm:$0xff]   ;;  %v5551_v36 = vld [vmem:[%s7929_s1 + $0x8a0] ss:$16 sps:$4 sm:$0xff]  }
  0xdb   :  { %3691 = vmatpush1.bf16.msra.mxu0 %v5459_v37  ;;  %4060 = vmatpush1.bf16.msra.mxu1 %v5462_v38  ;;  %v5554_v37 = vld [vmem:[%s7929_s1 + $0x8a8] ss:$16 sps:$4 sm:$0xff]   ;;  %v5559_v38 = vld [vmem:[%s7929_s1 + $0x8c4] ss:$16 sps:$4 sm:$0xff]  }
  0xdc   :  { %3692 = vmatprep.subr.bf16.mxu0 %v5467_v39  ;;  %4061 = vmatprep.subr.bf16.mxu1 %v5470_v40  ;;  %v5562_v39 = vld [vmem:[%s7929_s1 + $0x8cc] ss:$16 sps:$4 sm:$0xff]   ;;  %v5557_v40 = vld [vmem:[%s7929_s1 + $0x8c0] ss:$16 sps:$4 sm:$0xff]  }
  0xdf   :  { %3693 = vmatpush1.bf16.msra.mxu0 %v5465_v41  ;;  %4062 = vmatpush1.bf16.msra.mxu1 %v5468_v42  ;;  %v5560_v41 = vld [vmem:[%s7929_s1 + $0x8c8] ss:$16 sps:$4 sm:$0xff]   ;;  %v5565_v42 = vld [vmem:[%s7929_s1 + $0x8e4] ss:$16 sps:$4 sm:$0xff]  }
  0xe0   :  { %3694 = vmatprep.subr.bf16.mxu0 %v5473_v43  ;;  %4063 = vmatprep.subr.bf16.mxu1 %v5476_v44  ;;  %v5568_v43 = vld [vmem:[%s7929_s1 + $0x8ec] ss:$16 sps:$4 sm:$0xff]   ;;  %v5563_v44 = vld [vmem:[%s7929_s1 + $0x8e0] ss:$16 sps:$4 sm:$0xff]  }
  0xe3   :  { %3695 = vmatpush1.bf16.msra.mxu0 %v5471_v45  ;;  %4064 = vmatpush1.bf16.msra.mxu1 %v5474_v46  ;;  %v5566_v45 = vld [vmem:[%s7929_s1 + $0x8e8] ss:$16 sps:$4 sm:$0xff]   ;;  %v5571_v46 = vld [vmem:[%s7929_s1 + $0x904] ss:$16 sps:$4 sm:$0xff]  }
  0xe4   :  { %3696 = vmatprep.subr.bf16.mxu0 %v5479_v47  ;;  %4065 = vmatprep.subr.bf16.mxu1 %v5482_v48  ;;  %v5574_v47 = vld [vmem:[%s7929_s1 + $0x90c] ss:$16 sps:$4 sm:$0xff]   ;;  %v5569_v48 = vld [vmem:[%s7929_s1 + $0x900] ss:$16 sps:$4 sm:$0xff]  }
  0xe7   :  { %3697 = vmatpush1.bf16.msra.mxu0 %v5477_v49  ;;  %4066 = vmatpush1.bf16.msra.mxu1 %v5480_v50  ;;  %v5572_v49 = vld [vmem:[%s7929_s1 + $0x908] ss:$16 sps:$4 sm:$0xff]   ;;  %v5577_v50 = vld [vmem:[%s7929_s1 + $0x924] ss:$16 sps:$4 sm:$0xff]  }
  0xe8   :  { %3698 = vmatprep.subr.bf16.mxu0 %v5485_v51  ;;  %4067 = vmatprep.subr.bf16.mxu1 %v5488_v52  ;;  %v5580_v51 = vld [vmem:[%s7929_s1 + $0x92c] ss:$16 sps:$4 sm:$0xff]   ;;  %v5575_v52 = vld [vmem:[%s7929_s1 + $0x920] ss:$16 sps:$4 sm:$0xff]  }
  0xeb   :  { %3699 = vmatpush1.bf16.msra.mxu0 %v5483_v53  ;;  %4068 = vmatpush1.bf16.msra.mxu1 %v5486_v54  ;;  %v5578_v53 = vld [vmem:[%s7929_s1 + $0x928] ss:$16 sps:$4 sm:$0xff]   ;;  %v5583_v54 = vld [vmem:[%s7929_s1 + $0x944] ss:$16 sps:$4 sm:$0xff]  }
  0xec   :  { %3700 = vmatprep.subr.bf16.mxu0 %v5491_v55  ;;  %4069 = vmatprep.subr.bf16.mxu1 %v5494_v56  ;;  %v5586_v55 = vld [vmem:[%s7929_s1 + $0x94c] ss:$16 sps:$4 sm:$0xff]   ;;  %v5581_v56 = vld [vmem:[%s7929_s1 + $0x940] ss:$16 sps:$4 sm:$0xff]  }
  0xef   :  { %3701 = vmatpush1.bf16.msra.mxu0 %v5489_v57  ;;  %4070 = vmatpush1.bf16.msra.mxu1 %v5492_v58  ;;  %v5584_v57 = vld [vmem:[%s7929_s1 + $0x948] ss:$16 sps:$4 sm:$0xff]   ;;  %v5589_v58 = vld [vmem:[%s7929_s1 + $0x964] ss:$16 sps:$4 sm:$0xff]  }
  0xf0   :  { %3702 = vmatprep.subr.bf16.mxu0 %v5497_v59  ;;  %4071 = vmatprep.subr.bf16.mxu1 %v5500_v60  ;;  %v5592_v59 = vld [vmem:[%s7929_s1 + $0x96c] ss:$16 sps:$4 sm:$0xff]   ;;  %v5587_v60 = vld [vmem:[%s7929_s1 + $0x960] ss:$16 sps:$4 sm:$0xff]  }
  0xf3   :  { %3703 = vmatpush1.bf16.msra.mxu0 %v5495_v61  ;;  %4072 = vmatpush1.bf16.msra.mxu1 %v5498_v62  ;;  %v5590_v61 = vld [vmem:[%s7929_s1 + $0x968] ss:$16 sps:$4 sm:$0xff]   ;;  %v5595_v62 = vld [vmem:[%s7929_s1 + $0x984] ss:$16 sps:$4 sm:$0xff]  }
  0xf4   :  { %3704 = vmatprep.subr.bf16.mxu0 %v5503_v63  ;;  %4073 = vmatprep.subr.bf16.mxu1 %v5506_v0  ;;  %v5598_v63 = vld [vmem:[%s7929_s1 + $0x98c] ss:$16 sps:$4 sm:$0xff]   ;;  %v5593_v0 = vld [vmem:[%s7929_s1 + $0x980] ss:$16 sps:$4 sm:$0xff]  }
  0xf7   :  { %3705 = vmatpush1.bf16.msra.mxu0 %v5501_v1  ;;  %4074 = vmatpush1.bf16.msra.mxu1 %v5504_v2  ;;  %v5596_v1 = vld [vmem:[%s7929_s1 + $0x988] ss:$16 sps:$4 sm:$0xff]   ;;  %v5601_v2 = vld [vmem:[%s7929_s1 + $0x9a4] ss:$16 sps:$4 sm:$0xff]  }
  0xf8   :  { %3706 = vmatprep.subr.bf16.mxu0 %v5509_v3  ;;  %4075 = vmatprep.subr.bf16.mxu1 %v5512_v4  ;;  %v5604_v3 = vld [vmem:[%s7929_s1 + $0x9ac] ss:$16 sps:$4 sm:$0xff]   ;;  %v5599_v4 = vld [vmem:[%s7929_s1 + $0x9a0] ss:$16 sps:$4 sm:$0xff]  }
  0xfb   :  { %3707 = vmatpush1.bf16.msra.mxu0 %v5507_v5  ;;  %4076 = vmatpush1.bf16.msra.mxu1 %v5510_v6  ;;  %v5602_v5 = vld [vmem:[%s7929_s1 + $0x9a8] ss:$16 sps:$4 sm:$0xff]   ;;  %v5607_v6 = vld [vmem:[%s7929_s1 + $0x9c4] ss:$16 sps:$4 sm:$0xff]  }
  0xfc   :  { %3708 = vmatprep.subr.bf16.mxu0 %v5515_v7  ;;  %4077 = vmatprep.subr.bf16.mxu1 %v5518_v8  ;;  %v5610_v7 = vld [vmem:[%s7929_s1 + $0x9cc] ss:$16 sps:$4 sm:$0xff]   ;;  %v5605_v8 = vld [vmem:[%s7929_s1 + $0x9c0] ss:$16 sps:$4 sm:$0xff]  }
  0xff   :  { %3709 = vmatpush1.bf16.msra.mxu0 %v5513_v9  ;;  %4078 = vmatpush1.bf16.msra.mxu1 %v5516_v10  ;;  %v5608_v9 = vld [vmem:[%s7929_s1 + $0x9c8] ss:$16 sps:$4 sm:$0xff]   ;;  %v5613_v10 = vld [vmem:[%s7929_s1 + $0x9e4] ss:$16 sps:$4 sm:$0xff]  }
 0x100   :  { %3719 = vmatprep.subr.bf16.mxu0 %v5523_v12  ;;  %4088 = vmatprep.subr.bf16.mxu1 %v5526_v13  ;;  %v5616_v12 = vld [vmem:[%s7929_s1 + $0x9ec] ss:$16 sps:$4 sm:$0xff]   ;;  %v5611_v13 = vld [vmem:[%s7929_s1 + $0x9e0] ss:$16 sps:$4 sm:$0xff]  }
 0x102   :  { %3711 = vmatmul.mubr.bf16.vlgmr.msra.gmra.mrb[0].mxu0 %v4469_v11  ;;  %4080 = vmatmul.mubr.bf16.vlgmr.msra.gmra.mrb[0].mxu1 %v4469_v11  ;;  %v5621_v11 = vld [vmem:[%s7929_s1 + $0xa04] ss:$16 sps:$4 sm:$0xff]  }
 0x103   :  { %3720 = vmatpush1.bf16.msra.mxu0 %v5521_v15  ;;  %4089 = vmatpush1.bf16.msra.mxu1 %v5524_v17  ;;  %v5614_v15 = vld [vmem:[%s7929_s1 + $0x9e8] ss:$16 sps:$4 sm:$0xff]   ;;  %v5624_v17 = vld [vmem:[%s7929_s1 + $0xa0c] ss:$16 sps:$4 sm:$0xff]  }
 0x104   :  { %3721 = vmatprep.subr.bf16.mxu0 %v5529_v18  ;;  %4090 = vmatprep.subr.bf16.mxu1 %v5532_v14  ;;  %v7091_v18 = vld [vmem:[%s7928_s0 + $0x28] sm:$0xff]  ;;  %v4471_v14 = vcombine.low %v6895_v16, %v6895_v16 }
 0x105   :  { %3751 = vmatprep.mubr.bf16.mxu0 %v4472_v19  ;;  %4120 = vmatprep.mubr.bf16.mxu1 %v4472_v19  ;;  %v5619_v19 = vld [vmem:[%s7929_s1 + $0xa00] ss:$16 sps:$4 sm:$0xff]   ;;  %v5630_v16 = vld [vmem:[%s7929_s1 + $0xa2c] ss:$16 sps:$4 sm:$0xff]  }
 0x107   :  { %3722 = vmatpush1.bf16.msra.mxu0 %v5527_v20  ;;  %4091 = vmatpush1.bf16.msra.mxu1 %v5530_v21  ;;  %v5622_v20 = vld [vmem:[%s7929_s1 + $0xa08] ss:$16 sps:$4 sm:$0xff]   ;;  %v5627_v21 = vld [vmem:[%s7929_s1 + $0xa24] ss:$16 sps:$4 sm:$0xff]  }
 0x108   :  { %3723 = vmatprep.subr.bf16.mxu0 %v5535_v22  ;;  %4092 = vmatprep.subr.bf16.mxu1 %v5538_v23  ;;  %v4474_v22 = vcombine.high %v7091_v18, %v7091_v18  ;;  %v5625_v23 = vld [vmem:[%s7929_s1 + $0xa20] ss:$16 sps:$4 sm:$0xff]  }
 0x10b   :  { %3724 = vmatpush1.bf16.msra.mxu0 %v5533_v24  ;;  %4093 = vmatpush1.bf16.msra.mxu1 %v5536_v25  ;;  %v5628_v24 = vld [vmem:[%s7929_s1 + $0xa28] ss:$16 sps:$4 sm:$0xff]   ;;  %v5633_v25 = vld [vmem:[%s7929_s1 + $0xa44] ss:$16 sps:$4 sm:$0xff]  }
 0x10c   :  { %3725 = vmatprep.subr.bf16.mxu0 %v5541_v26  ;;  %4094 = vmatprep.subr.bf16.mxu1 %v5544_v27  ;;  %v5636_v26 = vld [vmem:[%s7929_s1 + $0xa4c] ss:$16 sps:$4 sm:$0xff]   ;;  %v5631_v27 = vld [vmem:[%s7929_s1 + $0xa40] ss:$16 sps:$4 sm:$0xff]  }
 0x10f   :  { %3726 = vmatpush1.bf16.msra.mxu0 %v5539_v28  ;;  %4095 = vmatpush1.bf16.msra.mxu1 %v5542_v29  ;;  %v5634_v28 = vld [vmem:[%s7929_s1 + $0xa48] ss:$16 sps:$4 sm:$0xff]   ;;  %v5639_v29 = vld [vmem:[%s7929_s1 + $0xa64] ss:$16 sps:$4 sm:$0xff]  }
 0x110   :  { %3727 = vmatprep.subr.bf16.mxu0 %v5547_v30  ;;  %4096 = vmatprep.subr.bf16.mxu1 %v5550_v31  ;;  %v5642_v30 = vld [vmem:[%s7929_s1 + $0xa6c] ss:$16 sps:$4 sm:$0xff]   ;;  %v5637_v31 = vld [vmem:[%s7929_s1 + $0xa60] ss:$16 sps:$4 sm:$0xff]  }
 0x113   :  { %3728 = vmatpush1.bf16.msra.mxu0 %v5545_v32  ;;  %4097 = vmatpush1.bf16.msra.mxu1 %v5548_v33  ;;  %v5640_v32 = vld [vmem:[%s7929_s1 + $0xa68] ss:$16 sps:$4 sm:$0xff]   ;;  %v5645_v33 = vld [vmem:[%s7929_s1 + $0xa84] ss:$16 sps:$4 sm:$0xff]  }
 0x114   :  { %3729 = vmatprep.subr.bf16.mxu0 %v5553_v34  ;;  %4098 = vmatprep.subr.bf16.mxu1 %v5556_v35  ;;  %v5648_v34 = vld [vmem:[%s7929_s1 + $0xa8c] ss:$16 sps:$4 sm:$0xff]   ;;  %v5643_v35 = vld [vmem:[%s7929_s1 + $0xa80] ss:$16 sps:$4 sm:$0xff]  }
 0x117   :  { %3730 = vmatpush1.bf16.msra.mxu0 %v5551_v36  ;;  %4099 = vmatpush1.bf16.msra.mxu1 %v5554_v37  ;;  %v5646_v36 = vld [vmem:[%s7929_s1 + $0xa88] ss:$16 sps:$4 sm:$0xff]   ;;  %v5651_v37 = vld [vmem:[%s7929_s1 + $0xaa4] ss:$16 sps:$4 sm:$0xff]  }
 0x118   :  { %3731 = vmatprep.subr.bf16.mxu0 %v5559_v38  ;;  %4100 = vmatprep.subr.bf16.mxu1 %v5562_v39  ;;  %v5654_v38 = vld [vmem:[%s7929_s1 + $0xaac] ss:$16 sps:$4 sm:$0xff]   ;;  %v5649_v39 = vld [vmem:[%s7929_s1 + $0xaa0] ss:$16 sps:$4 sm:$0xff]  }
 0x11b   :  { %3732 = vmatpush1.bf16.msra.mxu0 %v5557_v40  ;;  %4101 = vmatpush1.bf16.msra.mxu1 %v5560_v41  ;;  %v5652_v40 = vld [vmem:[%s7929_s1 + $0xaa8] ss:$16 sps:$4 sm:$0xff]   ;;  %v5657_v41 = vld [vmem:[%s7929_s1 + $0xac4] ss:$16 sps:$4 sm:$0xff]  }
 0x11c   :  { %3733 = vmatprep.subr.bf16.mxu0 %v5565_v42  ;;  %4102 = vmatprep.subr.bf16.mxu1 %v5568_v43  ;;  %v5660_v42 = vld [vmem:[%s7929_s1 + $0xacc] ss:$16 sps:$4 sm:$0xff]   ;;  %v5655_v43 = vld [vmem:[%s7929_s1 + $0xac0] ss:$16 sps:$4 sm:$0xff]  }
 0x11f   :  { %3734 = vmatpush1.bf16.msra.mxu0 %v5563_v44  ;;  %4103 = vmatpush1.bf16.msra.mxu1 %v5566_v45  ;;  %v5658_v44 = vld [vmem:[%s7929_s1 + $0xac8] ss:$16 sps:$4 sm:$0xff]   ;;  %v5663_v45 = vld [vmem:[%s7929_s1 + $0xae4] ss:$16 sps:$4 sm:$0xff]  }
 0x120   :  { %3735 = vmatprep.subr.bf16.mxu0 %v5571_v46  ;;  %4104 = vmatprep.subr.bf16.mxu1 %v5574_v47  ;;  %v5666_v46 = vld [vmem:[%s7929_s1 + $0xaec] ss:$16 sps:$4 sm:$0xff]   ;;  %v5661_v47 = vld [vmem:[%s7929_s1 + $0xae0] ss:$16 sps:$4 sm:$0xff]  }
 0x123   :  { %3736 = vmatpush1.bf16.msra.mxu0 %v5569_v48  ;;  %4105 = vmatpush1.bf16.msra.mxu1 %v5572_v49  ;;  %v5664_v48 = vld [vmem:[%s7929_s1 + $0xae8] ss:$16 sps:$4 sm:$0xff]   ;;  %v5669_v49 = vld [vmem:[%s7929_s1 + $0xb04] ss:$16 sps:$4 sm:$0xff]  }
 0x124   :  { %3737 = vmatprep.subr.bf16.mxu0 %v5577_v50  ;;  %4106 = vmatprep.subr.bf16.mxu1 %v5580_v51  ;;  %v5672_v50 = vld [vmem:[%s7929_s1 + $0xb0c] ss:$16 sps:$4 sm:$0xff]   ;;  %v5667_v51 = vld [vmem:[%s7929_s1 + $0xb00] ss:$16 sps:$4 sm:$0xff]  }
 0x127   :  { %3738 = vmatpush1.bf16.msra.mxu0 %v5575_v52  ;;  %4107 = vmatpush1.bf16.msra.mxu1 %v5578_v53  ;;  %v5670_v52 = vld [vmem:[%s7929_s1 + $0xb08] ss:$16 sps:$4 sm:$0xff]   ;;  %v5675_v53 = vld [vmem:[%s7929_s1 + $0xb24] ss:$16 sps:$4 sm:$0xff]  }
 0x128   :  { %3739 = vmatprep.subr.bf16.mxu0 %v5583_v54  ;;  %4108 = vmatprep.subr.bf16.mxu1 %v5586_v55  ;;  %v5678_v54 = vld [vmem:[%s7929_s1 + $0xb2c] ss:$16 sps:$4 sm:$0xff]  }
 0x12b   :  { %3740 = vmatpush1.bf16.msra.mxu0 %v5581_v56  ;;  %4109 = vmatpush1.bf16.msra.mxu1 %v5584_v57 }
 0x12c   :  { %3741 = vmatprep.subr.bf16.mxu0 %v5589_v58  ;;  %4110 = vmatprep.subr.bf16.mxu1 %v5592_v59 }
 0x12f   :  { %3742 = vmatpush1.bf16.msra.mxu0 %v5587_v60  ;;  %4111 = vmatpush1.bf16.msra.mxu1 %v5590_v61 }
 0x130   :  { %3743 = vmatprep.subr.bf16.mxu0 %v5595_v62  ;;  %4112 = vmatprep.subr.bf16.mxu1 %v5598_v63 }
 0x133   :  { %3744 = vmatpush1.bf16.msra.mxu0 %v5593_v0  ;;  %4113 = vmatpush1.bf16.msra.mxu1 %v5596_v1 }
 0x134   :  { %3745 = vmatprep.subr.bf16.mxu0 %v5601_v2  ;;  %4114 = vmatprep.subr.bf16.mxu1 %v5604_v3 }
 0x137   :  { %3746 = vmatpush1.bf16.msra.mxu0 %v5599_v4  ;;  %4115 = vmatpush1.bf16.msra.mxu1 %v5602_v5 }
 0x138   :  { %3747 = vmatprep.subr.bf16.mxu0 %v5607_v6  ;;  %4116 = vmatprep.subr.bf16.mxu1 %v5610_v7 }
 0x13b   :  { %3748 = vmatpush1.bf16.msra.mxu0 %v5605_v8  ;;  %4117 = vmatpush1.bf16.msra.mxu1 %v5608_v9 }
 0x13c   :  { %3749 = vmatprep.subr.bf16.mxu0 %v5613_v10  ;;  %4118 = vmatprep.subr.bf16.mxu1 %v5616_v12 }
 0x13f   :  { %3750 = vmatpush1.bf16.msra.mxu0 %v5611_v13  ;;  %4119 = vmatpush1.bf16.msra.mxu1 %v5614_v15 }
 0x140   :  { %3760 = vmatprep.subr.bf16.mxu0 %v5621_v11  ;;  %4129 = vmatprep.subr.bf16.mxu1 %v5624_v17 }
 0x142   :  { %3752 = vmatmul.mubr.bf16.vlgmr.msra.gmra.mrb[0].mxu0 %v4471_v14  ;;  %4121 = vmatmul.mubr.bf16.vlgmr.msra.gmra.mrb[0].mxu1 %v4471_v14 }
 0x143   :  { %3761 = vmatpush1.bf16.msra.mxu0 %v5619_v19  ;;  %4130 = vmatpush1.bf16.msra.mxu1 %v5622_v20 }
 0x144   :  { %3762 = vmatprep.subr.bf16.mxu0 %v5627_v21  ;;  %4131 = vmatprep.subr.bf16.mxu1 %v5630_v16 }
 0x145   :  { %3792 = vmatprep.mubr.bf16.mxu0 %v4474_v22  ;;  %4161 = vmatprep.mubr.bf16.mxu1 %v4474_v22 }
 0x147   :  { %3763 = vmatpush1.bf16.msra.mxu0 %v5625_v23  ;;  %4132 = vmatpush1.bf16.msra.mxu1 %v5628_v24 }
 0x148   :  { %3764 = vmatprep.subr.bf16.mxu0 %v5633_v25  ;;  %4133 = vmatprep.subr.bf16.mxu1 %v5636_v26 }
 0x14b   :  { %3765 = vmatpush1.bf16.msra.mxu0 %v5631_v27  ;;  %4134 = vmatpush1.bf16.msra.mxu1 %v5634_v28 }
 0x14c   :  { %3766 = vmatprep.subr.bf16.mxu0 %v5639_v29  ;;  %4135 = vmatprep.subr.bf16.mxu1 %v5642_v30 }
 0x14f   :  { %3767 = vmatpush1.bf16.msra.mxu0 %v5637_v31  ;;  %4136 = vmatpush1.bf16.msra.mxu1 %v5640_v32 }
 0x150   :  { %3768 = vmatprep.subr.bf16.mxu0 %v5645_v33  ;;  %4137 = vmatprep.subr.bf16.mxu1 %v5648_v34 }
 0x153   :  { %3769 = vmatpush1.bf16.msra.mxu0 %v5643_v35  ;;  %4138 = vmatpush1.bf16.msra.mxu1 %v5646_v36 }
 0x154   :  { %3770 = vmatprep.subr.bf16.mxu0 %v5651_v37  ;;  %4139 = vmatprep.subr.bf16.mxu1 %v5654_v38 }
 0x157   :  { %3771 = vmatpush1.bf16.msra.mxu0 %v5649_v39  ;;  %4140 = vmatpush1.bf16.msra.mxu1 %v5652_v40 }
 0x158   :  { %3772 = vmatprep.subr.bf16.mxu0 %v5657_v41  ;;  %4141 = vmatprep.subr.bf16.mxu1 %v5660_v42 }
 0x15b   :  { %3773 = vmatpush1.bf16.msra.mxu0 %v5655_v43  ;;  %4142 = vmatpush1.bf16.msra.mxu1 %v5658_v44 }
 0x15c   :  { %3774 = vmatprep.subr.bf16.mxu0 %v5663_v45  ;;  %4143 = vmatprep.subr.bf16.mxu1 %v5666_v46 }
 0x15f   :  { %3775 = vmatpush1.bf16.msra.mxu0 %v5661_v47  ;;  %4144 = vmatpush1.bf16.msra.mxu1 %v5664_v48 }
 0x160   :  { %3776 = vmatprep.subr.bf16.mxu0 %v5669_v49  ;;  %4145 = vmatprep.subr.bf16.mxu1 %v5672_v50 }
 0x161   :  { %12 = vsyncpa [#allocation3], 0  ;;  %v5673_v55 = vld [vmem:[%s7929_s1 + $0xb20] ss:$16 sps:$4 sm:$0xff]   ;;  %v5676_v56 = vld [vmem:[%s7929_s1 + $0xb28] ss:$16 sps:$4 sm:$0xff]   ;;  %v4473_v21 = vcombine.low %v7091_v18, %v7091_v18 }
 0x162   :  { %v5681_v57 = vld [vmem:[%s7929_s1 + $0xb44] ss:$16 sps:$4 sm:$0xff]   ;;  %v5684_v58 = vld [vmem:[%s7929_s1 + $0xb4c] ss:$16 sps:$4 sm:$0xff]   ;;  %v5679_v59 = vld [vmem:[%s7929_s1 + $0xb40] ss:$16 sps:$4 sm:$0xff]  }
 0x163   :  { %3777 = vmatpush1.bf16.msra.mxu0 %v5667_v51  ;;  %4146 = vmatpush1.bf16.msra.mxu1 %v5670_v52  ;;  %v5682_v60 = vld [vmem:[%s7929_s1 + $0xb48] ss:$16 sps:$4 sm:$0xff]   ;;  %v5687_v61 = vld [vmem:[%s7929_s1 + $0xb64] ss:$16 sps:$4 sm:$0xff]   ;;  %v5690_v62 = vld [vmem:[%s7929_s1 + $0xb6c] ss:$16 sps:$4 sm:$0xff]  }
 0x164   :  { %3778 = vmatprep.subr.bf16.mxu0 %v5675_v53  ;;  %4147 = vmatprep.subr.bf16.mxu1 %v5678_v54  ;;  %v5685_v63 = vld [vmem:[%s7929_s1 + $0xb60] ss:$16 sps:$4 sm:$0xff]   ;;  %v5688_v0 = vld [vmem:[%s7929_s1 + $0xb68] ss:$16 sps:$4 sm:$0xff]   ;;  %v5693_v1 = vld [vmem:[%s7929_s1 + $0xb84] ss:$16 sps:$4 sm:$0xff]  }
 0x165   :  { %v5696_v2 = vld [vmem:[%s7929_s1 + $0xb8c] ss:$16 sps:$4 sm:$0xff]   ;;  %v5691_v3 = vld [vmem:[%s7929_s1 + $0xb80] ss:$16 sps:$4 sm:$0xff]   ;;  %v5694_v4 = vld [vmem:[%s7929_s1 + $0xb88] ss:$16 sps:$4 sm:$0xff]  }
 0x166   :  { %v5699_v5 = vld [vmem:[%s7929_s1 + $0xba4] ss:$16 sps:$4 sm:$0xff]   ;;  %v5702_v6 = vld [vmem:[%s7929_s1 + $0xbac] ss:$16 sps:$4 sm:$0xff]   ;;  %v5697_v7 = vld [vmem:[%s7929_s1 + $0xba0] ss:$16 sps:$4 sm:$0xff]  }
 0x167   :  { %3779 = vmatpush1.bf16.msra.mxu0 %v5673_v55  ;;  %4148 = vmatpush1.bf16.msra.mxu1 %v5676_v56  ;;  %v5700_v8 = vld [vmem:[%s7929_s1 + $0xba8] ss:$16 sps:$4 sm:$0xff]   ;;  %v5705_v9 = vld [vmem:[%s7929_s1 + $0xbc4] ss:$16 sps:$4 sm:$0xff]   ;;  %v5708_v10 = vld [vmem:[%s7929_s1 + $0xbcc] ss:$16 sps:$4 sm:$0xff]  }
 0x168   :  { %3780 = vmatprep.subr.bf16.mxu0 %v5681_v57  ;;  %4149 = vmatprep.subr.bf16.mxu1 %v5684_v58  ;;  %v5703_v12 = vld [vmem:[%s7929_s1 + $0xbc0] ss:$16 sps:$4 sm:$0xff]   ;;  %v5706_v13 = vld [vmem:[%s7929_s1 + $0xbc8] ss:$16 sps:$4 sm:$0xff]   ;;  %v5711_v15 = vld [vmem:[%s7929_s1 + $0xbe4] ss:$16 sps:$4 sm:$0xff]  }
 0x169   :  { %v5714_v11 = vld [vmem:[%s7929_s1 + $0xbec] ss:$16 sps:$4 sm:$0xff]   ;;  %v5709_v17 = vld [vmem:[%s7929_s1 + $0xbe0] ss:$16 sps:$4 sm:$0xff]   ;;  %v5712_v14 = vld [vmem:[%s7929_s1 + $0xbe8] ss:$16 sps:$4 sm:$0xff]  }
 0x16a   :  { %v5719_v19 = vld [vmem:[%s7929_s1 + $0xc04] ss:$16 sps:$4 sm:$0xff]   ;;  %v5722_v20 = vld [vmem:[%s7929_s1 + $0xc0c] ss:$16 sps:$4 sm:$0xff]   ;;  %v5717_v22 = vld [vmem:[%s7929_s1 + $0xc00] ss:$16 sps:$4 sm:$0xff]  }
 0x16b   :  { %3781 = vmatpush1.bf16.msra.mxu0 %v5679_v59  ;;  %4150 = vmatpush1.bf16.msra.mxu1 %v5682_v60  ;;  %v7294_v16 = vld [vmem:[%s7928_s0 + $0x30] sm:$0xff]  ;;  %v5720_v23 = vld [vmem:[%s7929_s1 + $0xc08] ss:$16 sps:$4 sm:$0xff]   ;;  %v5728_v24 = vld [vmem:[%s7929_s1 + $0xc2c] ss:$16 sps:$4 sm:$0xff]   ;;  %vm4412_vm5 = vcmask 7168  }
 0x16c   :  { %3782 = vmatprep.subr.bf16.mxu0 %v5687_v61  ;;  %4151 = vmatprep.subr.bf16.mxu1 %v5690_v62  ;;  %v5725_v18 = vld [vmem:[%s7929_s1 + $0xc24] ss:$16 sps:$4 sm:$0xff]   ;;  %v4476_v25 = vcombine.high %v7294_v16, %v7294_v16  ;;  %v5723_v26 = vld [vmem:[%s7929_s1 + $0xc20] ss:$16 sps:$4 sm:$0xff]   ;;  %v5726_v27 = vld [vmem:[%s7929_s1 + $0xc28] ss:$16 sps:$4 sm:$0xff]  }
 0x16d   :  { %v5731_v28 = vld [vmem:[%s7929_s1 + $0xc44] ss:$16 sps:$4 sm:$0xff]   ;;  %v5734_v29 = vld [vmem:[%s7929_s1 + $0xc4c] ss:$16 sps:$4 sm:$0xff]   ;;  %v5729_v30 = vld [vmem:[%s7929_s1 + $0xc40] ss:$16 sps:$4 sm:$0xff]  }
 0x16e   :  { %v5732_v31 = vld [vmem:[%s7929_s1 + $0xc48] ss:$16 sps:$4 sm:$0xff]   ;;  %v5737_v32 = vld [vmem:[%s7929_s1 + $0xc64] ss:$16 sps:$4 sm:$0xff]   ;;  %v5740_v33 = vld [vmem:[%s7929_s1 + $0xc6c] ss:$16 sps:$4 sm:$0xff]  }
 0x16f   :  { %3783 = vmatpush1.bf16.msra.mxu0 %v5685_v63  ;;  %4152 = vmatpush1.bf16.msra.mxu1 %v5688_v0  ;;  %v5735_v34 = vld [vmem:[%s7929_s1 + $0xc60] ss:$16 sps:$4 sm:$0xff]   ;;  %v5738_v35 = vld [vmem:[%s7929_s1 + $0xc68] ss:$16 sps:$4 sm:$0xff]   ;;  %v5743_v36 = vld [vmem:[%s7929_s1 + $0xc84] ss:$16 sps:$4 sm:$0xff]  }
 0x170   :  { %3784 = vmatprep.subr.bf16.mxu0 %v5693_v1  ;;  %4153 = vmatprep.subr.bf16.mxu1 %v5696_v2  ;;  %v5746_v37 = vld [vmem:[%s7929_s1 + $0xc8c] ss:$16 sps:$4 sm:$0xff]   ;;  %v5741_v38 = vld [vmem:[%s7929_s1 + $0xc80] ss:$16 sps:$4 sm:$0xff]   ;;  %v5744_v39 = vld [vmem:[%s7929_s1 + $0xc88] ss:$16 sps:$4 sm:$0xff]  }
 0x171   :  { %v5749_v40 = vld [vmem:[%s7929_s1 + $0xca4] ss:$16 sps:$4 sm:$0xff]   ;;  %v5752_v41 = vld [vmem:[%s7929_s1 + $0xcac] ss:$16 sps:$4 sm:$0xff]   ;;  %v5747_v42 = vld [vmem:[%s7929_s1 + $0xca0] ss:$16 sps:$4 sm:$0xff]  }
 0x172   :  { %v5750_v43 = vld [vmem:[%s7929_s1 + $0xca8] ss:$16 sps:$4 sm:$0xff]   ;;  %v5755_v44 = vld [vmem:[%s7929_s1 + $0xcc4] ss:$16 sps:$4 sm:$0xff]   ;;  %v5758_v45 = vld [vmem:[%s7929_s1 + $0xccc] ss:$16 sps:$4 sm:$0xff]  }
 0x173   :  { %3785 = vmatpush1.bf16.msra.mxu0 %v5691_v3  ;;  %4154 = vmatpush1.bf16.msra.mxu1 %v5694_v4  ;;  %v5753_v46 = vld [vmem:[%s7929_s1 + $0xcc0] ss:$16 sps:$4 sm:$0xff]   ;;  %v5756_v47 = vld [vmem:[%s7929_s1 + $0xcc8] ss:$16 sps:$4 sm:$0xff]   ;;  %v5761_v48 = vld [vmem:[%s7929_s1 + $0xce4] ss:$16 sps:$4 sm:$0xff]  }
 0x174   :  { %3786 = vmatprep.subr.bf16.mxu0 %v5699_v5  ;;  %4155 = vmatprep.subr.bf16.mxu1 %v5702_v6  ;;  %v5764_v49 = vld [vmem:[%s7929_s1 + $0xcec] ss:$16 sps:$4 sm:$0xff]   ;;  %v5759_v50 = vld [vmem:[%s7929_s1 + $0xce0] ss:$16 sps:$4 sm:$0xff]   ;;  %v5762_v51 = vld [vmem:[%s7929_s1 + $0xce8] ss:$16 sps:$4 sm:$0xff]  }
 0x175   :  { %v5767_v52 = vld [vmem:[%s7929_s1 + $0xd04] ss:$16 sps:$4 sm:$0xff]   ;;  %v5770_v53 = vld [vmem:[%s7929_s1 + $0xd0c] ss:$16 sps:$4 sm:$0xff]   ;;  %v5765_v54 = vld [vmem:[%s7929_s1 + $0xd00] ss:$16 sps:$4 sm:$0xff]  }
 0x176   :  { %v5768_v55 = vld [vmem:[%s7929_s1 + $0xd08] ss:$16 sps:$4 sm:$0xff]   ;;  %v5773_v56 = vld [vmem:[%s7929_s1 + $0xd24] ss:$16 sps:$4 sm:$0xff]   ;;  %v5776_v57 = vld [vmem:[%s7929_s1 + $0xd2c] ss:$16 sps:$4 sm:$0xff]  }
 0x177   :  { %3787 = vmatpush1.bf16.msra.mxu0 %v5697_v7  ;;  %4156 = vmatpush1.bf16.msra.mxu1 %v5700_v8  ;;  %v5771_v58 = vld [vmem:[%s7929_s1 + $0xd20] ss:$16 sps:$4 sm:$0xff]   ;;  %v5774_v59 = vld [vmem:[%s7929_s1 + $0xd28] ss:$16 sps:$4 sm:$0xff]   ;;  %v5779_v60 = vld [vmem:[%s7929_s1 + $0xd44] ss:$16 sps:$4 sm:$0xff]  }
 0x178   :  { %3788 = vmatprep.subr.bf16.mxu0 %v5705_v9  ;;  %4157 = vmatprep.subr.bf16.mxu1 %v5708_v10  ;;  %v5782_v61 = vld [vmem:[%s7929_s1 + $0xd4c] ss:$16 sps:$4 sm:$0xff]   ;;  %v5777_v62 = vld [vmem:[%s7929_s1 + $0xd40] ss:$16 sps:$4 sm:$0xff]   ;;  %v5780_v63 = vld [vmem:[%s7929_s1 + $0xd48] ss:$16 sps:$4 sm:$0xff]  }
 0x179   :  { %v5785_v0 = vld [vmem:[%s7929_s1 + $0xd64] ss:$16 sps:$4 sm:$0xff]   ;;  %v5788_v1 = vld [vmem:[%s7929_s1 + $0xd6c] ss:$16 sps:$4 sm:$0xff]   ;;  %v5783_v2 = vld [vmem:[%s7929_s1 + $0xd60] ss:$16 sps:$4 sm:$0xff]  }
 0x17a   :  { %v5786_v3 = vld [vmem:[%s7929_s1 + $0xd68] ss:$16 sps:$4 sm:$0xff]   ;;  %v5791_v4 = vld [vmem:[%s7929_s1 + $0xd84] ss:$16 sps:$4 sm:$0xff]   ;;  %v5794_v5 = vld [vmem:[%s7929_s1 + $0xd8c] ss:$16 sps:$4 sm:$0xff]  }
 0x17b   :  { %3789 = vmatpush1.bf16.msra.mxu0 %v5703_v12  ;;  %4158 = vmatpush1.bf16.msra.mxu1 %v5706_v13  ;;  %v5789_v6 = vld [vmem:[%s7929_s1 + $0xd80] ss:$16 sps:$4 sm:$0xff]   ;;  %v5792_v7 = vld [vmem:[%s7929_s1 + $0xd88] ss:$16 sps:$4 sm:$0xff]   ;;  %v5797_v8 = vld [vmem:[%s7929_s1 + $0xda4] ss:$16 sps:$4 sm:$0xff]  }
 0x17c   :  { %3790 = vmatprep.subr.bf16.mxu0 %v5711_v15  ;;  %4159 = vmatprep.subr.bf16.mxu1 %v5714_v11  ;;  %v5800_v9 = vld [vmem:[%s7929_s1 + $0xdac] ss:$16 sps:$4 sm:$0xff]   ;;  %v5795_v10 = vld [vmem:[%s7929_s1 + $0xda0] ss:$16 sps:$4 sm:$0xff]   ;;  %v5798_v12 = vld [vmem:[%s7929_s1 + $0xda8] ss:$16 sps:$4 sm:$0xff]  }
 0x17d   :  { %v5803_v13 = vld [vmem:[%s7929_s1 + $0xdc4] ss:$16 sps:$4 sm:$0xff]   ;;  %v5806_v15 = vld [vmem:[%s7929_s1 + $0xdcc] ss:$16 sps:$4 sm:$0xff]   ;;  %v5801_v11 = vld [vmem:[%s7929_s1 + $0xdc0] ss:$16 sps:$4 sm:$0xff]  }
 0x17e   :  { %s6044_s25 = smov [#allocation2]   ;;  %vm4447_vm6 = vcmask 0  }
 0x17f   :  { %3791 = vmatpush1.bf16.msra.mxu0 %v5709_v17  ;;  %4160 = vmatpush1.bf16.msra.mxu1 %v5712_v14  ;;  %v5804_v17 = vld [vmem:[%s7929_s1 + $0xdc8] ss:$16 sps:$4 sm:$0xff]   ;;  %v5809_v14 = vld [vmem:[%s7929_s1 + $0xde4] ss:$16 sps:$4 sm:$0xff]   ;;  %s4455_s26 = sshll.u32 %s6044_s25, 4  ;;  %s4456_s26 = int_to_ptr.vmem [resolvable:$true] %s4455_s26 }
 0x180   :  { %3801 = vmatprep.subr.bf16.mxu0 %v5719_v19  ;;  %4170 = vmatprep.subr.bf16.mxu1 %v5722_v20  ;;  %v5812_v19 = vld [vmem:[%s7929_s1 + $0xdec] ss:$16 sps:$4 sm:$0xff]   ;;  %v5807_v20 = vld [vmem:[%s7929_s1 + $0xde0] ss:$16 sps:$4 sm:$0xff]   ;;  %s6019_s27 = scalar_lea.vmem %s4456_s26, 16  ;;  %s6023_s28 = scalar_lea.vmem %s4456_s26, 32 }
 0x181   :  { %p6020_p0 = scmp.ne.s32.totalorder %s4456_s26, %s6019_s27  ;;  %p6024_p1 = scmp.lt.s32.totalorder %s4456_s26, %s4456_s26 }
 0x182   :  { %3793 = vmatmul.mubr.bf16.vlgmr.msra.gmra.mrb[0].mxu0 %v4473_v21  ;;  %4162 = vmatmul.mubr.bf16.vlgmr.msra.gmra.mrb[0].mxu1 %v4473_v21  ;;  %v5810_v21 = vld [vmem:[%s7929_s1 + $0xde8] ss:$16 sps:$4 sm:$0xff]   ;;  %p6025_p2 = scmp.lt.s32.totalorder %s6023_s28, %s6019_s27 }
 0x183   :  { %3802 = vmatpush1.bf16.msra.mxu0 %v5717_v22  ;;  %4171 = vmatpush1.bf16.msra.mxu1 %v5720_v23  ;;  %v5817_v22 = vld [vmem:[%s7929_s1 + $0xe04] ss:$16 sps:$4 sm:$0xff]   ;;  %v5820_v23 = vld [vmem:[%s7929_s1 + $0xe0c] ss:$16 sps:$4 sm:$0xff]  }
 0x184   :  { %3803 = vmatprep.subr.bf16.mxu0 %v5725_v18  ;;  %4172 = vmatprep.subr.bf16.mxu1 %v5728_v24  ;;  %v4475_v18 = vcombine.low %v7294_v16, %v7294_v16  ;;  %v7495_v24 = vld [vmem:[%s7928_s0 + $0x38] sm:$0xff]  ;;  %v5823_v16 = vld [vmem:[%s7929_s1 + $0xe24] ss:$16 sps:$4 sm:$0xff]   ;;  %p6026_p3 = por %p6025_p2, %p6024_p1 }
 0x185   :  { %3833 = vmatprep.mubr.bf16.mxu0 %v4476_v25  ;;  %4202 = vmatprep.mubr.bf16.mxu1 %v4476_v25  ;;  %v5815_v25 = vld [vmem:[%s7929_s1 + $0xe00] ss:$16 sps:$4 sm:$0xff]  }
 0x186   :  { %p6027_p4 = pnand %p6026_p3, %p6020_p0 }
 0x187   :  { %3804 = vmatpush1.bf16.msra.mxu0 %v5723_v26  ;;  %4173 = vmatpush1.bf16.msra.mxu1 %v5726_v27  ;;  %v5818_v26 = vld [vmem:[%s7929_s1 + $0xe08] ss:$16 sps:$4 sm:$0xff]   ;;  %v5826_v27 = vld [vmem:[%s7929_s1 + $0xe2c] ss:$16 sps:$4 sm:$0xff]  }
 0x188   :  { %3805 = vmatprep.subr.bf16.mxu0 %v5731_v28  ;;  %4174 = vmatprep.subr.bf16.mxu1 %v5734_v29  ;;  %v4478_v28 = vcombine.high %v7495_v24, %v7495_v24  ;;  %v5821_v29 = vld [vmem:[%s7929_s1 + $0xe20] ss:$16 sps:$4 sm:$0xff]  }
 0x18b   :  { %3806 = vmatpush1.bf16.msra.mxu0 %v5729_v30  ;;  %4175 = vmatpush1.bf16.msra.mxu1 %v5732_v31  ;;  %v5824_v30 = vld [vmem:[%s7929_s1 + $0xe28] ss:$16 sps:$4 sm:$0xff]   ;;  %v5829_v31 = vld [vmem:[%s7929_s1 + $0xe44] ss:$16 sps:$4 sm:$0xff]  }
 0x18c   :  { %3807 = vmatprep.subr.bf16.mxu0 %v5737_v32  ;;  %4176 = vmatprep.subr.bf16.mxu1 %v5740_v33  ;;  %v5832_v32 = vld [vmem:[%s7929_s1 + $0xe4c] ss:$16 sps:$4 sm:$0xff]   ;;  %v5827_v33 = vld [vmem:[%s7929_s1 + $0xe40] ss:$16 sps:$4 sm:$0xff]  }
 0x18f   :  { %3808 = vmatpush1.bf16.msra.mxu0 %v5735_v34  ;;  %4177 = vmatpush1.bf16.msra.mxu1 %v5738_v35  ;;  %v5830_v34 = vld [vmem:[%s7929_s1 + $0xe48] ss:$16 sps:$4 sm:$0xff]   ;;  %v5835_v35 = vld [vmem:[%s7929_s1 + $0xe64] ss:$16 sps:$4 sm:$0xff]  }
 0x190   :  { %3809 = vmatprep.subr.bf16.mxu0 %v5743_v36  ;;  %4178 = vmatprep.subr.bf16.mxu1 %v5746_v37  ;;  %v5838_v36 = vld [vmem:[%s7929_s1 + $0xe6c] ss:$16 sps:$4 sm:$0xff]   ;;  %v5833_v37 = vld [vmem:[%s7929_s1 + $0xe60] ss:$16 sps:$4 sm:$0xff]  }
 0x193   :  { %3810 = vmatpush1.bf16.msra.mxu0 %v5741_v38  ;;  %4179 = vmatpush1.bf16.msra.mxu1 %v5744_v39  ;;  %v5836_v38 = vld [vmem:[%s7929_s1 + $0xe68] ss:$16 sps:$4 sm:$0xff]   ;;  %v5841_v39 = vld [vmem:[%s7929_s1 + $0xe84] ss:$16 sps:$4 sm:$0xff]  }
 0x194   :  { %3811 = vmatprep.subr.bf16.mxu0 %v5749_v40  ;;  %4180 = vmatprep.subr.bf16.mxu1 %v5752_v41  ;;  %v5844_v40 = vld [vmem:[%s7929_s1 + $0xe8c] ss:$16 sps:$4 sm:$0xff]   ;;  %v5839_v41 = vld [vmem:[%s7929_s1 + $0xe80] ss:$16 sps:$4 sm:$0xff]  }
 0x197   :  { %3812 = vmatpush1.bf16.msra.mxu0 %v5747_v42  ;;  %4181 = vmatpush1.bf16.msra.mxu1 %v5750_v43  ;;  %v5842_v42 = vld [vmem:[%s7929_s1 + $0xe88] ss:$16 sps:$4 sm:$0xff]   ;;  %v5847_v43 = vld [vmem:[%s7929_s1 + $0xea4] ss:$16 sps:$4 sm:$0xff]  }
 0x198   :  { %3813 = vmatprep.subr.bf16.mxu0 %v5755_v44  ;;  %4182 = vmatprep.subr.bf16.mxu1 %v5758_v45  ;;  %v5850_v44 = vld [vmem:[%s7929_s1 + $0xeac] ss:$16 sps:$4 sm:$0xff]   ;;  %v5845_v45 = vld [vmem:[%s7929_s1 + $0xea0] ss:$16 sps:$4 sm:$0xff]  }
 0x19b   :  { %3814 = vmatpush1.bf16.msra.mxu0 %v5753_v46  ;;  %4183 = vmatpush1.bf16.msra.mxu1 %v5756_v47  ;;  %v5848_v46 = vld [vmem:[%s7929_s1 + $0xea8] ss:$16 sps:$4 sm:$0xff]   ;;  %v5853_v47 = vld [vmem:[%s7929_s1 + $0xec4] ss:$16 sps:$4 sm:$0xff]  }
 0x19c   :  { %3815 = vmatprep.subr.bf16.mxu0 %v5761_v48  ;;  %4184 = vmatprep.subr.bf16.mxu1 %v5764_v49  ;;  %v5856_v48 = vld [vmem:[%s7929_s1 + $0xecc] ss:$16 sps:$4 sm:$0xff]   ;;  %v5851_v49 = vld [vmem:[%s7929_s1 + $0xec0] ss:$16 sps:$4 sm:$0xff]  }
 0x19f   :  { %3816 = vmatpush1.bf16.msra.mxu0 %v5759_v50  ;;  %4185 = vmatpush1.bf16.msra.mxu1 %v5762_v51  ;;  %v5854_v50 = vld [vmem:[%s7929_s1 + $0xec8] ss:$16 sps:$4 sm:$0xff]   ;;  %v5859_v51 = vld [vmem:[%s7929_s1 + $0xee4] ss:$16 sps:$4 sm:$0xff]  }
 0x1a0   :  { %3817 = vmatprep.subr.bf16.mxu0 %v5767_v52  ;;  %4186 = vmatprep.subr.bf16.mxu1 %v5770_v53  ;;  %v5862_v52 = vld [vmem:[%s7929_s1 + $0xeec] ss:$16 sps:$4 sm:$0xff]   ;;  %v5857_v53 = vld [vmem:[%s7929_s1 + $0xee0] ss:$16 sps:$4 sm:$0xff]  }
 0x1a3   :  { %3818 = vmatpush1.bf16.msra.mxu0 %v5765_v54  ;;  %4187 = vmatpush1.bf16.msra.mxu1 %v5768_v55  ;;  %v5860_v54 = vld [vmem:[%s7929_s1 + $0xee8] ss:$16 sps:$4 sm:$0xff]   ;;  %v5865_v55 = vld [vmem:[%s7929_s1 + $0xf04] ss:$16 sps:$4 sm:$0xff]  }
 0x1a4   :  { %3819 = vmatprep.subr.bf16.mxu0 %v5773_v56  ;;  %4188 = vmatprep.subr.bf16.mxu1 %v5776_v57  ;;  %v5868_v56 = vld [vmem:[%s7929_s1 + $0xf0c] ss:$16 sps:$4 sm:$0xff]   ;;  %v5863_v57 = vld [vmem:[%s7929_s1 + $0xf00] ss:$16 sps:$4 sm:$0xff]  }
 0x1a7   :  { %3820 = vmatpush1.bf16.msra.mxu0 %v5771_v58  ;;  %4189 = vmatpush1.bf16.msra.mxu1 %v5774_v59  ;;  %v5866_v58 = vld [vmem:[%s7929_s1 + $0xf08] ss:$16 sps:$4 sm:$0xff]   ;;  %v5871_v59 = vld [vmem:[%s7929_s1 + $0xf24] ss:$16 sps:$4 sm:$0xff]  }
 0x1a8   :  { %3821 = vmatprep.subr.bf16.mxu0 %v5779_v60  ;;  %4190 = vmatprep.subr.bf16.mxu1 %v5782_v61  ;;  %v5874_v60 = vld [vmem:[%s7929_s1 + $0xf2c] ss:$16 sps:$4 sm:$0xff]   ;;  %v5869_v61 = vld [vmem:[%s7929_s1 + $0xf20] ss:$16 sps:$4 sm:$0xff]  }
 0x1ab   :  { %3822 = vmatpush1.bf16.msra.mxu0 %v5777_v62  ;;  %4191 = vmatpush1.bf16.msra.mxu1 %v5780_v63  ;;  %v5872_v62 = vld [vmem:[%s7929_s1 + $0xf28] ss:$16 sps:$4 sm:$0xff]   ;;  %v5877_v63 = vld [vmem:[%s7929_s1 + $0xf44] ss:$16 sps:$4 sm:$0xff]  }
 0x1ac   :  { %3823 = vmatprep.subr.bf16.mxu0 %v5785_v0  ;;  %4192 = vmatprep.subr.bf16.mxu1 %v5788_v1  ;;  %v5880_v0 = vld [vmem:[%s7929_s1 + $0xf4c] ss:$16 sps:$4 sm:$0xff]   ;;  %v5875_v1 = vld [vmem:[%s7929_s1 + $0xf40] ss:$16 sps:$4 sm:$0xff]  }
 0x1af   :  { %3824 = vmatpush1.bf16.msra.mxu0 %v5783_v2  ;;  %4193 = vmatpush1.bf16.msra.mxu1 %v5786_v3  ;;  %v5878_v2 = vld [vmem:[%s7929_s1 + $0xf48] ss:$16 sps:$4 sm:$0xff]   ;;  %v5883_v3 = vld [vmem:[%s7929_s1 + $0xf64] ss:$16 sps:$4 sm:$0xff]  }
 0x1b0   :  { %3825 = vmatprep.subr.bf16.mxu0 %v5791_v4  ;;  %4194 = vmatprep.subr.bf16.mxu1 %v5794_v5  ;;  %v5886_v4 = vld [vmem:[%s7929_s1 + $0xf6c] ss:$16 sps:$4 sm:$0xff]   ;;  %v5881_v5 = vld [vmem:[%s7929_s1 + $0xf60] ss:$16 sps:$4 sm:$0xff]  }
 0x1b3   :  { %3826 = vmatpush1.bf16.msra.mxu0 %v5789_v6  ;;  %4195 = vmatpush1.bf16.msra.mxu1 %v5792_v7  ;;  %v5884_v6 = vld [vmem:[%s7929_s1 + $0xf68] ss:$16 sps:$4 sm:$0xff]   ;;  %v5889_v7 = vld [vmem:[%s7929_s1 + $0xf84] ss:$16 sps:$4 sm:$0xff]  }
 0x1b4   :  { %3827 = vmatprep.subr.bf16.mxu0 %v5797_v8  ;;  %4196 = vmatprep.subr.bf16.mxu1 %v5800_v9  ;;  %v5892_v8 = vld [vmem:[%s7929_s1 + $0xf8c] ss:$16 sps:$4 sm:$0xff]   ;;  %v5887_v9 = vld [vmem:[%s7929_s1 + $0xf80] ss:$16 sps:$4 sm:$0xff]  }
 0x1b7   :  { %3828 = vmatpush1.bf16.msra.mxu0 %v5795_v10  ;;  %4197 = vmatpush1.bf16.msra.mxu1 %v5798_v12  ;;  %v5890_v10 = vld [vmem:[%s7929_s1 + $0xf88] ss:$16 sps:$4 sm:$0xff]   ;;  %v5895_v12 = vld [vmem:[%s7929_s1 + $0xfa4] ss:$16 sps:$4 sm:$0xff]  }
 0x1b8   :  { %3829 = vmatprep.subr.bf16.mxu0 %v5803_v13  ;;  %4198 = vmatprep.subr.bf16.mxu1 %v5806_v15  ;;  %v5898_v13 = vld [vmem:[%s7929_s1 + $0xfac] ss:$16 sps:$4 sm:$0xff]   ;;  %v5893_v15 = vld [vmem:[%s7929_s1 + $0xfa0] ss:$16 sps:$4 sm:$0xff]  }
 0x1bb   :  { %3830 = vmatpush1.bf16.msra.mxu0 %v5801_v11  ;;  %4199 = vmatpush1.bf16.msra.mxu1 %v5804_v17  ;;  %v5896_v11 = vld [vmem:[%s7929_s1 + $0xfa8] ss:$16 sps:$4 sm:$0xff]   ;;  %v5901_v17 = vld [vmem:[%s7929_s1 + $0xfc4] ss:$16 sps:$4 sm:$0xff]  }
 0x1bc   :  { %3831 = vmatprep.subr.bf16.mxu0 %v5809_v14  ;;  %4200 = vmatprep.subr.bf16.mxu1 %v5812_v19  ;;  %v5904_v14 = vld [vmem:[%s7929_s1 + $0xfcc] ss:$16 sps:$4 sm:$0xff]   ;;  %v5899_v19 = vld [vmem:[%s7929_s1 + $0xfc0] ss:$16 sps:$4 sm:$0xff]  }
 0x1bf   :  { %3832 = vmatpush1.bf16.msra.mxu0 %v5807_v20  ;;  %4201 = vmatpush1.bf16.msra.mxu1 %v5810_v21  ;;  %v5902_v20 = vld [vmem:[%s7929_s1 + $0xfc8] ss:$16 sps:$4 sm:$0xff]   ;;  %v5907_v21 = vld [vmem:[%s7929_s1 + $0xfe4] ss:$16 sps:$4 sm:$0xff]  }
 0x1c0   :  { %3842 = vmatprep.subr.bf16.mxu0 %v5817_v22  ;;  %4211 = vmatprep.subr.bf16.mxu1 %v5820_v23  ;;  %v5910_v22 = vld [vmem:[%s7929_s1 + $0xfec] ss:$16 sps:$4 sm:$0xff]   ;;  %v5905_v23 = vld [vmem:[%s7929_s1 + $0xfe0] ss:$16 sps:$4 sm:$0xff]  }
 0x1c2   :  { %3834 = vmatmul.mubr.bf16.vlgmr.msra.gmra.mrb[0].mxu0 %v4475_v18  ;;  %4203 = vmatmul.mubr.bf16.vlgmr.msra.gmra.mrb[0].mxu1 %v4475_v18  ;;  %v5908_v18 = vld [vmem:[%s7929_s1 + $0xfe8] ss:$16 sps:$4 sm:$0xff]  }
 0x1c3   :  { %3843 = vmatpush1.bf16.msra.mxu0 %v5815_v25  ;;  %4212 = vmatpush1.bf16.msra.mxu1 %v5818_v26  ;;  %v5915_v25 = vld [vmem:[%s7929_s1 + $0x1004] ss:$16 sps:$4 sm:$0xff]   ;;  %v5918_v26 = vld [vmem:[%s7929_s1 + $0x100c] ss:$16 sps:$4 sm:$0xff]  }
 0x1c4   :  { %3844 = vmatprep.subr.bf16.mxu0 %v5823_v16  ;;  %4213 = vmatprep.subr.bf16.mxu1 %v5826_v27  ;;  %v4477_v16 = vcombine.low %v7495_v24, %v7495_v24  ;;  %v7696_v27 = vld [vmem:[%s7928_s0 + $0x40] sm:$0xff] }
 0x1c5   :  { %3874 = vmatprep.mubr.bf16.mxu0 %v4478_v28  ;;  %4243 = vmatprep.mubr.bf16.mxu1 %v4478_v28  ;;  %v5913_v28 = vld [vmem:[%s7929_s1 + $0x1000] ss:$16 sps:$4 sm:$0xff]   ;;  %v5921_v24 = vld [vmem:[%s7929_s1 + $0x1024] ss:$16 sps:$4 sm:$0xff]  }
 0x1c7   :  { %3845 = vmatpush1.bf16.msra.mxu0 %v5821_v29  ;;  %4214 = vmatpush1.bf16.msra.mxu1 %v5824_v30  ;;  %v5916_v29 = vld [vmem:[%s7929_s1 + $0x1008] ss:$16 sps:$4 sm:$0xff]   ;;  %v5924_v30 = vld [vmem:[%s7929_s1 + $0x102c] ss:$16 sps:$4 sm:$0xff]  }
 0x1c8   :  { %3846 = vmatprep.subr.bf16.mxu0 %v5829_v31  ;;  %4215 = vmatprep.subr.bf16.mxu1 %v5832_v32  ;;  %v4480_v31 = vcombine.high %v7696_v27, %v7696_v27  ;;  %v5919_v32 = vld [vmem:[%s7929_s1 + $0x1020] ss:$16 sps:$4 sm:$0xff]  }
 0x1cb   :  { %3847 = vmatpush1.bf16.msra.mxu0 %v5827_v33  ;;  %4216 = vmatpush1.bf16.msra.mxu1 %v5830_v34  ;;  %v5922_v33 = vld [vmem:[%s7929_s1 + $0x1028] ss:$16 sps:$4 sm:$0xff]   ;;  %v5927_v34 = vld [vmem:[%s7929_s1 + $0x1044] ss:$16 sps:$4 sm:$0xff]  }
 0x1cc   :  { %3848 = vmatprep.subr.bf16.mxu0 %v5835_v35  ;;  %4217 = vmatprep.subr.bf16.mxu1 %v5838_v36  ;;  %v5930_v35 = vld [vmem:[%s7929_s1 + $0x104c] ss:$16 sps:$4 sm:$0xff]   ;;  %v5925_v36 = vld [vmem:[%s7929_s1 + $0x1040] ss:$16 sps:$4 sm:$0xff]  }
 0x1cf   :  { %3849 = vmatpush1.bf16.msra.mxu0 %v5833_v37  ;;  %4218 = vmatpush1.bf16.msra.mxu1 %v5836_v38  ;;  %v5928_v37 = vld [vmem:[%s7929_s1 + $0x1048] ss:$16 sps:$4 sm:$0xff]   ;;  %v5933_v38 = vld [vmem:[%s7929_s1 + $0x1064] ss:$16 sps:$4 sm:$0xff]  }
 0x1d0   :  { %3850 = vmatprep.subr.bf16.mxu0 %v5841_v39  ;;  %4219 = vmatprep.subr.bf16.mxu1 %v5844_v40  ;;  %v5936_v39 = vld [vmem:[%s7929_s1 + $0x106c] ss:$16 sps:$4 sm:$0xff]   ;;  %v5931_v40 = vld [vmem:[%s7929_s1 + $0x1060] ss:$16 sps:$4 sm:$0xff]  }
 0x1d3   :  { %3851 = vmatpush1.bf16.msra.mxu0 %v5839_v41  ;;  %4220 = vmatpush1.bf16.msra.mxu1 %v5842_v42  ;;  %v5934_v41 = vld [vmem:[%s7929_s1 + $0x1068] ss:$16 sps:$4 sm:$0xff]   ;;  %v5939_v42 = vld [vmem:[%s7929_s1 + $0x1084] ss:$16 sps:$4 sm:$0xff]  }
 0x1d4   :  { %3852 = vmatprep.subr.bf16.mxu0 %v5847_v43  ;;  %4221 = vmatprep.subr.bf16.mxu1 %v5850_v44  ;;  %v5942_v43 = vld [vmem:[%s7929_s1 + $0x108c] ss:$16 sps:$4 sm:$0xff]   ;;  %v5937_v44 = vld [vmem:[%s7929_s1 + $0x1080] ss:$16 sps:$4 sm:$0xff]  }
 0x1d7   :  { %3853 = vmatpush1.bf16.msra.mxu0 %v5845_v45  ;;  %4222 = vmatpush1.bf16.msra.mxu1 %v5848_v46  ;;  %v5940_v45 = vld [vmem:[%s7929_s1 + $0x1088] ss:$16 sps:$4 sm:$0xff]   ;;  %v5945_v46 = vld [vmem:[%s7929_s1 + $0x10a4] ss:$16 sps:$4 sm:$0xff]  }
 0x1d8   :  { %3854 = vmatprep.subr.bf16.mxu0 %v5853_v47  ;;  %4223 = vmatprep.subr.bf16.mxu1 %v5856_v48  ;;  %v5948_v47 = vld [vmem:[%s7929_s1 + $0x10ac] ss:$16 sps:$4 sm:$0xff]   ;;  %v5943_v48 = vld [vmem:[%s7929_s1 + $0x10a0] ss:$16 sps:$4 sm:$0xff]  }
 0x1db   :  { %3855 = vmatpush1.bf16.msra.mxu0 %v5851_v49  ;;  %4224 = vmatpush1.bf16.msra.mxu1 %v5854_v50  ;;  %v5946_v49 = vld [vmem:[%s7929_s1 + $0x10a8] ss:$16 sps:$4 sm:$0xff]   ;;  %v5951_v50 = vld [vmem:[%s7929_s1 + $0x10c4] ss:$16 sps:$4 sm:$0xff]  }
 0x1dc   :  { %3856 = vmatprep.subr.bf16.mxu0 %v5859_v51  ;;  %4225 = vmatprep.subr.bf16.mxu1 %v5862_v52  ;;  %v5954_v51 = vld [vmem:[%s7929_s1 + $0x10cc] ss:$16 sps:$4 sm:$0xff]   ;;  %v5949_v52 = vld [vmem:[%s7929_s1 + $0x10c0] ss:$16 sps:$4 sm:$0xff]  }
 0x1df   :  { %3857 = vmatpush1.bf16.msra.mxu0 %v5857_v53  ;;  %4226 = vmatpush1.bf16.msra.mxu1 %v5860_v54  ;;  %v5952_v53 = vld [vmem:[%s7929_s1 + $0x10c8] ss:$16 sps:$4 sm:$0xff]   ;;  %v5957_v54 = vld [vmem:[%s7929_s1 + $0x10e4] ss:$16 sps:$4 sm:$0xff]  }
 0x1e0   :  { %3858 = vmatprep.subr.bf16.mxu0 %v5865_v55  ;;  %4227 = vmatprep.subr.bf16.mxu1 %v5868_v56  ;;  %v5960_v55 = vld [vmem:[%s7929_s1 + $0x10ec] ss:$16 sps:$4 sm:$0xff]   ;;  %v5955_v56 = vld [vmem:[%s7929_s1 + $0x10e0] ss:$16 sps:$4 sm:$0xff]  }
 0x1e3   :  { %3859 = vmatpush1.bf16.msra.mxu0 %v5863_v57  ;;  %4228 = vmatpush1.bf16.msra.mxu1 %v5866_v58  ;;  %v5958_v57 = vld [vmem:[%s7929_s1 + $0x10e8] ss:$16 sps:$4 sm:$0xff]   ;;  %v5963_v58 = vld [vmem:[%s7929_s1 + $0x1104] ss:$16 sps:$4 sm:$0xff]  }
 0x1e4   :  { %3860 = vmatprep.subr.bf16.mxu0 %v5871_v59  ;;  %4229 = vmatprep.subr.bf16.mxu1 %v5874_v60  ;;  %v5966_v59 = vld [vmem:[%s7929_s1 + $0x110c] ss:$16 sps:$4 sm:$0xff]   ;;  %v5961_v60 = vld [vmem:[%s7929_s1 + $0x1100] ss:$16 sps:$4 sm:$0xff]  }
 0x1e7   :  { %3861 = vmatpush1.bf16.msra.mxu0 %v5869_v61  ;;  %4230 = vmatpush1.bf16.msra.mxu1 %v5872_v62  ;;  %v5964_v61 = vld [vmem:[%s7929_s1 + $0x1108] ss:$16 sps:$4 sm:$0xff]   ;;  %v5969_v62 = vld [vmem:[%s7929_s1 + $0x1124] ss:$16 sps:$4 sm:$0xff]  }
 0x1e8   :  { %3862 = vmatprep.subr.bf16.mxu0 %v5877_v63  ;;  %4231 = vmatprep.subr.bf16.mxu1 %v5880_v0  ;;  %v5972_v63 = vld [vmem:[%s7929_s1 + $0x112c] ss:$16 sps:$4 sm:$0xff]   ;;  %v5967_v0 = vld [vmem:[%s7929_s1 + $0x1120] ss:$16 sps:$4 sm:$0xff]  }
 0x1eb   :  { %3863 = vmatpush1.bf16.msra.mxu0 %v5875_v1  ;;  %4232 = vmatpush1.bf16.msra.mxu1 %v5878_v2  ;;  %v5970_v1 = vld [vmem:[%s7929_s1 + $0x1128] ss:$16 sps:$4 sm:$0xff]   ;;  %v5975_v2 = vld [vmem:[%s7929_s1 + $0x1144] ss:$16 sps:$4 sm:$0xff]  }
 0x1ec   :  { %3864 = vmatprep.subr.bf16.mxu0 %v5883_v3  ;;  %4233 = vmatprep.subr.bf16.mxu1 %v5886_v4  ;;  %v5978_v3 = vld [vmem:[%s7929_s1 + $0x114c] ss:$16 sps:$4 sm:$0xff]   ;;  %v5973_v4 = vld [vmem:[%s7929_s1 + $0x1140] ss:$16 sps:$4 sm:$0xff]  }
 0x1ef   :  { %3865 = vmatpush1.bf16.msra.mxu0 %v5881_v5  ;;  %4234 = vmatpush1.bf16.msra.mxu1 %v5884_v6  ;;  %v5976_v5 = vld [vmem:[%s7929_s1 + $0x1148] ss:$16 sps:$4 sm:$0xff]   ;;  %v5981_v6 = vld [vmem:[%s7929_s1 + $0x1164] ss:$16 sps:$4 sm:$0xff]  }
 0x1f0   :  { %3866 = vmatprep.subr.bf16.mxu0 %v5889_v7  ;;  %4235 = vmatprep.subr.bf16.mxu1 %v5892_v8  ;;  %v5984_v7 = vld [vmem:[%s7929_s1 + $0x116c] ss:$16 sps:$4 sm:$0xff]   ;;  %v5979_v8 = vld [vmem:[%s7929_s1 + $0x1160] ss:$16 sps:$4 sm:$0xff]  }
 0x1f3   :  { %3867 = vmatpush1.bf16.msra.mxu0 %v5887_v9  ;;  %4236 = vmatpush1.bf16.msra.mxu1 %v5890_v10  ;;  %v5982_v9 = vld [vmem:[%s7929_s1 + $0x1168] ss:$16 sps:$4 sm:$0xff]   ;;  %v5987_v10 = vld [vmem:[%s7929_s1 + $0x1184] ss:$16 sps:$4 sm:$0xff]  }
 0x1f4   :  { %3868 = vmatprep.subr.bf16.mxu0 %v5895_v12  ;;  %4237 = vmatprep.subr.bf16.mxu1 %v5898_v13  ;;  %v5990_v12 = vld [vmem:[%s7929_s1 + $0x118c] ss:$16 sps:$4 sm:$0xff]   ;;  %v5985_v13 = vld [vmem:[%s7929_s1 + $0x1180] ss:$16 sps:$4 sm:$0xff]  }
 0x1f7   :  { %3869 = vmatpush1.bf16.msra.mxu0 %v5893_v15  ;;  %4238 = vmatpush1.bf16.msra.mxu1 %v5896_v11  ;;  %v5988_v15 = vld [vmem:[%s7929_s1 + $0x1188] ss:$16 sps:$4 sm:$0xff]   ;;  %v5993_v11 = vld [vmem:[%s7929_s1 + $0x11a4] ss:$16 sps:$4 sm:$0xff]  }
 0x1f8   :  { %3870 = vmatprep.subr.bf16.mxu0 %v5901_v17  ;;  %4239 = vmatprep.subr.bf16.mxu1 %v5904_v14  ;;  %v5996_v17 = vld [vmem:[%s7929_s1 + $0x11ac] ss:$16 sps:$4 sm:$0xff]   ;;  %v5991_v14 = vld [vmem:[%s7929_s1 + $0x11a0] ss:$16 sps:$4 sm:$0xff]  }
 0x1fb   :  { %3871 = vmatpush1.bf16.msra.mxu0 %v5899_v19  ;;  %4240 = vmatpush1.bf16.msra.mxu1 %v5902_v20  ;;  %v5994_v19 = vld [vmem:[%s7929_s1 + $0x11a8] ss:$16 sps:$4 sm:$0xff]   ;;  %v5999_v20 = vld [vmem:[%s7929_s1 + $0x11c4] ss:$16 sps:$4 sm:$0xff]  }
 0x1fc   :  { %3872 = vmatprep.subr.bf16.mxu0 %v5907_v21  ;;  %4241 = vmatprep.subr.bf16.mxu1 %v5910_v22  ;;  %v6002_v21 = vld [vmem:[%s7929_s1 + $0x11cc] ss:$16 sps:$4 sm:$0xff]   ;;  %v5997_v22 = vld [vmem:[%s7929_s1 + $0x11c0] ss:$16 sps:$4 sm:$0xff]  }
 0x1ff   :  { %3873 = vmatpush1.bf16.msra.mxu0 %v5905_v23  ;;  %4242 = vmatpush1.bf16.msra.mxu1 %v5908_v18  ;;  %v6000_v23 = vld [vmem:[%s7929_s1 + $0x11c8] ss:$16 sps:$4 sm:$0xff]   ;;  %v6005_v18 = vld [vmem:[%s7929_s1 + $0x11e4] ss:$16 sps:$4 sm:$0xff]  }
 0x200   :  { %3883 = vmatprep.subr.bf16.mxu0 %v5915_v25  ;;  %4252 = vmatprep.subr.bf16.mxu1 %v5918_v26  ;;  %v6008_v25 = vld [vmem:[%s7929_s1 + $0x11ec] ss:$16 sps:$4 sm:$0xff]   ;;  %v6003_v26 = vld [vmem:[%s7929_s1 + $0x11e0] ss:$16 sps:$4 sm:$0xff]  }
 0x202   :  { %3875 = vmatmul.mubr.bf16.vlgmr.msra.gmra.mrb[0].mxu0 %v4477_v16  ;;  %4244 = vmatmul.mubr.bf16.vlgmr.msra.gmra.mrb[0].mxu1 %v4477_v16  ;;  %v6006_v16 = vld [vmem:[%s7929_s1 + $0x11e8] ss:$16 sps:$4 sm:$0xff]  }
 0x203   :  { %3884 = vmatpush1.bf16.msra.mxu0 %v5913_v28  ;;  %4253 = vmatpush1.bf16.msra.mxu1 %v5916_v29  ;;  %v4479_v28 = vcombine.low %v7696_v27, %v7696_v27  ;;  %v4295_v29 = vlaneseq  ;;  %v4319_v27 = vld [vmem:[%s7931_s3] sm:$0xf] }
 0x204   :  { %3885 = vmatprep.subr.bf16.mxu0 %v5921_v24  ;;  %4254 = vmatprep.subr.bf16.mxu1 %v5924_v30 }
 0x205   :  { %3915 = vmatprep.mubr.bf16.mxu0 %v4480_v31  ;;  %4284 = vmatprep.mubr.bf16.mxu1 %v4480_v31  ;;  %v7888_v24 = vshrl.u32 %v4295_v29, 7 }
 0x207   :  { %3886 = vmatpush1.bf16.msra.mxu0 %v5919_v32  ;;  %4255 = vmatpush1.bf16.msra.mxu1 %v5922_v33  ;;  %v4297_v30 = vsub.s32 0, %v7888_v24  ;;  %v4305_v31 = vsub.s32 2, %v7888_v24  ;;  %v4293_v32 = vld [vmem:[%s7930_s2] sm:$0xf]  ;;  %v4301_v33 = vsub.s32 1, %v7888_v24  ;;  %vm4390_vm4 = vcmp.lt.s32.totalorder %v7888_v24, 2 }
 0x208   :  { %3887 = vmatprep.subr.bf16.mxu0 %v5927_v34  ;;  %4256 = vmatprep.subr.bf16.mxu1 %v5930_v35  ;;  %v4309_v34 = vsub.s32 3, %v7888_v24 }
 0x209   :  { %v4298_v35 = vrot.slane %v4293_v32, %v4297_v30 }
 0x20b   :  { %3888 = vmatpush1.bf16.msra.mxu0 %v5925_v36  ;;  %4257 = vmatpush1.bf16.msra.mxu1 %v5928_v37  ;;  %v4306_v36 = vrot.slane %v4293_v32, %v4305_v31  ;;  %v4302_v37 = vrot.slane %v4293_v32, %v4301_v33 }
 0x20c   :  { %3889 = vmatprep.subr.bf16.mxu0 %v5933_v38  ;;  %4258 = vmatprep.subr.bf16.mxu1 %v5936_v39  ;;  %v4310_v38 = vrot.slane %v4293_v32, %v4309_v34  ;;  %v4324_v39 = vrot.slane %v4319_v27, %v4297_v30 }
 0x20f   :  { %3890 = vmatpush1.bf16.msra.mxu0 %v5931_v40  ;;  %4259 = vmatpush1.bf16.msra.mxu1 %v5934_v41  ;;  %v4332_v40 = vrot.slane %v4319_v27, %v4305_v31 }
 0x210   :  { %3891 = vmatprep.subr.bf16.mxu0 %v5939_v42  ;;  %4260 = vmatprep.subr.bf16.mxu1 %v5942_v43  ;;  %v4328_v43 = vrot.slane %v4319_v27, %v4301_v33 }
 0x213   :  { %3892 = vmatpush1.bf16.msra.mxu0 %v5937_v44  ;;  %4261 = vmatpush1.bf16.msra.mxu1 %v5940_v45  ;;  %v4336_v44 = vrot.slane %v4319_v27, %v4309_v34 }
 0x214   :  { %3893 = vmatprep.subr.bf16.mxu0 %v5945_v46  ;;  %4262 = vmatprep.subr.bf16.mxu1 %v5948_v47 }
 0x217   :  { %3894 = vmatpush1.bf16.msra.mxu0 %v5943_v48  ;;  %4263 = vmatpush1.bf16.msra.mxu1 %v5946_v49  ;;  %v4357_v49 = vld [vmem:[%s7932_s4] sm:$0xf] }
 0x218   :  { %3895 = vmatprep.subr.bf16.mxu0 %v5951_v50  ;;  %4264 = vmatprep.subr.bf16.mxu1 %v5954_v51 }
 0x21b   :  { %3896 = vmatpush1.bf16.msra.mxu0 %v5949_v52  ;;  %4265 = vmatpush1.bf16.msra.mxu1 %v5952_v53 }
 0x21c   :  { %3897 = vmatprep.subr.bf16.mxu0 %v5957_v54  ;;  %4266 = vmatprep.subr.bf16.mxu1 %v5960_v55 }
 0x21f   :  { %3898 = vmatpush1.bf16.msra.mxu0 %v5955_v56  ;;  %4267 = vmatpush1.bf16.msra.mxu1 %v5958_v57 }
 0x220   :  { %3899 = vmatprep.subr.bf16.mxu0 %v5963_v58  ;;  %4268 = vmatprep.subr.bf16.mxu1 %v5966_v59 }
 0x223   :  { %3900 = vmatpush1.bf16.msra.mxu0 %v5961_v60  ;;  %4269 = vmatpush1.bf16.msra.mxu1 %v5964_v61  ;;  %v4362_v60 = vrot.slane %v4357_v49, %v4297_v30  ;;  %v4366_v61 = vrot.slane %v4357_v49, %v4301_v33 }
 0x224   :  { %3901 = vmatprep.subr.bf16.mxu0 %v5969_v62  ;;  %4270 = vmatprep.subr.bf16.mxu1 %v5972_v63 }
 0x227   :  { %3902 = vmatpush1.bf16.msra.mxu0 %v5967_v0  ;;  %4271 = vmatpush1.bf16.msra.mxu1 %v5970_v1 }
 0x228   :  { %3903 = vmatprep.subr.bf16.mxu0 %v5975_v2  ;;  %4272 = vmatprep.subr.bf16.mxu1 %v5978_v3  ;;  %v4370_v3 = vrot.slane %v4357_v49, %v4305_v31 }
 0x22b   :  { %3904 = vmatpush1.bf16.msra.mxu0 %v5973_v4  ;;  %4273 = vmatpush1.bf16.msra.mxu1 %v5976_v5 }
 0x22c   :  { %3905 = vmatprep.subr.bf16.mxu0 %v5981_v6  ;;  %4274 = vmatprep.subr.bf16.mxu1 %v5984_v7  ;;  %v4374_v7 = vrot.slane %v4357_v49, %v4309_v34 }
 0x22f   :  { %3906 = vmatpush1.bf16.msra.mxu0 %v5979_v8  ;;  %4275 = vmatpush1.bf16.msra.mxu1 %v5982_v9 }
 0x230   :  { %3907 = vmatprep.subr.bf16.mxu0 %v5987_v10  ;;  %4276 = vmatprep.subr.bf16.mxu1 %v5990_v12 }
 0x233   :  { %3908 = vmatpush1.bf16.msra.mxu0 %v5985_v13  ;;  %4277 = vmatpush1.bf16.msra.mxu1 %v5988_v15 }
 0x234   :  { %3909 = vmatprep.subr.bf16.mxu0 %v5993_v11  ;;  %4278 = vmatprep.subr.bf16.mxu1 %v5996_v17  ;;  %v4425_v17 = vld [vmem:[%s7933_s5] sm:$0xff] }
 0x237   :  { %3910 = vmatpush1.bf16.msra.mxu0 %v5991_v14  ;;  %4279 = vmatpush1.bf16.msra.mxu1 %v5994_v19  ;;  %v4426_v14 = vld [vmem:[%s7933_s5 + $0x8] sm:$0xff]  ;;  %v4427_v19 = vld [vmem:[%s7934_s6] sm:$0xff] }
 0x238   :  { %3911 = vmatprep.subr.bf16.mxu0 %v5999_v20  ;;  %4280 = vmatprep.subr.bf16.mxu1 %v6002_v21  ;;  %v4428_v20 = vld [vmem:[%s7934_s6 + $0x8] sm:$0xff]  ;;  %v4429_v21 = vsub.f32 %v4425_v17, %v4427_v19 }
 0x23b   :  { %3912 = vmatpush1.bf16.msra.mxu0 %v5997_v22  ;;  %4281 = vmatpush1.bf16.msra.mxu1 %v6000_v23  ;;  %v4430_v22 = vsub.f32 %v4426_v14, %v4428_v20  ;;  %v4431_v23 = vmul.f32 %v4429_v21, %v4429_v21 }
 0x23c   :  { %3913 = vmatprep.subr.bf16.mxu0 %v6005_v18  ;;  %4282 = vmatprep.subr.bf16.mxu1 %v6008_v25 }
 0x23d   :  { %v4432_v18 = vmul.f32 %v4430_v22, %v4430_v22 }
 0x23f   :  { %3914 = vmatpush1.bf16.msra.mxu0 %v6003_v26  ;;  %4283 = vmatpush1.bf16.msra.mxu1 %v6006_v16  ;;  %v4433_v25 = vadd.f32 %v4432_v18, %v4431_v23 }
 0x241   :  { %4434 = vadd.xlane.f32.xlu1 %v4433_v25 }
 0x242   :  { %3916 = vmatmul.mubr.bf16.vlgmr.msra.gmra.mrb[0].mxu0 %v4479_v28  ;;  %4285 = vmatmul.mubr.bf16.vlgmr.msra.gmra.mrb[0].mxu1 %v4479_v28 }
 0x315   :  { %v3917_v41 = vpop.f32.mrb[0].mxu0  ;;  %v4286_v42 = vpop.f32.mrb[0].mxu1 }
 0x316   :  { %v4315_v45 = vmul.f32 %v4298_v35, %v3917_v41  ;;  %v4317_v46 = vmul.f32 %v4306_v36, %v4286_v42  ;;  %v3919_v47 = vpop.f32.mrb[1].mxu0  ;;  %v4288_v48 = vpop.f32.mrb[1].mxu1  ;;  %v6043_v41 = vmov 0.0  }
 0x317   :  { %v4316_v50 = vmul.f32 %v4302_v37, %v3919_v47  ;;  %v4318_v51 = vmul.f32 %v4310_v38, %v4288_v48  ;;  %v3921_v52 = vpop.f32.mrb[2].mxu0  ;;  %v4290_v53 = vpop.f32.mrb[2].mxu1  ;;  %v5057_v42 = vsel %vm4390_vm4, 1.0, %v6043_v41 }
 0x318   :  { %v4341_v54 = vadd.f32 %v4324_v39, %v4315_v45  ;;  %v4343_v55 = vadd.f32 %v4332_v40, %v4317_v46  ;;  %v3922_v56 = vpop.f32.mrb[3].mxu0  ;;  %v4291_v57 = vpop.f32.mrb[3].mxu1 }
 0x319   :  { %v4342_v58 = vadd.f32 %v4328_v43, %v4316_v50  ;;  %v4344_v59 = vadd.f32 %v4336_v44, %v4318_v51  ;;  %v4435_v46 = vpop.xlane.xlu1 %4434 }
 0x31a   :  { %vm4345_vm0 = vcmp.ge.f32.partialorder %v4341_v54, 0.0  ;;  %v4349_v62 = vmul.f32 0.2, %v4341_v54  ;;  %vm4347_vm1 = vcmp.ge.f32.partialorder %v4343_v55, 0.0  ;;  %v4351_v63 = vmul.f32 0.2, %v4343_v55 }
 0x31b   :  { %vm4346_vm2 = vcmp.ge.f32.partialorder %v4342_v58, 0.0  ;;  %v4350_v0 = vmul.f32 0.2, %v4342_v58  ;;  %v4352_v1 = vmul.f32 0.2, %v4344_v59  ;;  %vm4348_vm3 = vcmp.ge.f32.partialorder %v4344_v59, 0.0 }
 0x31c   :  { %v4353_v2 = vsel %vm4345_vm0, %v4341_v54, %v4349_v62  ;;  %v4355_v5 = vsel %vm4347_vm1, %v4343_v55, %v4351_v63  ;;  %v4436_v47 = vrot.slane %v4435_v46, 4 }
 0x31d   :  { %v4354_v4 = vsel %vm4346_vm2, %v4342_v58, %v4350_v0  ;;  %v4379_v6 = vmul.f32 %v4362_v60, %v4353_v2  ;;  %v4356_v9 = vsel %vm4348_vm3, %v4344_v59, %v4352_v1  ;;  %v4381_v10 = vmul.f32 %v4370_v3, %v4355_v5 }
 0x31e   :  { %v4380_v8 = vmul.f32 %v4366_v61, %v4354_v4  ;;  %v4382_v13 = vmul.f32 %v4374_v7, %v4356_v9  ;;  %v4437_v48 = vadd.f32 %v4436_v47, %v4435_v46 }
 0x320   :  { %v4383_v12 = vadd.f32 %v4380_v8, %v4379_v6  ;;  %v4438_v49 = vrot.slane %v4437_v48, 2 }
 0x322   :  { %v4384_v15 = vadd.f32 %v4383_v12, %v4381_v10  ;;  %v4439_v53 = vadd.f32 %v4438_v49, %v4437_v48 }
 0x324   :  { %v4385_v11 = vadd.f32 %v4384_v15, %v4382_v13  ;;  %v4440_v24 = vrot.slane %v4439_v53, 1 }
 0x326   :  { %4386 = vadd.xlane.f32.xlu0 %v4385_v11  ;;  %v4441_v58 = vadd.f32 %v4440_v24, %v4439_v53 }
 0x3b3   :  { %v4387_v26 = vpop.xlane.xlu0 %4386 }
 0x3b4   :  { %v4401_v16 = vand.u32 2147483647, %v4387_v26  ;;  %v5058_v29 = vmul.f32 -1.442695, %v4387_v26  ;;  %v4399_v27 = vsub.f32 0.0, %v4387_v26 }
 0x3b6   :  { %v4402_v28 = vsub.f32 0.0, %v4401_v16  ;;  %v4400_v36 = vmax.f32 %v4399_v27, 0.0 }
 0x3b8   :  { %v4403_v30 = vmul.f32 1.442695, %v4402_v28 }
 0x3ba   :  { %6011 = vpow2.f32 %v4403_v30 }
 0x3bb   :  { %6013 = vpow2.f32 %v5058_v29 }
 0x3c4   :  { %v6012_v31 = vpop.eup %6011 }
 0x3c5   :  { %v4405_v32 = vadd.f32 1.0, %v6012_v31  ;;  %v6014_v33 = vpop.eup %6013 }
 0x3c6   :  { %v4396_v34 = vadd.f32 1.0, %v6014_v33 }
 0x3c7   :  { %6015 = vlog2.f32 %v4405_v32 }
 0x3c8   :  { %6017 = vrcp.f32 %v4396_v34 }
 0x3d1   :  { %v6016_v35 = vpop.eup %6015 }
 0x3d2   :  { %v4407_v37 = vmul.f32 0.6931472, %v6016_v35  ;;  %v6018_v40 = vpop.eup %6017 }
 0x3d4   :  { %v4408_v38 = vadd.f32 %v4407_v37, %v4400_v36 }
 0x3d6   :  { %v4409_v39 = vmin.f32 %v4408_v38, 100.0 }
 0x3d8   :  { %v4410_v43 = vsub.f32 %v4409_v39, %v6018_v40 }
 0x3da   :  { %v4411_v44 = vmul.f32 %v5057_v42, %v4410_v43 }
 0x3dc   :  { %v4413_v45 = vsel %vm4412_vm5, %v4411_v44, 0.0 }
 0x3dd   :  { %4414 = vadd.xlane.f32.xlu0 %v4413_v45 }
 0x46a   :  { %v4415_v50 = vpop.xlane.xlu0 %4414 }
 0x46b   :  { %v4416_v51 = vrot.slane %v4415_v50, 4 }
 0x46d   :  { %v4417_v52 = vadd.f32 %v4416_v51, %v4415_v50 }
 0x46f   :  { %v4418_v54 = vrot.slane %v4417_v52, 2 }
 0x471   :  { %v4419_v55 = vadd.f32 %v4418_v54, %v4417_v52 }
 0x473   :  { %v4420_v56 = vrot.slane %v4419_v55, 1 }
 0x475   :  { %v4421_v57 = vadd.f32 %v4420_v56, %v4419_v55 }
 0x477   :  { %5123 = vpush %v4421_v57 }
 0x478   :  { %5125 = vpush %v4441_v58 }
 0x4a8   :  { %s5124_s5 = spop %5123 }
 0x4a9   :  { %s5126_s6 = spop %5125  ;;  %v4423_v59 = vstv %s5124_s5 }
 0x4aa   :  { %v4443_v60 = vstv %s5126_s6  ;;  %v4424_v62 = vmul.f32 0.5, %v4423_v59 }
 0x4ab   :  { %v4444_v61 = vmul.f32 0.00048828125, %v4443_v60 }
 0x4ad   :  { %v4445_v63 = vmul.f32 100.0, %v4444_v61 }
 0x4af   :  { %v4446_v0 = vadd.f32 %v4445_v63, %v4424_v62 }
 0x4b1   :  { %4448 = vst.msk [vmem:[#allocation2] sm:$0x1] %vm4447_vm6, %v4446_v0 }
 0x4b2   :  { %6030 = shalt.err (!%p6027_p4)
}
 0x4b3   :  { %s6031_s8 = scalar_lea.hbm %s7935_s7, 16 }
 0x4b4   :  { %p6032_p5 = scmp.ne.s32.totalorder %s7935_s7, %s6031_s8  ;;  %p6035_p6 = scmp.lt.u32.totalorder %s6031_s8, %s7935_s7 }
 0x4b6   :  { %p6037_p7 = pnand %p6035_p6, %p6032_p5 }
 0x4b8   :  { %6040 = shalt.err (!%p6037_p7)
}
 0x4b9   :  { %4458 = dma.vmem_to_hbm [thread:$0]  %s4456_s26, 16, %s7935_s7, [#allocation3]  }
 0x4ba   :  { %6041 = dma.done.wait [#allocation3], 16  }
 0x4bb   :  { %6042 = vsyncadd [#allocation3], 4294967280 }
 0x4bc   :  { %4462 = vsyncpa [#allocation3], 1 }

</bundles_post_ra>
